<compile_context>
chip_gen: v5e
topology: v5e:2x2
jax: 0.10.0
libtpu: 0.0.40
codegen_flags: <defaults>
</compile_context>

<pallas_src>
import jax
import jax.numpy as jnp
from jax.experimental import pallas as pl
from jax.experimental.pallas import tpu as pltpu


# ----------------------------- model config ---------------------------------
BATCH = 2
IN_CHANS = 3
IMG = 16
PATCH = 4
EMBED_DIM = 32
DEPTH = 2
NUM_HEADS = 4
MLP_RATIO = 4
NUM_CLASSES = 10
LN_EPS = 1e-6

NUM_PATCHES = (IMG // PATCH) * (IMG // PATCH)          # 16
NUM_TOKENS = NUM_PATCHES + 1                           # 17 (cls token)
NT_PAD = 32                                            # tokens padded to 8-multiple
HEAD_DIM = EMBED_DIM // NUM_HEADS                      # 8
ATTN_SCALE = HEAD_DIM ** -0.5
NUM_CLASSES_PAD = 128                                  # lane-dense logits slab


# ------------------------------ helpers --------------------------------------
def _gelu_tanh(x):
    # tanh approximation of GELU.
    # TODO(synk): PyTorch nn.GELU default is erf-exact; tanh approx differs ~1e-3.
    c = jnp.float32(0.7978845608028654)  # sqrt(2/pi)
    return 0.5 * x * (1.0 + jnp.tanh(c * (x + 0.044715 * x * x * x)))


# ------------------------------ fused kernel ----------------------------------
def _fused_vit_kernel(
    xp_ref, patch_w_ref, patch_b_ref, cls_ref, pos_ref,
    ln1_g_ref, ln1_b_ref, qkv_w_ref, qkv_b_ref, proj_w_ref, proj_b_ref,
    ln2_g_ref, ln2_b_ref, fc1_w_ref, fc1_b_ref, fc2_w_ref, fc2_b_ref,
    lnf_g_ref, lnf_b_ref, head_w_ref, head_b_ref,
    o_ref,
    xt_ref, qkv_ref,
):
    D, nh, dh = EMBED_DIM, NUM_HEADS, HEAD_DIM

    def layernorm(x, g, b):
        mu = jnp.mean(x, axis=-1, keepdims=True)
        xc = x - mu
        var = jnp.mean(xc * xc, axis=-1, keepdims=True)
        return xc * jax.lax.rsqrt(var + LN_EPS) * g + b

    # --- patch embedding: (NUM_PATCHES, C*p*p) @ (C*p*p, D) ---
    ptok = jnp.dot(xp_ref[0], patch_w_ref[...],
                   preferred_element_type=jnp.float32) + patch_b_ref[...]

    # --- assemble padded token slab [cls; patches; zero pad] + pos ---
    xt_ref[...] = jnp.zeros((NT_PAD, D), jnp.float32)
    xt_ref[0:1, :] = cls_ref[...] + pos_ref[0:1, :]
    xt_ref[1:NUM_TOKENS, :] = ptok + pos_ref[1:NUM_TOKENS, :]
    xt = xt_ref[...]

    # mask that zeroes attention weights on padded key positions
    key_iota = jax.lax.broadcasted_iota(jnp.int32, (1, NT_PAD), 1)
    key_mask = (key_iota < NUM_TOKENS).astype(jnp.float32)

    # --- transformer blocks (statically unrolled; weights stay in VMEM) ---
    for d in range(DEPTH):
        h1 = layernorm(xt, ln1_g_ref[d], ln1_b_ref[d])
        qkv_ref[...] = jnp.dot(h1, qkv_w_ref[d],
                               preferred_element_type=jnp.float32) + qkv_b_ref[d]

        attn_proj = jnp.zeros((NT_PAD, D), jnp.float32)
        for hh in range(nh):
            q = qkv_ref[:, hh * dh:(hh + 1) * dh]
            k = qkv_ref[:, D + hh * dh:D + (hh + 1) * dh]
            v = qkv_ref[:, 2 * D + hh * dh:2 * D + (hh + 1) * dh]
            # q @ k^T by contracting last axes of both (no explicit transpose).
            s = jax.lax.dot_general(
                q, k, (((1,), (1,)), ((), ())),
                preferred_element_type=jnp.float32) * ATTN_SCALE
            s = s - jnp.max(s, axis=-1, keepdims=True)
            p = jnp.exp(s) * key_mask
            p = p * pl.reciprocal(jnp.sum(p, axis=-1, keepdims=True), approx=True)
            o = jnp.dot(p, v, preferred_element_type=jnp.float32)
            # proj(concat_h o_h) == sum_h o_h @ proj_w[rows of head h]
            attn_proj = attn_proj + jnp.dot(
                o, proj_w_ref[d, hh * dh:(hh + 1) * dh, :],
                preferred_element_type=jnp.float32)
        xt = xt + attn_proj + proj_b_ref[d]

        h2 = layernorm(xt, ln2_g_ref[d], ln2_b_ref[d])
        m = jnp.dot(h2, fc1_w_ref[d],
                    preferred_element_type=jnp.float32) + fc1_b_ref[d]
        m = _gelu_tanh(m)
        m = jnp.dot(m, fc2_w_ref[d],
                    preferred_element_type=jnp.float32) + fc2_b_ref[d]
        xt = xt + m

    # --- final LN + linear probe on the cls row ONLY ---
    xt_ref[...] = xt
    cls_tok = xt_ref[0:1, :]                                   # (1, D)
    f = layernorm(cls_tok, lnf_g_ref[...], lnf_b_ref[...])
    logits = jnp.dot(f, head_w_ref[...],
                     preferred_element_type=jnp.float32) + head_b_ref[...]
    # lane-dense full (8,128) tile store; wrapper slices row 0 / first 10 lanes.
    o_ref[0] = jnp.broadcast_to(logits, (8, NUM_CLASSES_PAD))


# ------------------------------ parameters -----------------------------------
def init_params(key):
    ks = iter(jax.random.split(key, 64))

    def w(shape, std=0.02):
        return std * jax.random.normal(next(ks), shape, dtype=jnp.float32)

    params = {
        # patch embed: Conv2d(C, D, kernel=stride=PATCH) as a (C*p*p, D) matmul
        "patch_w": w((IN_CHANS * PATCH * PATCH, EMBED_DIM)),
        "patch_b": jnp.zeros((1, EMBED_DIM), jnp.float32),
        "cls": w((1, 1, EMBED_DIM)),
        "pos": w((1, NUM_TOKENS, EMBED_DIM)),
        "lnf_g": jnp.ones((1, EMBED_DIM), jnp.float32),
        "lnf_b": jnp.zeros((1, EMBED_DIM), jnp.float32),
        # linear probe (the only trainable part in the PyTorch module)
        "head_w": w((EMBED_DIM, NUM_CLASSES)),
        "head_b": jnp.zeros((1, NUM_CLASSES), jnp.float32),
        "blocks": [],
    }
    for _ in range(DEPTH):
        params["blocks"].append({
            "ln1_g": jnp.ones((1, EMBED_DIM), jnp.float32),
            "ln1_b": jnp.zeros((1, EMBED_DIM), jnp.float32),
            "qkv_w": w((EMBED_DIM, 3 * EMBED_DIM)),
            "qkv_b": jnp.zeros((1, 3 * EMBED_DIM), jnp.float32),
            "proj_w": w((EMBED_DIM, EMBED_DIM)),
            "proj_b": jnp.zeros((1, EMBED_DIM), jnp.float32),
            "ln2_g": jnp.ones((1, EMBED_DIM), jnp.float32),
            "ln2_b": jnp.zeros((1, EMBED_DIM), jnp.float32),
            "fc1_w": w((EMBED_DIM, MLP_RATIO * EMBED_DIM)),
            "fc1_b": jnp.zeros((1, MLP_RATIO * EMBED_DIM), jnp.float32),
            "fc2_w": w((MLP_RATIO * EMBED_DIM, EMBED_DIM)),
            "fc2_b": jnp.zeros((1, EMBED_DIM), jnp.float32),
        })
    return params


# ------------------------------ forward ---------------------------------------
def _rep_spec(shape):
    """Full-array BlockSpec replicated across the batch grid."""
    n = len(shape)
    return pl.BlockSpec(shape, lambda b, _n=n: (0,) * _n)


@jax.jit
def moco_vit_linear_probe(params, x):
    """x: (B, C, H, W) float32 (NCHW). Returns logits (B, NUM_CLASSES)."""
    B, C, H, W = x.shape
    p, D = PATCH, EMBED_DIM
    cpp = C * p * p

    # patchify (layout-only, once on the input): flatten each patch in
    # (c, ph, pw) order to match Conv2d(k=s=p) weight flattening.
    xp = x.reshape(B, C, H // p, p, W // p, p)
    xp = xp.transpose(0, 2, 4, 1, 3, 5).reshape(B, NUM_PATCHES, cpp)

    stack = lambda name: jnp.stack([blk[name] for blk in params["blocks"]], 0)
    ln1_g, ln1_b = stack("ln1_g"), stack("ln1_b")
    qkv_w, qkv_b = stack("qkv_w"), stack("qkv_b")
    proj_w, proj_b = stack("proj_w"), stack("proj_b")
    ln2_g, ln2_b = stack("ln2_g"), stack("ln2_b")
    fc1_w, fc1_b = stack("fc1_w"), stack("fc1_b")
    fc2_w, fc2_b = stack("fc2_w"), stack("fc2_b")

    # pad the probe head to 128 output lanes (sliced back below).
    head_w = jnp.zeros((D, NUM_CLASSES_PAD), jnp.float32
                       ).at[:, :NUM_CLASSES].set(params["head_w"])
    head_b = jnp.zeros((1, NUM_CLASSES_PAD), jnp.float32
                       ).at[:, :NUM_CLASSES].set(params["head_b"])

    cls_tok = params["cls"].reshape(1, D)
    pos = params["pos"].reshape(NUM_TOKENS, D)

    inputs = (xp, params["patch_w"], params["patch_b"], cls_tok, pos,
              ln1_g, ln1_b, qkv_w, qkv_b, proj_w, proj_b,
              ln2_g, ln2_b, fc1_w, fc1_b, fc2_w, fc2_b,
              params["lnf_g"], params["lnf_b"], head_w, head_b)

    in_specs = [pl.BlockSpec((1, NUM_PATCHES, cpp), lambda b: (b, 0, 0))]
    in_specs += [_rep_spec(a.shape) for a in inputs[1:]]

    out = pl.pallas_call(
        _fused_vit_kernel,
        out_shape=jax.ShapeDtypeStruct((B, 8, NUM_CLASSES_PAD), jnp.float32),
        grid=(B,),
        in_specs=in_specs,
        out_specs=pl.BlockSpec((1, 8, NUM_CLASSES_PAD), lambda b: (b, 0, 0)),
        scratch_shapes=[
            pltpu.VMEM((NT_PAD, D), jnp.float32),          # padded token slab
            pltpu.VMEM((NT_PAD, 3 * D), jnp.float32),      # fused QKV slab
        ],
        compiler_params=pltpu.CompilerParams(
            dimension_semantics=("parallel",)),
    )(*inputs)

    return out[:, 0, :NUM_CLASSES]


# ------------------------------ main ------------------------------------------
if __name__ == "__main__":
    key = jax.random.PRNGKey(0)
    kx, kp = jax.random.split(key)
    x = jax.random.normal(kx, (BATCH, IN_CHANS, IMG, IMG), dtype=jnp.float32)
    params = init_params(kp)

    logits = moco_vit_linear_probe(params, x)
    jax.block_until_ready(logits)
    assert logits.shape == (BATCH, NUM_CLASSES), logits.shape
    assert bool(jnp.all(jnp.isfinite(logits)))
    print("KERNEL_OK")
</pallas_src>

<mosaic_0001>
module attributes {stable_mosaic.version = 11 : i64} {
  func.func @_fused_vit_kernel(%arg0: i32, %arg1: memref<1x16x48xf32, #tpu.memory_space<vmem>>, %arg2: memref<48x32xf32, #tpu.memory_space<vmem>>, %arg3: memref<1x32xf32, #tpu.memory_space<vmem>>, %arg4: memref<1x32xf32, #tpu.memory_space<vmem>>, %arg5: memref<17x32xf32, #tpu.memory_space<vmem>>, %arg6: memref<2x1x32xf32, #tpu.memory_space<vmem>>, %arg7: memref<2x1x32xf32, #tpu.memory_space<vmem>>, %arg8: memref<2x32x96xf32, #tpu.memory_space<vmem>>, %arg9: memref<2x1x96xf32, #tpu.memory_space<vmem>>, %arg10: memref<2x32x32xf32, #tpu.memory_space<vmem>>, %arg11: memref<2x1x32xf32, #tpu.memory_space<vmem>>, %arg12: memref<2x1x32xf32, #tpu.memory_space<vmem>>, %arg13: memref<2x1x32xf32, #tpu.memory_space<vmem>>, %arg14: memref<2x32x128xf32, #tpu.memory_space<vmem>>, %arg15: memref<2x1x128xf32, #tpu.memory_space<vmem>>, %arg16: memref<2x128x32xf32, #tpu.memory_space<vmem>>, %arg17: memref<2x1x32xf32, #tpu.memory_space<vmem>>, %arg18: memref<1x32xf32, #tpu.memory_space<vmem>>, %arg19: memref<1x32xf32, #tpu.memory_space<vmem>>, %arg20: memref<32x128xf32, #tpu.memory_space<vmem>>, %arg21: memref<1x128xf32, #tpu.memory_space<vmem>>, %arg22: memref<1x8x128xf32, #tpu.memory_space<vmem>>, %arg23: memref<32x32xf32, #tpu.memory_space<vmem>>, %arg24: memref<32x96xf32, #tpu.memory_space<vmem>>) attributes {dimension_semantics = [#tpu.dimension_semantics<parallel>], iteration_bounds = array<i64: 2>, scalar_prefetch = 0 : i64, scratch_operands = 2 : i64, tpu.core_type = #tpu.core_type<tc>, window_params = [{transform_indices = @transform_0, window_bounds = array<i64: 1, 16, 48>}, {pipeline_mode = #tpu.pipeline_mode<synchronous>, transform_indices = @transform_1, window_bounds = array<i64: 48, 32>}, {pipeline_mode = #tpu.pipeline_mode<synchronous>, transform_indices = @transform_2, window_bounds = array<i64: 1, 32>}, {pipeline_mode = #tpu.pipeline_mode<synchronous>, transform_indices = @transform_3, window_bounds = array<i64: 1, 32>}, {pipeline_mode = #tpu.pipeline_mode<synchronous>, transform_indices = @transform_4, window_bounds = array<i64: 17, 32>}, {pipeline_mode = #tpu.pipeline_mode<synchronous>, transform_indices = @transform_5, window_bounds = array<i64: 2, 1, 32>}, {pipeline_mode = #tpu.pipeline_mode<synchronous>, transform_indices = @transform_6, window_bounds = array<i64: 2, 1, 32>}, {pipeline_mode = #tpu.pipeline_mode<synchronous>, transform_indices = @transform_7, window_bounds = array<i64: 2, 32, 96>}, {pipeline_mode = #tpu.pipeline_mode<synchronous>, transform_indices = @transform_8, window_bounds = array<i64: 2, 1, 96>}, {pipeline_mode = #tpu.pipeline_mode<synchronous>, transform_indices = @transform_9, window_bounds = array<i64: 2, 32, 32>}, {pipeline_mode = #tpu.pipeline_mode<synchronous>, transform_indices = @transform_10, window_bounds = array<i64: 2, 1, 32>}, {pipeline_mode = #tpu.pipeline_mode<synchronous>, transform_indices = @transform_11, window_bounds = array<i64: 2, 1, 32>}, {pipeline_mode = #tpu.pipeline_mode<synchronous>, transform_indices = @transform_12, window_bounds = array<i64: 2, 1, 32>}, {pipeline_mode = #tpu.pipeline_mode<synchronous>, transform_indices = @transform_13, window_bounds = array<i64: 2, 32, 128>}, {pipeline_mode = #tpu.pipeline_mode<synchronous>, transform_indices = @transform_14, window_bounds = array<i64: 2, 1, 128>}, {pipeline_mode = #tpu.pipeline_mode<synchronous>, transform_indices = @transform_15, window_bounds = array<i64: 2, 128, 32>}, {pipeline_mode = #tpu.pipeline_mode<synchronous>, transform_indices = @transform_16, window_bounds = array<i64: 2, 1, 32>}, {pipeline_mode = #tpu.pipeline_mode<synchronous>, transform_indices = @transform_17, window_bounds = array<i64: 1, 32>}, {pipeline_mode = #tpu.pipeline_mode<synchronous>, transform_indices = @transform_18, window_bounds = array<i64: 1, 32>}, {pipeline_mode = #tpu.pipeline_mode<synchronous>, transform_indices = @transform_19, window_bounds = array<i64: 32, 128>}, {pipeline_mode = #tpu.pipeline_mode<synchronous>, transform_indices = @transform_20, window_bounds = array<i64: 1, 128>}, {transform_indices = @transform_21, window_bounds = array<i64: 1, 8, 128>}]} {
    %c0 = arith.constant 0 : index
    %c0_0 = arith.constant 0 : index
    %c0_1 = arith.constant 0 : index
    %0 = vector.load %arg1[%c0, %c0_0, %c0_1] : memref<1x16x48xf32, #tpu.memory_space<vmem>>, vector<1x16x48xf32>
    %1 = vector.shape_cast %0 : vector<1x16x48xf32> to vector<16x48xf32>
    %c0_2 = arith.constant 0 : index
    %c0_3 = arith.constant 0 : index
    %2 = vector.load %arg2[%c0_2, %c0_3] : memref<48x32xf32, #tpu.memory_space<vmem>>, vector<48x32xf32>
    %cst = arith.constant dense<0.000000e+00> : vector<16x32xf32>
    %3 = tpu.matmul %1, %2, %cst {dimension_numbers = #tpu.dot_dimension_numbers<[1], [0], [0], [1], [0, 0, 1, 1], [], []>} : vector<16x48xf32>, vector<48x32xf32>, vector<16x32xf32> -> vector<16x32xf32>
    %c0_4 = arith.constant 0 : index
    %c0_5 = arith.constant 0 : index
    %4 = vector.load %arg3[%c0_4, %c0_5] : memref<1x32xf32, #tpu.memory_space<vmem>>, vector<1x32xf32>
    %5 = vector.broadcast %4 : vector<1x32xf32> to vector<16x32xf32>
    %6 = arith.addf %3, %5 : vector<16x32xf32>
    %cst_6 = arith.constant 0.000000e+00 : f32
    %7 = vector.broadcast %cst_6 : f32 to vector<32x32xf32>
    %c0_7 = arith.constant 0 : index
    %c0_8 = arith.constant 0 : index
    %8 = vector.load %arg23[%c0_7, %c0_8] : memref<32x32xf32, #tpu.memory_space<vmem>>, vector<32x32xf32>
    tpu.vector_store %arg23[%c0_7, %c0_8], %7 {strides = array<i32>} : memref<32x32xf32, #tpu.memory_space<vmem>>, vector<32x32xf32>,
    %c0_9 = arith.constant 0 : index
    %c0_10 = arith.constant 0 : index
    %9 = vector.load %arg4[%c0_9, %c0_10] : memref<1x32xf32, #tpu.memory_space<vmem>>, vector<1x32xf32>
    %c0_11 = arith.constant 0 : index
    %c0_12 = arith.constant 0 : index
    %10 = vector.load %arg5[%c0_11, %c0_12] : memref<17x32xf32, #tpu.memory_space<vmem>>, vector<1x32xf32>
    %11 = arith.addf %9, %10 : vector<1x32xf32>
    %c0_13 = arith.constant 0 : index
    %c0_14 = arith.constant 0 : index
    %12 = vector.load %arg23[%c0_13, %c0_14] : memref<32x32xf32, #tpu.memory_space<vmem>>, vector<1x32xf32>
    tpu.vector_store %arg23[%c0_13, %c0_14], %11 {strides = array<i32>} : memref<32x32xf32, #tpu.memory_space<vmem>>, vector<1x32xf32>,
    %c1 = arith.constant 1 : index
    %c0_15 = arith.constant 0 : index
    %13 = vector.load %arg5[%c1, %c0_15] : memref<17x32xf32, #tpu.memory_space<vmem>>, vector<16x32xf32>
    %14 = arith.addf %6, %13 : vector<16x32xf32>
    %c1_16 = arith.constant 1 : index
    %c0_17 = arith.constant 0 : index
    %15 = vector.load %arg23[%c1_16, %c0_17] : memref<32x32xf32, #tpu.memory_space<vmem>>, vector<16x32xf32>
    tpu.vector_store %arg23[%c1_16, %c0_17], %14 {strides = array<i32>} : memref<32x32xf32, #tpu.memory_space<vmem>>, vector<16x32xf32>,
    %c0_18 = arith.constant 0 : index
    %c0_19 = arith.constant 0 : index
    %16 = vector.load %arg23[%c0_18, %c0_19] : memref<32x32xf32, #tpu.memory_space<vmem>>, vector<32x32xf32>
    %17 = tpu.iota {dimensions = array<i32: 1>} : vector<1x32xi32>
    %c17_i32 = arith.constant 17 : i32
    %18 = vector.broadcast %c17_i32 : i32 to vector<1x32xi32>
    %19 = arith.cmpi slt, %17, %18 : vector<1x32xi32>
    %20 = arith.extui %19 : vector<1x32xi1> to vector<1x32xi32>
    %21 = arith.sitofp %20 : vector<1x32xi32> to vector<1x32xf32>
    %c0_20 = arith.constant 0 : index
    %c0_21 = arith.constant 0 : index
    %c0_22 = arith.constant 0 : index
    %22 = vector.load %arg6[%c0_20, %c0_21, %c0_22] : memref<2x1x32xf32, #tpu.memory_space<vmem>>, vector<1x1x32xf32>
    %23 = vector.shape_cast %22 : vector<1x1x32xf32> to vector<1x32xf32>
    %c0_23 = arith.constant 0 : index
    %c0_24 = arith.constant 0 : index
    %c0_25 = arith.constant 0 : index
    %24 = vector.load %arg7[%c0_23, %c0_24, %c0_25] : memref<2x1x32xf32, #tpu.memory_space<vmem>>, vector<1x1x32xf32>
    %25 = vector.shape_cast %24 : vector<1x1x32xf32> to vector<1x32xf32>
    %cst_26 = arith.constant dense<0.000000e+00> : vector<32xf32>
    %26 = vector.multi_reduction <add>, %16, %cst_26 [1] : vector<32x32xf32> to vector<32xf32>
    %27 = vector.shape_cast %26 : vector<32xf32> to vector<32x1xf32>
    %cst_27 = arith.constant 3.200000e+01 : f32
    %28 = vector.broadcast %cst_27 : f32 to vector<32x1xf32>
    %29 = arith.divf %27, %28 : vector<32x1xf32>
    %30 = vector.broadcast %29 : vector<32x1xf32> to vector<32x32xf32>
    %31 = arith.subf %16, %30 : vector<32x32xf32>
    %32 = arith.mulf %31, %31 : vector<32x32xf32>
    %cst_28 = arith.constant dense<0.000000e+00> : vector<32xf32>
    %33 = vector.multi_reduction <add>, %32, %cst_28 [1] : vector<32x32xf32> to vector<32xf32>
    %34 = vector.shape_cast %33 : vector<32xf32> to vector<32x1xf32>
    %cst_29 = arith.constant 3.200000e+01 : f32
    %35 = vector.broadcast %cst_29 : f32 to vector<32x1xf32>
    %36 = arith.divf %34, %35 : vector<32x1xf32>
    %cst_30 = arith.constant 9.99999997E-7 : f32
    %37 = vector.broadcast %cst_30 : f32 to vector<32x1xf32>
    %38 = arith.addf %36, %37 : vector<32x1xf32>
    %39 = math.rsqrt %38 : vector<32x1xf32>
    %40 = vector.broadcast %39 : vector<32x1xf32> to vector<32x32xf32>
    %41 = arith.mulf %31, %40 : vector<32x32xf32>
    %42 = vector.broadcast %23 : vector<1x32xf32> to vector<32x32xf32>
    %43 = arith.mulf %41, %42 : vector<32x32xf32>
    %44 = vector.broadcast %25 : vector<1x32xf32> to vector<32x32xf32>
    %45 = arith.addf %43, %44 : vector<32x32xf32>
    %c0_31 = arith.constant 0 : index
    %c0_32 = arith.constant 0 : index
    %c0_33 = arith.constant 0 : index
    %46 = vector.load %arg8[%c0_31, %c0_32, %c0_33] : memref<2x32x96xf32, #tpu.memory_space<vmem>>, vector<1x32x96xf32>
    %47 = vector.shape_cast %46 : vector<1x32x96xf32> to vector<32x96xf32>
    %cst_34 = arith.constant dense<0.000000e+00> : vector<32x96xf32>
    %48 = tpu.matmul %45, %47, %cst_34 {dimension_numbers = #tpu.dot_dimension_numbers<[1], [0], [0], [1], [0, 0, 1, 1], [], []>} : vector<32x32xf32>, vector<32x96xf32>, vector<32x96xf32> -> vector<32x96xf32>
    %c0_35 = arith.constant 0 : index
    %c0_36 = arith.constant 0 : index
    %c0_37 = arith.constant 0 : index
    %49 = vector.load %arg9[%c0_35, %c0_36, %c0_37] : memref<2x1x96xf32, #tpu.memory_space<vmem>>, vector<1x1x96xf32>
    %50 = vector.shape_cast %49 : vector<1x1x96xf32> to vector<1x96xf32>
    %51 = vector.broadcast %50 : vector<1x96xf32> to vector<32x96xf32>
    %52 = arith.addf %48, %51 : vector<32x96xf32>
    %c0_38 = arith.constant 0 : index
    %c0_39 = arith.constant 0 : index
    %53 = vector.load %arg24[%c0_38, %c0_39] : memref<32x96xf32, #tpu.memory_space<vmem>>, vector<32x96xf32>
    tpu.vector_store %arg24[%c0_38, %c0_39], %52 {strides = array<i32>} : memref<32x96xf32, #tpu.memory_space<vmem>>, vector<32x96xf32>,
    %cst_40 = arith.constant 0.000000e+00 : f32
    %54 = vector.broadcast %cst_40 : f32 to vector<32x32xf32>
    %c0_41 = arith.constant 0 : index
    %c0_42 = arith.constant 0 : index
    %55 = vector.load %arg24[%c0_41, %c0_42] : memref<32x96xf32, #tpu.memory_space<vmem>>, vector<32x8xf32>
    %c0_43 = arith.constant 0 : index
    %c32 = arith.constant 32 : index
    %56 = vector.load %arg24[%c0_43, %c32] : memref<32x96xf32, #tpu.memory_space<vmem>>, vector<32x8xf32>
    %c0_44 = arith.constant 0 : index
    %c64 = arith.constant 64 : index
    %57 = vector.load %arg24[%c0_44, %c64] : memref<32x96xf32, #tpu.memory_space<vmem>>, vector<32x8xf32>
    %cst_45 = arith.constant dense<0.000000e+00> : vector<32x32xf32>
    %58 = tpu.matmul %55, %56, %cst_45 {dimension_numbers = #tpu.dot_dimension_numbers<[1], [1], [0], [0], [0, 0, 1, 0], [], []>} : vector<32x8xf32>, vector<32x8xf32>, vector<32x32xf32> -> vector<32x32xf32>
    %cst_46 = arith.constant 0.353553385 : f32
    %59 = vector.broadcast %cst_46 : f32 to vector<32x32xf32>
    %60 = arith.mulf %58, %59 : vector<32x32xf32>
    %cst_47 = arith.constant dense<0xFF800000> : vector<32xf32>
    %61 = vector.multi_reduction <maximumf>, %60, %cst_47 [1] : vector<32x32xf32> to vector<32xf32>
    %62 = vector.shape_cast %61 : vector<32xf32> to vector<32x1xf32>
    %63 = vector.broadcast %62 : vector<32x1xf32> to vector<32x32xf32>
    %64 = arith.subf %60, %63 : vector<32x32xf32>
    %65 = math.exp %64 : vector<32x32xf32>
    %66 = vector.broadcast %21 : vector<1x32xf32> to vector<32x32xf32>
    %67 = arith.mulf %65, %66 : vector<32x32xf32>
    %cst_48 = arith.constant dense<0.000000e+00> : vector<32xf32>
    %68 = vector.multi_reduction <add>, %67, %cst_48 [1] : vector<32x32xf32> to vector<32xf32>
    %69 = vector.shape_cast %68 : vector<32xf32> to vector<32x1xf32>
    %70 = tpu.reciprocal %69 {approx = true} : vector<32x1xf32> -> vector<32x1xf32>
    %71 = vector.broadcast %70 : vector<32x1xf32> to vector<32x32xf32>
    %72 = arith.mulf %67, %71 : vector<32x32xf32>
    %cst_49 = arith.constant dense<0.000000e+00> : vector<32x8xf32>
    %73 = tpu.matmul %72, %57, %cst_49 {dimension_numbers = #tpu.dot_dimension_numbers<[1], [0], [0], [1], [0, 0, 1, 1], [], []>} : vector<32x32xf32>, vector<32x8xf32>, vector<32x8xf32> -> vector<32x8xf32>
    %c0_50 = arith.constant 0 : index
    %c0_51 = arith.constant 0 : index
    %c0_52 = arith.constant 0 : index
    %74 = vector.load %arg10[%c0_50, %c0_51, %c0_52] : memref<2x32x32xf32, #tpu.memory_space<vmem>>, vector<1x8x32xf32>
    %75 = vector.shape_cast %74 : vector<1x8x32xf32> to vector<8x32xf32>
    %cst_53 = arith.constant dense<0.000000e+00> : vector<32x32xf32>
    %76 = tpu.matmul %73, %75, %cst_53 {dimension_numbers = #tpu.dot_dimension_numbers<[1], [0], [0], [1], [0, 0, 1, 1], [], []>} : vector<32x8xf32>, vector<8x32xf32>, vector<32x32xf32> -> vector<32x32xf32>
    %77 = arith.addf %54, %76 : vector<32x32xf32>
    %c0_54 = arith.constant 0 : index
    %c8 = arith.constant 8 : index
    %78 = vector.load %arg24[%c0_54, %c8] : memref<32x96xf32, #tpu.memory_space<vmem>>, vector<32x8xf32>
    %c0_55 = arith.constant 0 : index
    %c40 = arith.constant 40 : index
    %79 = vector.load %arg24[%c0_55, %c40] : memref<32x96xf32, #tpu.memory_space<vmem>>, vector<32x8xf32>
    %c0_56 = arith.constant 0 : index
    %c72 = arith.constant 72 : index
    %80 = vector.load %arg24[%c0_56, %c72] : memref<32x96xf32, #tpu.memory_space<vmem>>, vector<32x8xf32>
    %cst_57 = arith.constant dense<0.000000e+00> : vector<32x32xf32>
    %81 = tpu.matmul %78, %79, %cst_57 {dimension_numbers = #tpu.dot_dimension_numbers<[1], [1], [0], [0], [0, 0, 1, 0], [], []>} : vector<32x8xf32>, vector<32x8xf32>, vector<32x32xf32> -> vector<32x32xf32>
    %cst_58 = arith.constant 0.353553385 : f32
    %82 = vector.broadcast %cst_58 : f32 to vector<32x32xf32>
    %83 = arith.mulf %81, %82 : vector<32x32xf32>
    %cst_59 = arith.constant dense<0xFF800000> : vector<32xf32>
    %84 = vector.multi_reduction <maximumf>, %83, %cst_59 [1] : vector<32x32xf32> to vector<32xf32>
    %85 = vector.shape_cast %84 : vector<32xf32> to vector<32x1xf32>
    %86 = vector.broadcast %85 : vector<32x1xf32> to vector<32x32xf32>
    %87 = arith.subf %83, %86 : vector<32x32xf32>
    %88 = math.exp %87 : vector<32x32xf32>
    %89 = vector.broadcast %21 : vector<1x32xf32> to vector<32x32xf32>
    %90 = arith.mulf %88, %89 : vector<32x32xf32>
    %cst_60 = arith.constant dense<0.000000e+00> : vector<32xf32>
    %91 = vector.multi_reduction <add>, %90, %cst_60 [1] : vector<32x32xf32> to vector<32xf32>
    %92 = vector.shape_cast %91 : vector<32xf32> to vector<32x1xf32>
    %93 = tpu.reciprocal %92 {approx = true} : vector<32x1xf32> -> vector<32x1xf32>
    %94 = vector.broadcast %93 : vector<32x1xf32> to vector<32x32xf32>
    %95 = arith.mulf %90, %94 : vector<32x32xf32>
    %cst_61 = arith.constant dense<0.000000e+00> : vector<32x8xf32>
    %96 = tpu.matmul %95, %80, %cst_61 {dimension_numbers = #tpu.dot_dimension_numbers<[1], [0], [0], [1], [0, 0, 1, 1], [], []>} : vector<32x32xf32>, vector<32x8xf32>, vector<32x8xf32> -> vector<32x8xf32>
    %c0_62 = arith.constant 0 : index
    %c8_63 = arith.constant 8 : index
    %c0_64 = arith.constant 0 : index
    %97 = vector.load %arg10[%c0_62, %c8_63, %c0_64] : memref<2x32x32xf32, #tpu.memory_space<vmem>>, vector<1x8x32xf32>
    %98 = vector.shape_cast %97 : vector<1x8x32xf32> to vector<8x32xf32>
    %cst_65 = arith.constant dense<0.000000e+00> : vector<32x32xf32>
    %99 = tpu.matmul %96, %98, %cst_65 {dimension_numbers = #tpu.dot_dimension_numbers<[1], [0], [0], [1], [0, 0, 1, 1], [], []>} : vector<32x8xf32>, vector<8x32xf32>, vector<32x32xf32> -> vector<32x32xf32>
    %100 = arith.addf %77, %99 : vector<32x32xf32>
    %c0_66 = arith.constant 0 : index
    %c16 = arith.constant 16 : index
    %101 = vector.load %arg24[%c0_66, %c16] : memref<32x96xf32, #tpu.memory_space<vmem>>, vector<32x8xf32>
    %c0_67 = arith.constant 0 : index
    %c48 = arith.constant 48 : index
    %102 = vector.load %arg24[%c0_67, %c48] : memref<32x96xf32, #tpu.memory_space<vmem>>, vector<32x8xf32>
    %c0_68 = arith.constant 0 : index
    %c80 = arith.constant 80 : index
    %103 = vector.load %arg24[%c0_68, %c80] : memref<32x96xf32, #tpu.memory_space<vmem>>, vector<32x8xf32>
    %cst_69 = arith.constant dense<0.000000e+00> : vector<32x32xf32>
    %104 = tpu.matmul %101, %102, %cst_69 {dimension_numbers = #tpu.dot_dimension_numbers<[1], [1], [0], [0], [0, 0, 1, 0], [], []>} : vector<32x8xf32>, vector<32x8xf32>, vector<32x32xf32> -> vector<32x32xf32>
    %cst_70 = arith.constant 0.353553385 : f32
    %105 = vector.broadcast %cst_70 : f32 to vector<32x32xf32>
    %106 = arith.mulf %104, %105 : vector<32x32xf32>
    %cst_71 = arith.constant dense<0xFF800000> : vector<32xf32>
    %107 = vector.multi_reduction <maximumf>, %106, %cst_71 [1] : vector<32x32xf32> to vector<32xf32>
    %108 = vector.shape_cast %107 : vector<32xf32> to vector<32x1xf32>
    %109 = vector.broadcast %108 : vector<32x1xf32> to vector<32x32xf32>
    %110 = arith.subf %106, %109 : vector<32x32xf32>
    %111 = math.exp %110 : vector<32x32xf32>
    %112 = vector.broadcast %21 : vector<1x32xf32> to vector<32x32xf32>
    %113 = arith.mulf %111, %112 : vector<32x32xf32>
    %cst_72 = arith.constant dense<0.000000e+00> : vector<32xf32>
    %114 = vector.multi_reduction <add>, %113, %cst_72 [1] : vector<32x32xf32> to vector<32xf32>
    %115 = vector.shape_cast %114 : vector<32xf32> to vector<32x1xf32>
    %116 = tpu.reciprocal %115 {approx = true} : vector<32x1xf32> -> vector<32x1xf32>
    %117 = vector.broadcast %116 : vector<32x1xf32> to vector<32x32xf32>
    %118 = arith.mulf %113, %117 : vector<32x32xf32>
    %cst_73 = arith.constant dense<0.000000e+00> : vector<32x8xf32>
    %119 = tpu.matmul %118, %103, %cst_73 {dimension_numbers = #tpu.dot_dimension_numbers<[1], [0], [0], [1], [0, 0, 1, 1], [], []>} : vector<32x32xf32>, vector<32x8xf32>, vector<32x8xf32> -> vector<32x8xf32>
    %c0_74 = arith.constant 0 : index
    %c16_75 = arith.constant 16 : index
    %c0_76 = arith.constant 0 : index
    %120 = vector.load %arg10[%c0_74, %c16_75, %c0_76] : memref<2x32x32xf32, #tpu.memory_space<vmem>>, vector<1x8x32xf32>
    %121 = vector.shape_cast %120 : vector<1x8x32xf32> to vector<8x32xf32>
    %cst_77 = arith.constant dense<0.000000e+00> : vector<32x32xf32>
    %122 = tpu.matmul %119, %121, %cst_77 {dimension_numbers = #tpu.dot_dimension_numbers<[1], [0], [0], [1], [0, 0, 1, 1], [], []>} : vector<32x8xf32>, vector<8x32xf32>, vector<32x32xf32> -> vector<32x32xf32>
    %123 = arith.addf %100, %122 : vector<32x32xf32>
    %c0_78 = arith.constant 0 : index
    %c24 = arith.constant 24 : index
    %124 = vector.load %arg24[%c0_78, %c24] : memref<32x96xf32, #tpu.memory_space<vmem>>, vector<32x8xf32>
    %c0_79 = arith.constant 0 : index
    %c56 = arith.constant 56 : index
    %125 = vector.load %arg24[%c0_79, %c56] : memref<32x96xf32, #tpu.memory_space<vmem>>, vector<32x8xf32>
    %c0_80 = arith.constant 0 : index
    %c88 = arith.constant 88 : index
    %126 = vector.load %arg24[%c0_80, %c88] : memref<32x96xf32, #tpu.memory_space<vmem>>, vector<32x8xf32>
    %cst_81 = arith.constant dense<0.000000e+00> : vector<32x32xf32>
    %127 = tpu.matmul %124, %125, %cst_81 {dimension_numbers = #tpu.dot_dimension_numbers<[1], [1], [0], [0], [0, 0, 1, 0], [], []>} : vector<32x8xf32>, vector<32x8xf32>, vector<32x32xf32> -> vector<32x32xf32>
    %cst_82 = arith.constant 0.353553385 : f32
    %128 = vector.broadcast %cst_82 : f32 to vector<32x32xf32>
    %129 = arith.mulf %127, %128 : vector<32x32xf32>
    %cst_83 = arith.constant dense<0xFF800000> : vector<32xf32>
    %130 = vector.multi_reduction <maximumf>, %129, %cst_83 [1] : vector<32x32xf32> to vector<32xf32>
    %131 = vector.shape_cast %130 : vector<32xf32> to vector<32x1xf32>
    %132 = vector.broadcast %131 : vector<32x1xf32> to vector<32x32xf32>
    %133 = arith.subf %129, %132 : vector<32x32xf32>
    %134 = math.exp %133 : vector<32x32xf32>
    %135 = vector.broadcast %21 : vector<1x32xf32> to vector<32x32xf32>
    %136 = arith.mulf %134, %135 : vector<32x32xf32>
    %cst_84 = arith.constant dense<0.000000e+00> : vector<32xf32>
    %137 = vector.multi_reduction <add>, %136, %cst_84 [1] : vector<32x32xf32> to vector<32xf32>
    %138 = vector.shape_cast %137 : vector<32xf32> to vector<32x1xf32>
    %139 = tpu.reciprocal %138 {approx = true} : vector<32x1xf32> -> vector<32x1xf32>
    %140 = vector.broadcast %139 : vector<32x1xf32> to vector<32x32xf32>
    %141 = arith.mulf %136, %140 : vector<32x32xf32>
    %cst_85 = arith.constant dense<0.000000e+00> : vector<32x8xf32>
    %142 = tpu.matmul %141, %126, %cst_85 {dimension_numbers = #tpu.dot_dimension_numbers<[1], [0], [0], [1], [0, 0, 1, 1], [], []>} : vector<32x32xf32>, vector<32x8xf32>, vector<32x8xf32> -> vector<32x8xf32>
    %c0_86 = arith.constant 0 : index
    %c24_87 = arith.constant 24 : index
    %c0_88 = arith.constant 0 : index
    %143 = vector.load %arg10[%c0_86, %c24_87, %c0_88] : memref<2x32x32xf32, #tpu.memory_space<vmem>>, vector<1x8x32xf32>
    %144 = vector.shape_cast %143 : vector<1x8x32xf32> to vector<8x32xf32>
    %cst_89 = arith.constant dense<0.000000e+00> : vector<32x32xf32>
    %145 = tpu.matmul %142, %144, %cst_89 {dimension_numbers = #tpu.dot_dimension_numbers<[1], [0], [0], [1], [0, 0, 1, 1], [], []>} : vector<32x8xf32>, vector<8x32xf32>, vector<32x32xf32> -> vector<32x32xf32>
    %146 = arith.addf %123, %145 : vector<32x32xf32>
    %147 = arith.addf %16, %146 : vector<32x32xf32>
    %c0_90 = arith.constant 0 : index
    %c0_91 = arith.constant 0 : index
    %c0_92 = arith.constant 0 : index
    %148 = vector.load %arg11[%c0_90, %c0_91, %c0_92] : memref<2x1x32xf32, #tpu.memory_space<vmem>>, vector<1x1x32xf32>
    %149 = vector.shape_cast %148 : vector<1x1x32xf32> to vector<1x32xf32>
    %150 = vector.broadcast %149 : vector<1x32xf32> to vector<32x32xf32>
    %151 = arith.addf %147, %150 : vector<32x32xf32>
    %c0_93 = arith.constant 0 : index
    %c0_94 = arith.constant 0 : index
    %c0_95 = arith.constant 0 : index
    %152 = vector.load %arg12[%c0_93, %c0_94, %c0_95] : memref<2x1x32xf32, #tpu.memory_space<vmem>>, vector<1x1x32xf32>
    %153 = vector.shape_cast %152 : vector<1x1x32xf32> to vector<1x32xf32>
    %c0_96 = arith.constant 0 : index
    %c0_97 = arith.constant 0 : index
    %c0_98 = arith.constant 0 : index
    %154 = vector.load %arg13[%c0_96, %c0_97, %c0_98] : memref<2x1x32xf32, #tpu.memory_space<vmem>>, vector<1x1x32xf32>
    %155 = vector.shape_cast %154 : vector<1x1x32xf32> to vector<1x32xf32>
    %cst_99 = arith.constant dense<0.000000e+00> : vector<32xf32>
    %156 = vector.multi_reduction <add>, %151, %cst_99 [1] : vector<32x32xf32> to vector<32xf32>
    %157 = vector.shape_cast %156 : vector<32xf32> to vector<32x1xf32>
    %cst_100 = arith.constant 3.200000e+01 : f32
    %158 = vector.broadcast %cst_100 : f32 to vector<32x1xf32>
    %159 = arith.divf %157, %158 : vector<32x1xf32>
    %160 = vector.broadcast %159 : vector<32x1xf32> to vector<32x32xf32>
    %161 = arith.subf %151, %160 : vector<32x32xf32>
    %162 = arith.mulf %161, %161 : vector<32x32xf32>
    %cst_101 = arith.constant dense<0.000000e+00> : vector<32xf32>
    %163 = vector.multi_reduction <add>, %162, %cst_101 [1] : vector<32x32xf32> to vector<32xf32>
    %164 = vector.shape_cast %163 : vector<32xf32> to vector<32x1xf32>
    %cst_102 = arith.constant 3.200000e+01 : f32
    %165 = vector.broadcast %cst_102 : f32 to vector<32x1xf32>
    %166 = arith.divf %164, %165 : vector<32x1xf32>
    %cst_103 = arith.constant 9.99999997E-7 : f32
    %167 = vector.broadcast %cst_103 : f32 to vector<32x1xf32>
    %168 = arith.addf %166, %167 : vector<32x1xf32>
    %169 = math.rsqrt %168 : vector<32x1xf32>
    %170 = vector.broadcast %169 : vector<32x1xf32> to vector<32x32xf32>
    %171 = arith.mulf %161, %170 : vector<32x32xf32>
    %172 = vector.broadcast %153 : vector<1x32xf32> to vector<32x32xf32>
    %173 = arith.mulf %171, %172 : vector<32x32xf32>
    %174 = vector.broadcast %155 : vector<1x32xf32> to vector<32x32xf32>
    %175 = arith.addf %173, %174 : vector<32x32xf32>
    %c0_104 = arith.constant 0 : index
    %c0_105 = arith.constant 0 : index
    %c0_106 = arith.constant 0 : index
    %176 = vector.load %arg14[%c0_104, %c0_105, %c0_106] : memref<2x32x128xf32, #tpu.memory_space<vmem>>, vector<1x32x128xf32>
    %177 = vector.shape_cast %176 : vector<1x32x128xf32> to vector<32x128xf32>
    %cst_107 = arith.constant dense<0.000000e+00> : vector<32x128xf32>
    %178 = tpu.matmul %175, %177, %cst_107 {dimension_numbers = #tpu.dot_dimension_numbers<[1], [0], [0], [1], [0, 0, 1, 1], [], []>} : vector<32x32xf32>, vector<32x128xf32>, vector<32x128xf32> -> vector<32x128xf32>
    %c0_108 = arith.constant 0 : index
    %c0_109 = arith.constant 0 : index
    %c0_110 = arith.constant 0 : index
    %179 = vector.load %arg15[%c0_108, %c0_109, %c0_110] : memref<2x1x128xf32, #tpu.memory_space<vmem>>, vector<1x1x128xf32>
    %180 = vector.shape_cast %179 : vector<1x1x128xf32> to vector<1x128xf32>
    %181 = vector.broadcast %180 : vector<1x128xf32> to vector<32x128xf32>
    %182 = arith.addf %178, %181 : vector<32x128xf32>
    %cst_111 = arith.constant 5.000000e-01 : f32
    %183 = vector.broadcast %cst_111 : f32 to vector<32x128xf32>
    %184 = arith.mulf %183, %182 : vector<32x128xf32>
    %cst_112 = arith.constant 4.471500e-02 : f32
    %185 = vector.broadcast %cst_112 : f32 to vector<32x128xf32>
    %186 = arith.mulf %185, %182 : vector<32x128xf32>
    %187 = arith.mulf %186, %182 : vector<32x128xf32>
    %188 = arith.mulf %187, %182 : vector<32x128xf32>
    %189 = arith.addf %182, %188 : vector<32x128xf32>
    %cst_113 = arith.constant 0.797884583 : f32
    %190 = vector.broadcast %cst_113 : f32 to vector<32x128xf32>
    %191 = arith.mulf %190, %189 : vector<32x128xf32>
    %192 = math.tanh %191 : vector<32x128xf32>
    %cst_114 = arith.constant 1.000000e+00 : f32
    %193 = vector.broadcast %cst_114 : f32 to vector<32x128xf32>
    %194 = arith.addf %193, %192 : vector<32x128xf32>
    %195 = arith.mulf %184, %194 : vector<32x128xf32>
    %c0_115 = arith.constant 0 : index
    %c0_116 = arith.constant 0 : index
    %c0_117 = arith.constant 0 : index
    %196 = vector.load %arg16[%c0_115, %c0_116, %c0_117] : memref<2x128x32xf32, #tpu.memory_space<vmem>>, vector<1x128x32xf32>
    %197 = vector.shape_cast %196 : vector<1x128x32xf32> to vector<128x32xf32>
    %cst_118 = arith.constant dense<0.000000e+00> : vector<32x32xf32>
    %198 = tpu.matmul %195, %197, %cst_118 {dimension_numbers = #tpu.dot_dimension_numbers<[1], [0], [0], [1], [0, 0, 1, 1], [], []>} : vector<32x128xf32>, vector<128x32xf32>, vector<32x32xf32> -> vector<32x32xf32>
    %c0_119 = arith.constant 0 : index
    %c0_120 = arith.constant 0 : index
    %c0_121 = arith.constant 0 : index
    %199 = vector.load %arg17[%c0_119, %c0_120, %c0_121] : memref<2x1x32xf32, #tpu.memory_space<vmem>>, vector<1x1x32xf32>
    %200 = vector.shape_cast %199 : vector<1x1x32xf32> to vector<1x32xf32>
    %201 = vector.broadcast %200 : vector<1x32xf32> to vector<32x32xf32>
    %202 = arith.addf %198, %201 : vector<32x32xf32>
    %203 = arith.addf %151, %202 : vector<32x32xf32>
    %c1_122 = arith.constant 1 : index
    %c0_123 = arith.constant 0 : index
    %c0_124 = arith.constant 0 : index
    %204 = vector.load %arg6[%c1_122, %c0_123, %c0_124] : memref<2x1x32xf32, #tpu.memory_space<vmem>>, vector<1x1x32xf32>
    %205 = vector.shape_cast %204 : vector<1x1x32xf32> to vector<1x32xf32>
    %c1_125 = arith.constant 1 : index
    %c0_126 = arith.constant 0 : index
    %c0_127 = arith.constant 0 : index
    %206 = vector.load %arg7[%c1_125, %c0_126, %c0_127] : memref<2x1x32xf32, #tpu.memory_space<vmem>>, vector<1x1x32xf32>
    %207 = vector.shape_cast %206 : vector<1x1x32xf32> to vector<1x32xf32>
    %cst_128 = arith.constant dense<0.000000e+00> : vector<32xf32>
    %208 = vector.multi_reduction <add>, %203, %cst_128 [1] : vector<32x32xf32> to vector<32xf32>
    %209 = vector.shape_cast %208 : vector<32xf32> to vector<32x1xf32>
    %cst_129 = arith.constant 3.200000e+01 : f32
    %210 = vector.broadcast %cst_129 : f32 to vector<32x1xf32>
    %211 = arith.divf %209, %210 : vector<32x1xf32>
    %212 = vector.broadcast %211 : vector<32x1xf32> to vector<32x32xf32>
    %213 = arith.subf %203, %212 : vector<32x32xf32>
    %214 = arith.mulf %213, %213 : vector<32x32xf32>
    %cst_130 = arith.constant dense<0.000000e+00> : vector<32xf32>
    %215 = vector.multi_reduction <add>, %214, %cst_130 [1] : vector<32x32xf32> to vector<32xf32>
    %216 = vector.shape_cast %215 : vector<32xf32> to vector<32x1xf32>
    %cst_131 = arith.constant 3.200000e+01 : f32
    %217 = vector.broadcast %cst_131 : f32 to vector<32x1xf32>
    %218 = arith.divf %216, %217 : vector<32x1xf32>
    %cst_132 = arith.constant 9.99999997E-7 : f32
    %219 = vector.broadcast %cst_132 : f32 to vector<32x1xf32>
    %220 = arith.addf %218, %219 : vector<32x1xf32>
    %221 = math.rsqrt %220 : vector<32x1xf32>
    %222 = vector.broadcast %221 : vector<32x1xf32> to vector<32x32xf32>
    %223 = arith.mulf %213, %222 : vector<32x32xf32>
    %224 = vector.broadcast %205 : vector<1x32xf32> to vector<32x32xf32>
    %225 = arith.mulf %223, %224 : vector<32x32xf32>
    %226 = vector.broadcast %207 : vector<1x32xf32> to vector<32x32xf32>
    %227 = arith.addf %225, %226 : vector<32x32xf32>
    %c1_133 = arith.constant 1 : index
    %c0_134 = arith.constant 0 : index
    %c0_135 = arith.constant 0 : index
    %228 = vector.load %arg8[%c1_133, %c0_134, %c0_135] : memref<2x32x96xf32, #tpu.memory_space<vmem>>, vector<1x32x96xf32>
    %229 = vector.shape_cast %228 : vector<1x32x96xf32> to vector<32x96xf32>
    %cst_136 = arith.constant dense<0.000000e+00> : vector<32x96xf32>
    %230 = tpu.matmul %227, %229, %cst_136 {dimension_numbers = #tpu.dot_dimension_numbers<[1], [0], [0], [1], [0, 0, 1, 1], [], []>} : vector<32x32xf32>, vector<32x96xf32>, vector<32x96xf32> -> vector<32x96xf32>
    %c1_137 = arith.constant 1 : index
    %c0_138 = arith.constant 0 : index
    %c0_139 = arith.constant 0 : index
    %231 = vector.load %arg9[%c1_137, %c0_138, %c0_139] : memref<2x1x96xf32, #tpu.memory_space<vmem>>, vector<1x1x96xf32>
    %232 = vector.shape_cast %231 : vector<1x1x96xf32> to vector<1x96xf32>
    %233 = vector.broadcast %232 : vector<1x96xf32> to vector<32x96xf32>
    %234 = arith.addf %230, %233 : vector<32x96xf32>
    %c0_140 = arith.constant 0 : index
    %c0_141 = arith.constant 0 : index
    %235 = vector.load %arg24[%c0_140, %c0_141] : memref<32x96xf32, #tpu.memory_space<vmem>>, vector<32x96xf32>
    tpu.vector_store %arg24[%c0_140, %c0_141], %234 {strides = array<i32>} : memref<32x96xf32, #tpu.memory_space<vmem>>, vector<32x96xf32>,
    %cst_142 = arith.constant 0.000000e+00 : f32
    %236 = vector.broadcast %cst_142 : f32 to vector<32x32xf32>
    %c0_143 = arith.constant 0 : index
    %c0_144 = arith.constant 0 : index
    %237 = vector.load %arg24[%c0_143, %c0_144] : memref<32x96xf32, #tpu.memory_space<vmem>>, vector<32x8xf32>
    %c0_145 = arith.constant 0 : index
    %c32_146 = arith.constant 32 : index
    %238 = vector.load %arg24[%c0_145, %c32_146] : memref<32x96xf32, #tpu.memory_space<vmem>>, vector<32x8xf32>
    %c0_147 = arith.constant 0 : index
    %c64_148 = arith.constant 64 : index
    %239 = vector.load %arg24[%c0_147, %c64_148] : memref<32x96xf32, #tpu.memory_space<vmem>>, vector<32x8xf32>
    %cst_149 = arith.constant dense<0.000000e+00> : vector<32x32xf32>
    %240 = tpu.matmul %237, %238, %cst_149 {dimension_numbers = #tpu.dot_dimension_numbers<[1], [1], [0], [0], [0, 0, 1, 0], [], []>} : vector<32x8xf32>, vector<32x8xf32>, vector<32x32xf32> -> vector<32x32xf32>
    %cst_150 = arith.constant 0.353553385 : f32
    %241 = vector.broadcast %cst_150 : f32 to vector<32x32xf32>
    %242 = arith.mulf %240, %241 : vector<32x32xf32>
    %cst_151 = arith.constant dense<0xFF800000> : vector<32xf32>
    %243 = vector.multi_reduction <maximumf>, %242, %cst_151 [1] : vector<32x32xf32> to vector<32xf32>
    %244 = vector.shape_cast %243 : vector<32xf32> to vector<32x1xf32>
    %245 = vector.broadcast %244 : vector<32x1xf32> to vector<32x32xf32>
    %246 = arith.subf %242, %245 : vector<32x32xf32>
    %247 = math.exp %246 : vector<32x32xf32>
    %248 = vector.broadcast %21 : vector<1x32xf32> to vector<32x32xf32>
    %249 = arith.mulf %247, %248 : vector<32x32xf32>
    %cst_152 = arith.constant dense<0.000000e+00> : vector<32xf32>
    %250 = vector.multi_reduction <add>, %249, %cst_152 [1] : vector<32x32xf32> to vector<32xf32>
    %251 = vector.shape_cast %250 : vector<32xf32> to vector<32x1xf32>
    %252 = tpu.reciprocal %251 {approx = true} : vector<32x1xf32> -> vector<32x1xf32>
    %253 = vector.broadcast %252 : vector<32x1xf32> to vector<32x32xf32>
    %254 = arith.mulf %249, %253 : vector<32x32xf32>
    %cst_153 = arith.constant dense<0.000000e+00> : vector<32x8xf32>
    %255 = tpu.matmul %254, %239, %cst_153 {dimension_numbers = #tpu.dot_dimension_numbers<[1], [0], [0], [1], [0, 0, 1, 1], [], []>} : vector<32x32xf32>, vector<32x8xf32>, vector<32x8xf32> -> vector<32x8xf32>
    %c1_154 = arith.constant 1 : index
    %c0_155 = arith.constant 0 : index
    %c0_156 = arith.constant 0 : index
    %256 = vector.load %arg10[%c1_154, %c0_155, %c0_156] : memref<2x32x32xf32, #tpu.memory_space<vmem>>, vector<1x8x32xf32>
    %257 = vector.shape_cast %256 : vector<1x8x32xf32> to vector<8x32xf32>
    %cst_157 = arith.constant dense<0.000000e+00> : vector<32x32xf32>
    %258 = tpu.matmul %255, %257, %cst_157 {dimension_numbers = #tpu.dot_dimension_numbers<[1], [0], [0], [1], [0, 0, 1, 1], [], []>} : vector<32x8xf32>, vector<8x32xf32>, vector<32x32xf32> -> vector<32x32xf32>
    %259 = arith.addf %236, %258 : vector<32x32xf32>
    %c0_158 = arith.constant 0 : index
    %c8_159 = arith.constant 8 : index
    %260 = vector.load %arg24[%c0_158, %c8_159] : memref<32x96xf32, #tpu.memory_space<vmem>>, vector<32x8xf32>
    %c0_160 = arith.constant 0 : index
    %c40_161 = arith.constant 40 : index
    %261 = vector.load %arg24[%c0_160, %c40_161] : memref<32x96xf32, #tpu.memory_space<vmem>>, vector<32x8xf32>
    %c0_162 = arith.constant 0 : index
    %c72_163 = arith.constant 72 : index
    %262 = vector.load %arg24[%c0_162, %c72_163] : memref<32x96xf32, #tpu.memory_space<vmem>>, vector<32x8xf32>
    %cst_164 = arith.constant dense<0.000000e+00> : vector<32x32xf32>
    %263 = tpu.matmul %260, %261, %cst_164 {dimension_numbers = #tpu.dot_dimension_numbers<[1], [1], [0], [0], [0, 0, 1, 0], [], []>} : vector<32x8xf32>, vector<32x8xf32>, vector<32x32xf32> -> vector<32x32xf32>
    %cst_165 = arith.constant 0.353553385 : f32
    %264 = vector.broadcast %cst_165 : f32 to vector<32x32xf32>
    %265 = arith.mulf %263, %264 : vector<32x32xf32>
    %cst_166 = arith.constant dense<0xFF800000> : vector<32xf32>
    %266 = vector.multi_reduction <maximumf>, %265, %cst_166 [1] : vector<32x32xf32> to vector<32xf32>
    %267 = vector.shape_cast %266 : vector<32xf32> to vector<32x1xf32>
    %268 = vector.broadcast %267 : vector<32x1xf32> to vector<32x32xf32>
    %269 = arith.subf %265, %268 : vector<32x32xf32>
    %270 = math.exp %269 : vector<32x32xf32>
    %271 = vector.broadcast %21 : vector<1x32xf32> to vector<32x32xf32>
    %272 = arith.mulf %270, %271 : vector<32x32xf32>
    %cst_167 = arith.constant dense<0.000000e+00> : vector<32xf32>
    %273 = vector.multi_reduction <add>, %272, %cst_167 [1] : vector<32x32xf32> to vector<32xf32>
    %274 = vector.shape_cast %273 : vector<32xf32> to vector<32x1xf32>
    %275 = tpu.reciprocal %274 {approx = true} : vector<32x1xf32> -> vector<32x1xf32>
    %276 = vector.broadcast %275 : vector<32x1xf32> to vector<32x32xf32>
    %277 = arith.mulf %272, %276 : vector<32x32xf32>
    %cst_168 = arith.constant dense<0.000000e+00> : vector<32x8xf32>
    %278 = tpu.matmul %277, %262, %cst_168 {dimension_numbers = #tpu.dot_dimension_numbers<[1], [0], [0], [1], [0, 0, 1, 1], [], []>} : vector<32x32xf32>, vector<32x8xf32>, vector<32x8xf32> -> vector<32x8xf32>
    %c1_169 = arith.constant 1 : index
    %c8_170 = arith.constant 8 : index
    %c0_171 = arith.constant 0 : index
    %279 = vector.load %arg10[%c1_169, %c8_170, %c0_171] : memref<2x32x32xf32, #tpu.memory_space<vmem>>, vector<1x8x32xf32>
    %280 = vector.shape_cast %279 : vector<1x8x32xf32> to vector<8x32xf32>
    %cst_172 = arith.constant dense<0.000000e+00> : vector<32x32xf32>
    %281 = tpu.matmul %278, %280, %cst_172 {dimension_numbers = #tpu.dot_dimension_numbers<[1], [0], [0], [1], [0, 0, 1, 1], [], []>} : vector<32x8xf32>, vector<8x32xf32>, vector<32x32xf32> -> vector<32x32xf32>
    %282 = arith.addf %259, %281 : vector<32x32xf32>
    %c0_173 = arith.constant 0 : index
    %c16_174 = arith.constant 16 : index
    %283 = vector.load %arg24[%c0_173, %c16_174] : memref<32x96xf32, #tpu.memory_space<vmem>>, vector<32x8xf32>
    %c0_175 = arith.constant 0 : index
    %c48_176 = arith.constant 48 : index
    %284 = vector.load %arg24[%c0_175, %c48_176] : memref<32x96xf32, #tpu.memory_space<vmem>>, vector<32x8xf32>
    %c0_177 = arith.constant 0 : index
    %c80_178 = arith.constant 80 : index
    %285 = vector.load %arg24[%c0_177, %c80_178] : memref<32x96xf32, #tpu.memory_space<vmem>>, vector<32x8xf32>
    %cst_179 = arith.constant dense<0.000000e+00> : vector<32x32xf32>
    %286 = tpu.matmul %283, %284, %cst_179 {dimension_numbers = #tpu.dot_dimension_numbers<[1], [1], [0], [0], [0, 0, 1, 0], [], []>} : vector<32x8xf32>, vector<32x8xf32>, vector<32x32xf32> -> vector<32x32xf32>
    %cst_180 = arith.constant 0.353553385 : f32
    %287 = vector.broadcast %cst_180 : f32 to vector<32x32xf32>
    %288 = arith.mulf %286, %287 : vector<32x32xf32>
    %cst_181 = arith.constant dense<0xFF800000> : vector<32xf32>
    %289 = vector.multi_reduction <maximumf>, %288, %cst_181 [1] : vector<32x32xf32> to vector<32xf32>
    %290 = vector.shape_cast %289 : vector<32xf32> to vector<32x1xf32>
    %291 = vector.broadcast %290 : vector<32x1xf32> to vector<32x32xf32>
    %292 = arith.subf %288, %291 : vector<32x32xf32>
    %293 = math.exp %292 : vector<32x32xf32>
    %294 = vector.broadcast %21 : vector<1x32xf32> to vector<32x32xf32>
    %295 = arith.mulf %293, %294 : vector<32x32xf32>
    %cst_182 = arith.constant dense<0.000000e+00> : vector<32xf32>
    %296 = vector.multi_reduction <add>, %295, %cst_182 [1] : vector<32x32xf32> to vector<32xf32>
    %297 = vector.shape_cast %296 : vector<32xf32> to vector<32x1xf32>
    %298 = tpu.reciprocal %297 {approx = true} : vector<32x1xf32> -> vector<32x1xf32>
    %299 = vector.broadcast %298 : vector<32x1xf32> to vector<32x32xf32>
    %300 = arith.mulf %295, %299 : vector<32x32xf32>
    %cst_183 = arith.constant dense<0.000000e+00> : vector<32x8xf32>
    %301 = tpu.matmul %300, %285, %cst_183 {dimension_numbers = #tpu.dot_dimension_numbers<[1], [0], [0], [1], [0, 0, 1, 1], [], []>} : vector<32x32xf32>, vector<32x8xf32>, vector<32x8xf32> -> vector<32x8xf32>
    %c1_184 = arith.constant 1 : index
    %c16_185 = arith.constant 16 : index
    %c0_186 = arith.constant 0 : index
    %302 = vector.load %arg10[%c1_184, %c16_185, %c0_186] : memref<2x32x32xf32, #tpu.memory_space<vmem>>, vector<1x8x32xf32>
    %303 = vector.shape_cast %302 : vector<1x8x32xf32> to vector<8x32xf32>
    %cst_187 = arith.constant dense<0.000000e+00> : vector<32x32xf32>
    %304 = tpu.matmul %301, %303, %cst_187 {dimension_numbers = #tpu.dot_dimension_numbers<[1], [0], [0], [1], [0, 0, 1, 1], [], []>} : vector<32x8xf32>, vector<8x32xf32>, vector<32x32xf32> -> vector<32x32xf32>
    %305 = arith.addf %282, %304 : vector<32x32xf32>
    %c0_188 = arith.constant 0 : index
    %c24_189 = arith.constant 24 : index
    %306 = vector.load %arg24[%c0_188, %c24_189] : memref<32x96xf32, #tpu.memory_space<vmem>>, vector<32x8xf32>
    %c0_190 = arith.constant 0 : index
    %c56_191 = arith.constant 56 : index
    %307 = vector.load %arg24[%c0_190, %c56_191] : memref<32x96xf32, #tpu.memory_space<vmem>>, vector<32x8xf32>
    %c0_192 = arith.constant 0 : index
    %c88_193 = arith.constant 88 : index
    %308 = vector.load %arg24[%c0_192, %c88_193] : memref<32x96xf32, #tpu.memory_space<vmem>>, vector<32x8xf32>
    %cst_194 = arith.constant dense<0.000000e+00> : vector<32x32xf32>
    %309 = tpu.matmul %306, %307, %cst_194 {dimension_numbers = #tpu.dot_dimension_numbers<[1], [1], [0], [0], [0, 0, 1, 0], [], []>} : vector<32x8xf32>, vector<32x8xf32>, vector<32x32xf32> -> vector<32x32xf32>
    %cst_195 = arith.constant 0.353553385 : f32
    %310 = vector.broadcast %cst_195 : f32 to vector<32x32xf32>
    %311 = arith.mulf %309, %310 : vector<32x32xf32>
    %cst_196 = arith.constant dense<0xFF800000> : vector<32xf32>
    %312 = vector.multi_reduction <maximumf>, %311, %cst_196 [1] : vector<32x32xf32> to vector<32xf32>
    %313 = vector.shape_cast %312 : vector<32xf32> to vector<32x1xf32>
    %314 = vector.broadcast %313 : vector<32x1xf32> to vector<32x32xf32>
    %315 = arith.subf %311, %314 : vector<32x32xf32>
    %316 = math.exp %315 : vector<32x32xf32>
    %317 = vector.broadcast %21 : vector<1x32xf32> to vector<32x32xf32>
    %318 = arith.mulf %316, %317 : vector<32x32xf32>
    %cst_197 = arith.constant dense<0.000000e+00> : vector<32xf32>
    %319 = vector.multi_reduction <add>, %318, %cst_197 [1] : vector<32x32xf32> to vector<32xf32>
    %320 = vector.shape_cast %319 : vector<32xf32> to vector<32x1xf32>
    %321 = tpu.reciprocal %320 {approx = true} : vector<32x1xf32> -> vector<32x1xf32>
    %322 = vector.broadcast %321 : vector<32x1xf32> to vector<32x32xf32>
    %323 = arith.mulf %318, %322 : vector<32x32xf32>
    %cst_198 = arith.constant dense<0.000000e+00> : vector<32x8xf32>
    %324 = tpu.matmul %323, %308, %cst_198 {dimension_numbers = #tpu.dot_dimension_numbers<[1], [0], [0], [1], [0, 0, 1, 1], [], []>} : vector<32x32xf32>, vector<32x8xf32>, vector<32x8xf32> -> vector<32x8xf32>
    %c1_199 = arith.constant 1 : index
    %c24_200 = arith.constant 24 : index
    %c0_201 = arith.constant 0 : index
    %325 = vector.load %arg10[%c1_199, %c24_200, %c0_201] : memref<2x32x32xf32, #tpu.memory_space<vmem>>, vector<1x8x32xf32>
    %326 = vector.shape_cast %325 : vector<1x8x32xf32> to vector<8x32xf32>
    %cst_202 = arith.constant dense<0.000000e+00> : vector<32x32xf32>
    %327 = tpu.matmul %324, %326, %cst_202 {dimension_numbers = #tpu.dot_dimension_numbers<[1], [0], [0], [1], [0, 0, 1, 1], [], []>} : vector<32x8xf32>, vector<8x32xf32>, vector<32x32xf32> -> vector<32x32xf32>
    %328 = arith.addf %305, %327 : vector<32x32xf32>
    %329 = arith.addf %203, %328 : vector<32x32xf32>
    %c1_203 = arith.constant 1 : index
    %c0_204 = arith.constant 0 : index
    %c0_205 = arith.constant 0 : index
    %330 = vector.load %arg11[%c1_203, %c0_204, %c0_205] : memref<2x1x32xf32, #tpu.memory_space<vmem>>, vector<1x1x32xf32>
    %331 = vector.shape_cast %330 : vector<1x1x32xf32> to vector<1x32xf32>
    %332 = vector.broadcast %331 : vector<1x32xf32> to vector<32x32xf32>
    %333 = arith.addf %329, %332 : vector<32x32xf32>
    %c1_206 = arith.constant 1 : index
    %c0_207 = arith.constant 0 : index
    %c0_208 = arith.constant 0 : index
    %334 = vector.load %arg12[%c1_206, %c0_207, %c0_208] : memref<2x1x32xf32, #tpu.memory_space<vmem>>, vector<1x1x32xf32>
    %335 = vector.shape_cast %334 : vector<1x1x32xf32> to vector<1x32xf32>
    %c1_209 = arith.constant 1 : index
    %c0_210 = arith.constant 0 : index
    %c0_211 = arith.constant 0 : index
    %336 = vector.load %arg13[%c1_209, %c0_210, %c0_211] : memref<2x1x32xf32, #tpu.memory_space<vmem>>, vector<1x1x32xf32>
    %337 = vector.shape_cast %336 : vector<1x1x32xf32> to vector<1x32xf32>
    %cst_212 = arith.constant dense<0.000000e+00> : vector<32xf32>
    %338 = vector.multi_reduction <add>, %333, %cst_212 [1] : vector<32x32xf32> to vector<32xf32>
    %339 = vector.shape_cast %338 : vector<32xf32> to vector<32x1xf32>
    %cst_213 = arith.constant 3.200000e+01 : f32
    %340 = vector.broadcast %cst_213 : f32 to vector<32x1xf32>
    %341 = arith.divf %339, %340 : vector<32x1xf32>
    %342 = vector.broadcast %341 : vector<32x1xf32> to vector<32x32xf32>
    %343 = arith.subf %333, %342 : vector<32x32xf32>
    %344 = arith.mulf %343, %343 : vector<32x32xf32>
    %cst_214 = arith.constant dense<0.000000e+00> : vector<32xf32>
    %345 = vector.multi_reduction <add>, %344, %cst_214 [1] : vector<32x32xf32> to vector<32xf32>
    %346 = vector.shape_cast %345 : vector<32xf32> to vector<32x1xf32>
    %cst_215 = arith.constant 3.200000e+01 : f32
    %347 = vector.broadcast %cst_215 : f32 to vector<32x1xf32>
    %348 = arith.divf %346, %347 : vector<32x1xf32>
    %cst_216 = arith.constant 9.99999997E-7 : f32
    %349 = vector.broadcast %cst_216 : f32 to vector<32x1xf32>
    %350 = arith.addf %348, %349 : vector<32x1xf32>
    %351 = math.rsqrt %350 : vector<32x1xf32>
    %352 = vector.broadcast %351 : vector<32x1xf32> to vector<32x32xf32>
    %353 = arith.mulf %343, %352 : vector<32x32xf32>
    %354 = vector.broadcast %335 : vector<1x32xf32> to vector<32x32xf32>
    %355 = arith.mulf %353, %354 : vector<32x32xf32>
    %356 = vector.broadcast %337 : vector<1x32xf32> to vector<32x32xf32>
    %357 = arith.addf %355, %356 : vector<32x32xf32>
    %c1_217 = arith.constant 1 : index
    %c0_218 = arith.constant 0 : index
    %c0_219 = arith.constant 0 : index
    %358 = vector.load %arg14[%c1_217, %c0_218, %c0_219] : memref<2x32x128xf32, #tpu.memory_space<vmem>>, vector<1x32x128xf32>
    %359 = vector.shape_cast %358 : vector<1x32x128xf32> to vector<32x128xf32>
    %cst_220 = arith.constant dense<0.000000e+00> : vector<32x128xf32>
    %360 = tpu.matmul %357, %359, %cst_220 {dimension_numbers = #tpu.dot_dimension_numbers<[1], [0], [0], [1], [0, 0, 1, 1], [], []>} : vector<32x32xf32>, vector<32x128xf32>, vector<32x128xf32> -> vector<32x128xf32>
    %c1_221 = arith.constant 1 : index
    %c0_222 = arith.constant 0 : index
    %c0_223 = arith.constant 0 : index
    %361 = vector.load %arg15[%c1_221, %c0_222, %c0_223] : memref<2x1x128xf32, #tpu.memory_space<vmem>>, vector<1x1x128xf32>
    %362 = vector.shape_cast %361 : vector<1x1x128xf32> to vector<1x128xf32>
    %363 = vector.broadcast %362 : vector<1x128xf32> to vector<32x128xf32>
    %364 = arith.addf %360, %363 : vector<32x128xf32>
    %cst_224 = arith.constant 5.000000e-01 : f32
    %365 = vector.broadcast %cst_224 : f32 to vector<32x128xf32>
    %366 = arith.mulf %365, %364 : vector<32x128xf32>
    %cst_225 = arith.constant 4.471500e-02 : f32
    %367 = vector.broadcast %cst_225 : f32 to vector<32x128xf32>
    %368 = arith.mulf %367, %364 : vector<32x128xf32>
    %369 = arith.mulf %368, %364 : vector<32x128xf32>
    %370 = arith.mulf %369, %364 : vector<32x128xf32>
    %371 = arith.addf %364, %370 : vector<32x128xf32>
    %cst_226 = arith.constant 0.797884583 : f32
    %372 = vector.broadcast %cst_226 : f32 to vector<32x128xf32>
    %373 = arith.mulf %372, %371 : vector<32x128xf32>
    %374 = math.tanh %373 : vector<32x128xf32>
    %cst_227 = arith.constant 1.000000e+00 : f32
    %375 = vector.broadcast %cst_227 : f32 to vector<32x128xf32>
    %376 = arith.addf %375, %374 : vector<32x128xf32>
    %377 = arith.mulf %366, %376 : vector<32x128xf32>
    %c1_228 = arith.constant 1 : index
    %c0_229 = arith.constant 0 : index
    %c0_230 = arith.constant 0 : index
    %378 = vector.load %arg16[%c1_228, %c0_229, %c0_230] : memref<2x128x32xf32, #tpu.memory_space<vmem>>, vector<1x128x32xf32>
    %379 = vector.shape_cast %378 : vector<1x128x32xf32> to vector<128x32xf32>
    %cst_231 = arith.constant dense<0.000000e+00> : vector<32x32xf32>
    %380 = tpu.matmul %377, %379, %cst_231 {dimension_numbers = #tpu.dot_dimension_numbers<[1], [0], [0], [1], [0, 0, 1, 1], [], []>} : vector<32x128xf32>, vector<128x32xf32>, vector<32x32xf32> -> vector<32x32xf32>
    %c1_232 = arith.constant 1 : index
    %c0_233 = arith.constant 0 : index
    %c0_234 = arith.constant 0 : index
    %381 = vector.load %arg17[%c1_232, %c0_233, %c0_234] : memref<2x1x32xf32, #tpu.memory_space<vmem>>, vector<1x1x32xf32>
    %382 = vector.shape_cast %381 : vector<1x1x32xf32> to vector<1x32xf32>
    %383 = vector.broadcast %382 : vector<1x32xf32> to vector<32x32xf32>
    %384 = arith.addf %380, %383 : vector<32x32xf32>
    %385 = arith.addf %333, %384 : vector<32x32xf32>
    %c0_235 = arith.constant 0 : index
    %c0_236 = arith.constant 0 : index
    %386 = vector.load %arg23[%c0_235, %c0_236] : memref<32x32xf32, #tpu.memory_space<vmem>>, vector<32x32xf32>
    tpu.vector_store %arg23[%c0_235, %c0_236], %385 {strides = array<i32>} : memref<32x32xf32, #tpu.memory_space<vmem>>, vector<32x32xf32>,
    %c0_237 = arith.constant 0 : index
    %c0_238 = arith.constant 0 : index
    %387 = vector.load %arg23[%c0_237, %c0_238] : memref<32x32xf32, #tpu.memory_space<vmem>>, vector<1x32xf32>
    %c0_239 = arith.constant 0 : index
    %c0_240 = arith.constant 0 : index
    %388 = vector.load %arg18[%c0_239, %c0_240] : memref<1x32xf32, #tpu.memory_space<vmem>>, vector<1x32xf32>
    %c0_241 = arith.constant 0 : index
    %c0_242 = arith.constant 0 : index
    %389 = vector.load %arg19[%c0_241, %c0_242] : memref<1x32xf32, #tpu.memory_space<vmem>>, vector<1x32xf32>
    %cst_243 = arith.constant dense<0.000000e+00> : vector<1xf32>
    %390 = vector.multi_reduction <add>, %387, %cst_243 [1] : vector<1x32xf32> to vector<1xf32>
    %391 = vector.shape_cast %390 : vector<1xf32> to vector<1x1xf32>
    %cst_244 = arith.constant 3.200000e+01 : f32
    %392 = vector.broadcast %cst_244 : f32 to vector<1x1xf32>
    %393 = arith.divf %391, %392 : vector<1x1xf32>
    %394 = vector.broadcast %393 : vector<1x1xf32> to vector<1x32xf32>
    %395 = arith.subf %387, %394 : vector<1x32xf32>
    %396 = arith.mulf %395, %395 : vector<1x32xf32>
    %cst_245 = arith.constant dense<0.000000e+00> : vector<1xf32>
    %397 = vector.multi_reduction <add>, %396, %cst_245 [1] : vector<1x32xf32> to vector<1xf32>
    %398 = vector.shape_cast %397 : vector<1xf32> to vector<1x1xf32>
    %cst_246 = arith.constant 3.200000e+01 : f32
    %399 = vector.broadcast %cst_246 : f32 to vector<1x1xf32>
    %400 = arith.divf %398, %399 : vector<1x1xf32>
    %cst_247 = arith.constant 9.99999997E-7 : f32
    %401 = vector.broadcast %cst_247 : f32 to vector<1x1xf32>
    %402 = arith.addf %400, %401 : vector<1x1xf32>
    %403 = math.rsqrt %402 : vector<1x1xf32>
    %404 = vector.broadcast %403 : vector<1x1xf32> to vector<1x32xf32>
    %405 = arith.mulf %395, %404 : vector<1x32xf32>
    %406 = arith.mulf %405, %388 : vector<1x32xf32>
    %407 = arith.addf %406, %389 : vector<1x32xf32>
    %c0_248 = arith.constant 0 : index
    %c0_249 = arith.constant 0 : index
    %408 = vector.load %arg20[%c0_248, %c0_249] : memref<32x128xf32, #tpu.memory_space<vmem>>, vector<32x128xf32>
    %cst_250 = arith.constant dense<0.000000e+00> : vector<1x128xf32>
    %409 = tpu.matmul %407, %408, %cst_250 {dimension_numbers = #tpu.dot_dimension_numbers<[1], [0], [0], [1], [0, 0, 1, 1], [], []>} : vector<1x32xf32>, vector<32x128xf32>, vector<1x128xf32> -> vector<1x128xf32>
    %c0_251 = arith.constant 0 : index
    %c0_252 = arith.constant 0 : index
    %410 = vector.load %arg21[%c0_251, %c0_252] : memref<1x128xf32, #tpu.memory_space<vmem>>, vector<1x128xf32>
    %411 = arith.addf %409, %410 : vector<1x128xf32>
    %412 = vector.shape_cast %411 : vector<1x128xf32> to vector<1x128xf32>
    %413 = vector.broadcast %412 : vector<1x128xf32> to vector<8x128xf32>
    %c0_253 = arith.constant 0 : index
    %c0_254 = arith.constant 0 : index
    %c0_255 = arith.constant 0 : index
    %414 = vector.load %arg22[%c0_253, %c0_254, %c0_255] : memref<1x8x128xf32, #tpu.memory_space<vmem>>, vector<1x8x128xf32>
    %415 = vector.shape_cast %414 : vector<1x8x128xf32> to vector<8x128xf32>
    %416 = vector.shape_cast %413 : vector<8x128xf32> to vector<1x8x128xf32>
    tpu.vector_store %arg22[%c0_253, %c0_254, %c0_255], %416 {strides = array<i32>} : memref<1x8x128xf32, #tpu.memory_space<vmem>>, vector<1x8x128xf32>,
    return
  }
  func.func @transform_0(%arg0: i32) -> (i32, i32, i32) {
    %c0_i32 = arith.constant 0 : i32
    %c0_i32_0 = arith.constant 0 : i32
    %c0_i32_1 = arith.constant 0 : i32
    return %arg0, %c0_i32, %c0_i32_0 : i32, i32, i32
  }
  func.func @transform_1(%arg0: i32) -> (i32, i32) {
    %c0_i32 = arith.constant 0 : i32
    %c0_i32_0 = arith.constant 0 : i32
    %c0_i32_1 = arith.constant 0 : i32
    return %c0_i32, %c0_i32_0 : i32, i32
  }
  func.func @transform_2(%arg0: i32) -> (i32, i32) {
    %c0_i32 = arith.constant 0 : i32
    %c0_i32_0 = arith.constant 0 : i32
    %c0_i32_1 = arith.constant 0 : i32
    return %c0_i32, %c0_i32_0 : i32, i32
  }
  func.func @transform_3(%arg0: i32) -> (i32, i32) {
    %c0_i32 = arith.constant 0 : i32
    %c0_i32_0 = arith.constant 0 : i32
    %c0_i32_1 = arith.constant 0 : i32
    return %c0_i32, %c0_i32_0 : i32, i32
  }
  func.func @transform_4(%arg0: i32) -> (i32, i32) {
    %c0_i32 = arith.constant 0 : i32
    %c0_i32_0 = arith.constant 0 : i32
    %c0_i32_1 = arith.constant 0 : i32
    return %c0_i32, %c0_i32_0 : i32, i32
  }
  func.func @transform_5(%arg0: i32) -> (i32, i32, i32) {
    %c0_i32 = arith.constant 0 : i32
    %c0_i32_0 = arith.constant 0 : i32
    %c0_i32_1 = arith.constant 0 : i32
    %c0_i32_2 = arith.constant 0 : i32
    return %c0_i32, %c0_i32_0, %c0_i32_1 : i32, i32, i32
  }
  func.func @transform_6(%arg0: i32) -> (i32, i32, i32) {
    %c0_i32 = arith.constant 0 : i32
    %c0_i32_0 = arith.constant 0 : i32
    %c0_i32_1 = arith.constant 0 : i32
    %c0_i32_2 = arith.constant 0 : i32
    return %c0_i32, %c0_i32_0, %c0_i32_1 : i32, i32, i32
  }
  func.func @transform_7(%arg0: i32) -> (i32, i32, i32) {
    %c0_i32 = arith.constant 0 : i32
    %c0_i32_0 = arith.constant 0 : i32
    %c0_i32_1 = arith.constant 0 : i32
    %c0_i32_2 = arith.constant 0 : i32
    return %c0_i32, %c0_i32_0, %c0_i32_1 : i32, i32, i32
  }
  func.func @transform_8(%arg0: i32) -> (i32, i32, i32) {
    %c0_i32 = arith.constant 0 : i32
    %c0_i32_0 = arith.constant 0 : i32
    %c0_i32_1 = arith.constant 0 : i32
    %c0_i32_2 = arith.constant 0 : i32
    return %c0_i32, %c0_i32_0, %c0_i32_1 : i32, i32, i32
  }
  func.func @transform_9(%arg0: i32) -> (i32, i32, i32) {
    %c0_i32 = arith.constant 0 : i32
    %c0_i32_0 = arith.constant 0 : i32
    %c0_i32_1 = arith.constant 0 : i32
    %c0_i32_2 = arith.constant 0 : i32
    return %c0_i32, %c0_i32_0, %c0_i32_1 : i32, i32, i32
  }
  func.func @transform_10(%arg0: i32) -> (i32, i32, i32) {
    %c0_i32 = arith.constant 0 : i32
    %c0_i32_0 = arith.constant 0 : i32
    %c0_i32_1 = arith.constant 0 : i32
    %c0_i32_2 = arith.constant 0 : i32
    return %c0_i32, %c0_i32_0, %c0_i32_1 : i32, i32, i32
  }
  func.func @transform_11(%arg0: i32) -> (i32, i32, i32) {
    %c0_i32 = arith.constant 0 : i32
    %c0_i32_0 = arith.constant 0 : i32
    %c0_i32_1 = arith.constant 0 : i32
    %c0_i32_2 = arith.constant 0 : i32
    return %c0_i32, %c0_i32_0, %c0_i32_1 : i32, i32, i32
  }
  func.func @transform_12(%arg0: i32) -> (i32, i32, i32) {
    %c0_i32 = arith.constant 0 : i32
    %c0_i32_0 = arith.constant 0 : i32
    %c0_i32_1 = arith.constant 0 : i32
    %c0_i32_2 = arith.constant 0 : i32
    return %c0_i32, %c0_i32_0, %c0_i32_1 : i32, i32, i32
  }
  func.func @transform_13(%arg0: i32) -> (i32, i32, i32) {
    %c0_i32 = arith.constant 0 : i32
    %c0_i32_0 = arith.constant 0 : i32
    %c0_i32_1 = arith.constant 0 : i32
    %c0_i32_2 = arith.constant 0 : i32
    return %c0_i32, %c0_i32_0, %c0_i32_1 : i32, i32, i32
  }
  func.func @transform_14(%arg0: i32) -> (i32, i32, i32) {
    %c0_i32 = arith.constant 0 : i32
    %c0_i32_0 = arith.constant 0 : i32
    %c0_i32_1 = arith.constant 0 : i32
    %c0_i32_2 = arith.constant 0 : i32
    return %c0_i32, %c0_i32_0, %c0_i32_1 : i32, i32, i32
  }
  func.func @transform_15(%arg0: i32) -> (i32, i32, i32) {
    %c0_i32 = arith.constant 0 : i32
    %c0_i32_0 = arith.constant 0 : i32
    %c0_i32_1 = arith.constant 0 : i32
    %c0_i32_2 = arith.constant 0 : i32
    return %c0_i32, %c0_i32_0, %c0_i32_1 : i32, i32, i32
  }
  func.func @transform_16(%arg0: i32) -> (i32, i32, i32) {
    %c0_i32 = arith.constant 0 : i32
    %c0_i32_0 = arith.constant 0 : i32
    %c0_i32_1 = arith.constant 0 : i32
    %c0_i32_2 = arith.constant 0 : i32
    return %c0_i32, %c0_i32_0, %c0_i32_1 : i32, i32, i32
  }
  func.func @transform_17(%arg0: i32) -> (i32, i32) {
    %c0_i32 = arith.constant 0 : i32
    %c0_i32_0 = arith.constant 0 : i32
    %c0_i32_1 = arith.constant 0 : i32
    return %c0_i32, %c0_i32_0 : i32, i32
  }
  func.func @transform_18(%arg0: i32) -> (i32, i32) {
    %c0_i32 = arith.constant 0 : i32
    %c0_i32_0 = arith.constant 0 : i32
    %c0_i32_1 = arith.constant 0 : i32
    return %c0_i32, %c0_i32_0 : i32, i32
  }
  func.func @transform_19(%arg0: i32) -> (i32, i32) {
    %c0_i32 = arith.constant 0 : i32
    %c0_i32_0 = arith.constant 0 : i32
    %c0_i32_1 = arith.constant 0 : i32
    return %c0_i32, %c0_i32_0 : i32, i32
  }
  func.func @transform_20(%arg0: i32) -> (i32, i32) {
    %c0_i32 = arith.constant 0 : i32
    %c0_i32_0 = arith.constant 0 : i32
    %c0_i32_1 = arith.constant 0 : i32
    return %c0_i32, %c0_i32_0 : i32, i32
  }
  func.func @transform_21(%arg0: i32) -> (i32, i32, i32) {
    %c0_i32 = arith.constant 0 : i32
    %c0_i32_0 = arith.constant 0 : i32
    %c0_i32_1 = arith.constant 0 : i32
    return %arg0, %c0_i32, %c0_i32_0 : i32, i32, i32
  }
}

</mosaic_0001>

<bundles_post_ra>
// kernel: moco_vit_linear_probe.1
= control target key start
LH: loop header
LB: loop body
LE: loop exit
PB: predicated region body
PF: predicated region fallthrough
CT: control target
= control target key end

     0   :  { %s5077_s0 = inlined_call_operand.vmem [shape: f32[2,16,48], index: 0, kind: input, shape index: {}]   ;;  %s5078_s1 = inlined_call_operand.vmem [shape: f32[48,32], index: 1, kind: input, shape index: {}]   ;;  %s5079_s2 = inlined_call_operand.vmem [shape: f32[1,32], index: 2, kind: input, shape index: {}]   ;;  %s5080_s3 = inlined_call_operand.vmem [shape: f32[1,32], index: 3, kind: input, shape index: {}]   ;;  %s5081_s4 = inlined_call_operand.vmem [shape: f32[17,32], index: 4, kind: input, shape index: {}]   ;;  %s5082_s5 = inlined_call_operand.vmem [shape: f32[2,1,32], index: 5, kind: input, shape index: {}]   ;;  %s5083_s6 = inlined_call_operand.vmem [shape: f32[2,1,32], index: 6, kind: input, shape index: {}]   ;;  %s5084_s7 = inlined_call_operand.vmem [shape: f32[2,32,96], index: 7, kind: input, shape index: {}]   ;;  %s5085_s8 = inlined_call_operand.vmem [shape: f32[2,1,96], index: 8, kind: input, shape index: {}]   ;;  %s5086_s9 = inlined_call_operand.vmem [shape: f32[2,32,32], index: 9, kind: input, shape index: {}]   ;;  %s5087_s10 = inlined_call_operand.vmem [shape: f32[2,1,32], index: 10, kind: input, shape index: {}]   ;;  %s5088_s11 = inlined_call_operand.vmem [shape: f32[2,1,32], index: 11, kind: input, shape index: {}]   ;;  %s5089_s12 = inlined_call_operand.vmem [shape: f32[2,1,32], index: 12, kind: input, shape index: {}]   ;;  %s5090_s13 = inlined_call_operand.vmem [shape: f32[2,32,128], index: 13, kind: input, shape index: {}]   ;;  %s5091_s14 = inlined_call_operand.vmem [shape: f32[2,1,128], index: 14, kind: input, shape index: {}]   ;;  %s5092_s15 = inlined_call_operand.vmem [shape: f32[2,128,32], index: 15, kind: input, shape index: {}]   ;;  %s5093_s16 = inlined_call_operand.vmem [shape: f32[2,1,32], index: 16, kind: input, shape index: {}]   ;;  %s5094_s17 = inlined_call_operand.vmem [shape: f32[1,32], index: 17, kind: input, shape index: {}]   ;;  %s5095_s18 = inlined_call_operand.vmem [shape: f32[1,32], index: 18, kind: input, shape index: {}]   ;;  %s5096_s19 = inlined_call_operand.vmem [shape: f32[32,128], index: 19, kind: input, shape index: {}]   ;;  %s5097_s20 = inlined_call_operand.vmem [shape: f32[1,128], index: 20, kind: input, shape index: {}]   ;;  %s5098_s21 = inlined_call_operand.vmem [shape: f32[2,8,128], index: 21, kind: output, shape index: {}]  }
   0x1   :  { %5124 = sst [smem:[#allocation4_spill]] %s5077_s0 }
   0x2   :  { %5125 = sst [smem:[#allocation5_spill]] %s5078_s1 }
   0x3   :  { %5126 = sst [smem:[#allocation6_spill]] %s5079_s2  ;;  %s3987_s2 = smov 0  }
   0x4   :  { %5127 = sst [smem:[#allocation7_spill]] %s5080_s3 }
   0x5   :  { %5128 = sst [smem:[#allocation8_spill]] %s5081_s4 }
   0x6   :  { %5129 = sst [smem:[#allocation9_spill]] %s5082_s5 }
   0x7 LB: > { %s3359_s25 = sadd.s32 4294967295, %s3862_s2   ;;  %p3363_p0 = scmp.ge.s32.totalorder %s3862_s2, 1  ;;  %s3862_s2 = sphi %s3987_s2, %s31_s2  }
   0x8   : > { %p587_p1 = scmp.lt.s32.totalorder %s3862_s2, 3 }
   0xa   : > { %p588_p2 = pnand %p3363_p0, %p587_p1 }
   0xb   : > { %s5130_s3 = sld [smem:[#allocation5_spill]] (!%p588_p2)  ;;  %p646_p3 = scmp.lt.s32.totalorder (!%p588_p2), %s3359_s25, 1 }
   0xc   : > { %591 = sbr.rel (%p588_p2) target bundleno = 5275 (0x149b), region = 104  ;;  %s5131_s29 = sld [smem:[#allocation4_spill]] (!%p588_p2) }
   0xd   : > { %s5132_s5 = sld [smem:[#allocation7_spill]] (!%p588_p2)  ;;  %s5120_s26 = smov (!%p588_p2), 64  }
   0xe   : > { %s5133_s24 = sld [smem:[#allocation8_spill]] (!%p588_p2)  ;;  %s5116_s28 = smov (!%p588_p2), 120  }
   0xf   : > { %s5134_s27 = sld [smem:[#allocation6_spill]] (!%p588_p2)  ;;  %s5102_s30 = smov (!%p588_p2), 104  }
  0x10   : > { %s5135_s4 = sld [smem:[#allocation9_spill]] (!%p588_p2)  ;;  %s5108_s23 = smov (!%p588_p2), 56  }
  0x11   : > { %v662_v0 = vld [vmem:[%s5130_s3 + $0x28] sm:$0xff]  ;;  %v661_v1 = vld [vmem:[%s5130_s3 + $0x20] sm:$0xff]  ;;  %v660_v2 = vld [vmem:[%s5130_s3 + $0x18] sm:$0xff]  ;;  %s5148_s25 = smov (!%p646_p3, %s3359_s25), 1  ;;  %vm667_vm0 = vcmask 392192   ;;  %vm697_vm1 = vcmask 261120  }
  0x12   : > { %684 = vmatpush.msra.mxu0 %v662_v0  ;;  %v659_v3 = vld [vmem:[%s5130_s3 + $0x10] sm:$0xff]  ;;  %s3553_s22 = sshll.u32 %s5148_s25, 4  ;;  %v658_v4 = vld [vmem:[%s5130_s3 + $0x8] sm:$0xff]  ;;  %v657_v5 = vld [vmem:[%s5130_s3] sm:$0xff]  ;;  %v3864_v10 = vmov 0.0   ;;  %vm705_vm2 = vcmask 253952  }
  0x13   : > { %s650_s0 = scalar_lea.vmem %s5131_s29, %s3553_s22  ;;  %v702_v8 = vld [vmem:[%s5132_s5] sm:$0x1]  ;;  %698 = vst.msk [vmem:[#allocation2] sm:$0xff] %vm697_vm1, %v3864_v10  ;;  %v3865_v29 = vmov 32.0   ;;  %v836_v56 = vld [vmem:[%s5084_s7 + $0x18] sm:$0xff]  ;;  %v835_v57 = vld [vmem:[%s5084_s7 + $0x10] sm:$0xff] }
  0x14   : > { %685 = vmatpush.msra.mxu0 %v661_v1  ;;  %v655_v6 = vld [vmem:[%s650_s0] sm:$0xff]  ;;  %v656_v7 = vld [vmem:[%s650_s0 + $0x8] sm:$0xff]  ;;  %699 = vst.msk [vmem:[#allocation2 + $0x8] sm:$0xff] %vm697_vm1, %v3864_v10  ;;  %3672 = vrcp.f32 %v3865_v29  ;;  %865 = vmatpush.msra.mxu1 %v836_v56  ;;  %s5122_s22 = smov 96   ;;  %s5112_s29 = smov 72  }
  0x15   : > { %v703_v9 = vld [vmem:[%s5133_s24] sm:$0x1]  ;;  %701 = vst.msk [vmem:[#allocation2 + $0x18] sm:$0xff] %vm697_vm1, %v3864_v10  ;;  %v707_v14 = vld [vmem:[%s5133_s24 + $0x1] sm:$0xff]  ;;  %v708_v18 = vld [vmem:[%s5133_s24 + $0x9] sm:$0xff]  ;;  %s5114_s0 = smov 80  }
  0x16   : > { %686 = vmatpush.msra.mxu0 %v660_v2  ;;  %v704_v11 = vadd.f32 %v703_v9, %v702_v8  ;;  %700 = vst.msk [vmem:[#allocation2 + $0x10] sm:$0xff] %vm697_vm1, %v3864_v10  ;;  %v3655_v12 = vld [vmem:[%s5134_s27] ss:$0 sm:$0xff]  ;;  %866 = vmatpush.msra.mxu1 %v835_v57  ;;  %v834_v58 = vld [vmem:[%s5084_s7 + $0x8] sm:$0xff]  ;;  %s5118_s27 = smov 88   ;;  %s5110_s5 = smov 112  }
  0x17   : > { %v833_v59 = vld [vmem:[%s5084_s7] sm:$0xff]  ;;  %s5104_s1 = smov 48  }
  0x18   : > { %687 = vmatpush.msra.mxu0 %v659_v3  ;;  %706 = vst.msk [vmem:[#allocation2] sm:$0x1] %vm705_vm2, %v704_v11  ;;  %867 = vmatpush.msra.mxu1 %v834_v58 }
  0x1a   : > { %688 = vmatpush.msra.mxu0 %v658_v4  ;;  %v3673_v30 = vpop.eup %3672  ;;  %868 = vmatpush.msra.mxu1 %v833_v59 }
  0x1b   : > { %v737_v31 = vmul.f32 32.0, %v3673_v30  ;;  %vm741_vm3 = vweird.f32 %v3673_v30 }
  0x1c   : > { %689 = vmatpush.msra.mxu0 %v657_v5  ;;  %v716_v27 = vld [vmem:[#allocation2 + $0x18] sm:$0xff] }
  0x1d   : > { %3367 = vmatmul.msk.f32.vlgmr.msra.gmra.mxu0 %vm667_vm0, %v655_v6  ;;  %v733_v28 = vsel %vm697_vm1, %v716_v27, 0.0  ;;  %v738_v32 = vsub.f32 1.0, %v737_v31 }
  0x1f   : > { %v739_v33 = vmul.f32 %v3673_v30, %v738_v32 }
  0x21   : > { %v740_v34 = vadd.f32 %v3673_v30, %v739_v33 }
  0x23   : > { %v4049_v35 = vsel %vm741_vm3, %v3673_v30, %v740_v34  ;;  %vm903_vm3 = vcmask 64512  }
  0x25   : > { %3368 = vmatmul.msk.f32.gmra.mxu0 %vm667_vm0, %v656_v7  ;;  %vm882_vm0 = vcmask 785408  }
  0x9a   : > { %v691_v13 = vpop.f32.mrf.mxu0 }
  0x9b   : > { %v692_v15 = vadd.f32 %v3655_v12, %v691_v13 }
  0x9d   : > { %v709_v16 = vadd.f32 %v707_v14, %v692_v15 }
  0x9f   : > { %711 = vst.msk [vmem:[#allocation2 + $0x1] sm:$0xff] %vm697_vm1, %v709_v16 }
  0xa2   : > { %v694_v17 = vpop.f32.mrf.mxu0 }
  0xa3   : > { %v695_v19 = vadd.f32 %v3655_v12, %v694_v17 }
  0xa5   : > { %v710_v20 = vadd.f32 %v708_v18, %v695_v19  ;;  %v3656_v19 = vld [vmem:[%s5135_s4] ss:$0 sm:$0xff] }
  0xa6   : > { %v713_v21 = vld [vmem:[#allocation2] sm:$0xff] }
  0xa7   : > { %712 = vst.msk [vmem:[#allocation2 + $0x9] sm:$0xff] %vm697_vm1, %v710_v20  ;;  %v724_v22 = vsel %vm697_vm1, %v713_v21, 0.0 }
  0xa8   : > { %725 = vadd.xlane.f32.xlu0 %v724_v22 }
  0xae   : > { %v715_v23 = vld [vmem:[#allocation2 + $0x10] sm:$0xff]  ;;  %v714_v24 = vld [vmem:[#allocation2 + $0x8] sm:$0xff] }
  0xaf   : > { %v730_v25 = vsel %vm697_vm1, %v715_v23, 0.0  ;;  %v727_v26 = vsel %vm697_vm1, %v714_v24, 0.0 }
  0xb0   : > { %731 = vadd.xlane.f32.xlu1 %v730_v25  ;;  %728 = vadd.xlane.f32.xlu0 %v727_v26 }
  0xb8   : > { %734 = vadd.xlane.f32.xlu1 %v733_v28 }
 0x11b   : > { %v726_v36 = vpop.xlane.xlu0 %725 }
 0x11c   : > { %v743_v37 = vmul.f32 %v4049_v35, %v726_v36 }
 0x11e   : > { %v4052_v38 = vsub.f32 %v713_v21, %v743_v37 }
 0x120   : > { %v751_v39 = vmul.f32 %v4052_v38, %v4052_v38 }
 0x122   : > { %v755_v40 = vsel %vm697_vm1, %v751_v39, 0.0 }
 0x123   : > { %v732_v41 = vpop.xlane.xlu1 %731  ;;  %756 = vadd.xlane.f32.xlu2 %v755_v40  ;;  %v729_v42 = vpop.xlane.xlu0 %728 }
 0x124   : > { %v745_v43 = vmul.f32 %v4049_v35, %v732_v41  ;;  %v744_v44 = vmul.f32 %v4049_v35, %v729_v42 }
 0x126   : > { %v4059_v45 = vsub.f32 %v715_v23, %v745_v43  ;;  %v4061_v46 = vsub.f32 %v714_v24, %v744_v44  ;;  %v3657_v24 = vld [vmem:[%s5083_s6] ss:$0 sm:$0xff] }
 0x128   : > { %v753_v47 = vmul.f32 %v4059_v45, %v4059_v45  ;;  %v752_v48 = vmul.f32 %v4061_v46, %v4061_v46 }
 0x12a   : > { %v761_v49 = vsel %vm697_vm1, %v753_v47, 0.0  ;;  %v758_v50 = vsel %vm697_vm1, %v752_v48, 0.0 }
 0x12b   : > { %v735_v51 = vpop.xlane.xlu1 %734  ;;  %762 = vadd.xlane.f32.xlu0 %v761_v49  ;;  %759 = vadd.xlane.f32.xlu2 %v758_v50 }
 0x12c   : > { %v746_v52 = vmul.f32 %v4049_v35, %v735_v51 }
 0x12e   : > { %v4070_v53 = vsub.f32 %v716_v27, %v746_v52 }
 0x130   : > { %v754_v54 = vmul.f32 %v4070_v53, %v4070_v53 }
 0x132   : > { %v764_v55 = vsel %vm697_vm1, %v754_v54, 0.0  ;;  %v3658_v54 = vld [vmem:[%s5085_s8] ss:$0 sm:$0xff] }
 0x133   : > { %765 = vadd.xlane.f32.xlu1 %v764_v55 }
 0x196   : > { %v757_v60 = vpop.xlane.xlu2 %756 }
 0x197   : > { %v767_v61 = vmul.f32 %v757_v60, %v4049_v35 }
 0x199   : > { %v771_v62 = vadd.f32 1e-06, %v767_v61 }
 0x19b   : > { %3674 = vrsqrt.f32 %v771_v62  ;;  %vm781_vm5 = vweird.f32 %v771_v62 }
 0x19e   : > { %v760_v63 = vpop.xlane.xlu2 %759  ;;  %v763_v0 = vpop.xlane.xlu0 %762 }
 0x19f   : > { %v768_v1 = vmul.f32 %v760_v63, %v4049_v35  ;;  %v769_v2 = vmul.f32 %v763_v0, %v4049_v35 }
 0x1a1   : > { %v3675_v3 = vpop.eup %3674  ;;  %v772_v4 = vadd.f32 1e-06, %v768_v1  ;;  %v773_v5 = vadd.f32 1e-06, %v769_v2 }
 0x1a2   : > { %v776_v6 = vmul.f32 %v3675_v3, %v771_v62  ;;  %vm782_vm4 = vweird.f32 %v3675_v3 }
 0x1a3   : > { %3676 = vrsqrt.f32 %v772_v4  ;;  %vm783_vm6 = vmor %vm781_vm5, %vm782_vm4  ;;  %vm791_vm8 = vweird.f32 %v772_v4  ;;  %vm801_vm11 = vweird.f32 %v773_v5 }
 0x1a4   : > { %v777_v7 = vmul.f32 %v3675_v3, %v776_v6  ;;  %3678 = vrsqrt.f32 %v773_v5 }
 0x1a6   : > { %v778_v8 = vmul.f32 0.5, %v777_v7  ;;  %v766_v9 = vpop.xlane.xlu1 %765 }
 0x1a7   : > { %v770_v11 = vmul.f32 %v766_v9, %v4049_v35 }
 0x1a8   : > { %v779_v12 = vsub.f32 1.5, %v778_v8 }
 0x1a9   : > { %v3677_v13 = vpop.eup %3676  ;;  %v774_v14 = vadd.f32 1e-06, %v770_v11 }
 0x1aa   : > { %v3679_v15 = vpop.eup %3678  ;;  %v780_v16 = vmul.f32 %v3675_v3, %v779_v12  ;;  %v786_v17 = vmul.f32 %v3677_v13, %v772_v4  ;;  %vm792_vm7 = vweird.f32 %v3677_v13 }
 0x1ab   : > { %v796_v18 = vmul.f32 %v3679_v15, %v773_v5  ;;  %3680 = vrsqrt.f32 %v774_v14  ;;  %vm802_vm9 = vweird.f32 %v3679_v15  ;;  %vm793_vm10 = vmor %vm791_vm8, %vm792_vm7  ;;  %vm811_vm13 = vweird.f32 %v774_v14 }
 0x1ac   : > { %v787_v20 = vmul.f32 %v3677_v13, %v786_v17  ;;  %v784_v21 = vsel %vm783_vm6, %v3675_v3, %v780_v16  ;;  %vm803_vm12 = vmor %vm801_vm11, %vm802_vm9 }
 0x1ad   : > { %v797_v22 = vmul.f32 %v3679_v15, %v796_v18  ;;  %v815_v23 = vmul.f32 %v784_v21, %v4052_v38 }
 0x1ae   : > { %v788_v25 = vmul.f32 0.5, %v787_v20  ;;  %v717_v20 = vlaneseq }
 0x1af   : > { %v798_v26 = vmul.f32 0.5, %v797_v22  ;;  %v822_v27 = vmul.f32 %v3656_v19, %v815_v23 }
 0x1b0   : > { %v789_v28 = vsub.f32 1.5, %v788_v25  ;;  %v718_v23 = vand.u32 127, %v717_v20 }
 0x1b1   : > { %v3681_v29 = vpop.eup %3680  ;;  %v799_v30 = vsub.f32 1.5, %v798_v26  ;;  %v829_v31 = vadd.f32 %v3657_v24, %v822_v27 }
 0x1b2   : > { %v790_v32 = vmul.f32 %v3677_v13, %v789_v28  ;;  %v806_v33 = vmul.f32 %v3681_v29, %v774_v14  ;;  %vm812_vm14 = vweird.f32 %v3681_v29  ;;  %vm719_vm4 = vcmp.lt.s32.totalorder %v718_v23, 17 }
 0x1b3   : > { %v800_v34 = vmul.f32 %v3679_v15, %v799_v30  ;;  %3370 = vmatmul.msk.f32.vlgmr.msra.gmra.mxu1 %vm697_vm1, %v829_v31  ;;  %vm813_vm15 = vmor %vm811_vm13, %vm812_vm14  ;;  %v4193_v26 = vsel %vm719_vm4, 1.0, %v3864_v10 }
 0x1b4   : > { %v807_v36 = vmul.f32 %v3681_v29, %v806_v33  ;;  %v794_v37 = vsel %vm793_vm10, %v3677_v13, %v790_v32 }
 0x1b5   : > { %v816_v38 = vmul.f32 %v794_v37, %v4061_v46  ;;  %v804_v40 = vsel %vm803_vm12, %v3679_v15, %v800_v34 }
 0x1b6   : > { %v808_v39 = vmul.f32 0.5, %v807_v36  ;;  %v817_v44 = vmul.f32 %v804_v40, %v4059_v45 }
 0x1b7   : > { %v823_v41 = vmul.f32 %v3656_v19, %v816_v38 }
 0x1b8   : > { %v809_v42 = vsub.f32 1.5, %v808_v39  ;;  %v824_v48 = vmul.f32 %v3656_v19, %v817_v44 }
 0x1b9   : > { %v830_v43 = vadd.f32 %v3657_v24, %v823_v41 }
 0x1ba   : > { %v810_v47 = vmul.f32 %v3681_v29, %v809_v42  ;;  %v831_v50 = vadd.f32 %v3657_v24, %v824_v48 }
 0x1bb   : > { %3371 = vmatmul.msk.f32.gmra.mxu1 %vm697_vm1, %v830_v43 }
 0x1bc   : > { %v814_v49 = vsel %vm813_vm15, %v3681_v29, %v810_v47 }
 0x1bd   : > { %v818_v51 = vmul.f32 %v814_v49, %v4070_v53  ;;  %v1054_v49 = vld [vmem:[%s5086_s9] sm:$0xff] }
 0x1bf   : > { %v825_v46 = vmul.f32 %v3656_v19, %v818_v51 }
 0x1c1   : > { %v832_v52 = vadd.f32 %v3657_v24, %v825_v46 }
 0x1c3   : > { %3372 = vmatmul.msk.f32.gmra.mxu1 %vm697_vm1, %v831_v50 }
 0x1cb   : > { %3373 = vmatmul.msk.f32.gmra.mxu1 %vm697_vm1, %v832_v52 }
 0x230   : > { %v870_v45 = vpop.f32.mrf.mxu1 }
 0x231   : > { %v871_v55 = vadd.f32 %v3658_v54, %v870_v45 }
 0x233   : > { %883 = vst.msk [vmem:[#allocation3] sm:$0xff] %vm882_vm0, %v871_v55 }
 0x238   : > { %v873_v56 = vpop.f32.mrf.mxu1 }
 0x239   : > { %v874_v57 = vadd.f32 %v3658_v54, %v873_v56 }
 0x23a   : > { %v4124_v0 = vld [vmem:[#allocation3] sm:$0xff] }
 0x23b   : > { %884 = vst.msk [vmem:[#allocation3 + $0x8] sm:$0xff] %vm882_vm0, %v874_v57 }
 0x240   : > { %v876_v53 = vpop.f32.mrf.mxu1 }
 0x241   : > { %v877_v58 = vadd.f32 %v3658_v54, %v876_v53 }
 0x242   : > { %v4110_v59 = vld [vmem:[#allocation3 + $0x8] sm:$0xff] }
 0x243   : > { %885 = vst.msk [vmem:[#allocation3 + $0x10] sm:$0xff] %vm882_vm0, %v877_v58  ;;  %897 = vrot.lane.b32.xlu1 %v4110_v59, %s5122_s22  ;;  %v4152_v19 = vpack.i.bf16 %v4124_v0, %v4110_v59 }
 0x248   : > { %v879_v60 = vpop.f32.mrf.mxu1 }
 0x249   : > { %v880_v61 = vadd.f32 %v3658_v54, %v879_v60 }
 0x24a   : > { %v4115_v62 = vld [vmem:[#allocation3 + $0x10] sm:$0xff] }
 0x24b   : > { %886 = vst.msk [vmem:[#allocation3 + $0x18] sm:$0xff] %vm882_vm0, %v880_v61  ;;  %899 = vrot.lane.b32.xlu0 %v4115_v62, %s5122_s22 }
 0x252   : > { %v4120_v63 = vld [vmem:[#allocation3 + $0x18] sm:$0xff] }
 0x253   : > { %901 = vrot.lane.b32.xlu2 %v4120_v63, %s5122_s22  ;;  %v4146_v18 = vpack.i.bf16 %v4115_v62, %v4120_v63 }
 0x25b   : > { %895 = vrot.lane.b32.xlu2 %v4124_v0, %s5122_s22  ;;  %s5142_s22 = smov 112  }
 0x2ad   : > { %v902_v1 = vpop.permute.xlu2 %901 }
 0x2ae   : > { %3374 = vmatpush.xpose.msk.msra.mxu2 %vm903_vm3, %v902_v1 }
 0x2b5   : > { %v898_v3 = vpop.permute.xlu1 %897  ;;  %v896_v4 = vpop.permute.xlu2 %895 }
 0x2bd   : > { %v900_v2 = vpop.permute.xlu0 %899 }
 0x2be   : > { %3375 = vmatpush.xpose.msk.msra.mxu2 %vm903_vm3, %v900_v2 }
 0x2c2   : > { %3376 = vmatpush.xpose.msk.msra.mxu2 %vm903_vm3, %v898_v3 }
 0x2c6   : > { %3377 = vmatpush.xpose.msk.msra.mxu2 %vm903_vm3, %v896_v4 }
 0x2c9   : > { %3378 = vmatmul.msk.f32.vlgmr.msra.gmra.mxu2 %vm903_vm3, %v4124_v0 }
 0x2ca   : > { %1290 = vmatpush.msrb.mxu2 %v1054_v49 }
 0x2d1   : > { %3379 = vmatmul.msk.f32.gmra.mxu2 %vm903_vm3, %v4110_v59 }
 0x2d9   : > { %3380 = vmatmul.msk.f32.gmra.mxu2 %vm903_vm3, %v4115_v62 }
 0x2e1   : > { %3381 = vmatmul.msk.f32.gmra.mxu2 %vm903_vm3, %v4120_v63 }
 0x34c   : > { %v937_v5 = vpop.f32.mrf.mxu2 }
 0x34d   : > { %v949_v6 = vmul.f32 0.35355338, %v937_v5 }
 0x34f   : > { %v953_v7 = vsel %vm697_vm1, %v949_v6, -inf }
 0x350   : > { %954 = vmax.xlane.f32.xlu0 %v953_v7 }
 0x354   : > { %v940_v8 = vpop.f32.mrf.mxu2 }
 0x355   : > { %v950_v9 = vmul.f32 0.35355338, %v940_v8 }
 0x357   : > { %v956_v11 = vsel %vm697_vm1, %v950_v9, -inf }
 0x358   : > { %957 = vmax.xlane.f32.xlu2 %v956_v11 }
 0x35c   : > { %v943_v12 = vpop.f32.mrf.mxu2 }
 0x35d   : > { %v951_v13 = vmul.f32 0.35355338, %v943_v12 }
 0x35f   : > { %v959_v14 = vsel %vm697_vm1, %v951_v13, -inf }
 0x360   : > { %960 = vmax.xlane.f32.xlu1 %v959_v14 }
 0x364   : > { %v946_v15 = vpop.f32.mrf.mxu2 }
 0x365   : > { %v952_v16 = vmul.f32 0.35355338, %v946_v15 }
 0x367   : > { %v962_v17 = vsel %vm697_vm1, %v952_v16, -inf }
 0x368   : > { %963 = vmax.xlane.f32.xlu0 %v962_v17 }
 0x379   : > { %3576 = vrot.lane.b32.xlu1 %v4146_v18, %s5120_s26 }
 0x37c   : > { %3581 = vrot.lane.b32.xlu0 %v4152_v19, %s5120_s26  ;;  %s5143_s26 = smov 104  }
 0x381   : > { %1067 = vrot.lane.b32.xlu1 %v4115_v62, %s5118_s27 }
 0x384   : > { %1069 = vrot.lane.b32.xlu0 %v4120_v63, %s5118_s27 }
 0x389   : > { %1055 = vrot.lane.b32.xlu1 %v4124_v0, %s5116_s28 }
 0x38c   : > { %1063 = vrot.lane.b32.xlu0 %v4124_v0, %s5118_s27 }
 0x391   : > { %1059 = vrot.lane.b32.xlu1 %v4115_v62, %s5116_s28 }
 0x394   : > { %1057 = vrot.lane.b32.xlu0 %v4110_v59, %s5116_s28 }
 0x399   : > { %1530 = vrot.lane.b32.xlu1 %v4120_v63, %s5112_s29 }
 0x39c   : > { %1318 = vrot.lane.b32.xlu0 %v4120_v63, %s5114_s0 }
 0x3a1   : > { %1061 = vrot.lane.b32.xlu1 %v4120_v63, %s5116_s28  ;;  %s5139_s28 = smov 120  }
 0x3a4   : > { %1528 = vrot.lane.b32.xlu0 %v4115_v62, %s5112_s29 }
 0x3a9   : > { %1312 = vrot.lane.b32.xlu1 %v4124_v0, %s5114_s0 }
 0x3ac   : > { %1526 = vrot.lane.b32.xlu0 %v4110_v59, %s5112_s29 }
 0x3b1   : > { %1516 = vrot.lane.b32.xlu1 %v4124_v0, %s5102_s30 }
 0x3b4   : > { %1304 = vrot.lane.b32.xlu0 %v4124_v0, %s5110_s5 }
 0x3b9   : > { %1308 = vrot.lane.b32.xlu1 %v4115_v62, %s5110_s5 }
 0x3bc   : > { %1518 = vrot.lane.b32.xlu0 %v4110_v59, %s5102_s30 }
 0x3c1   : > { %1522 = vrot.lane.b32.xlu1 %v4120_v63, %s5102_s30 }
 0x3c3   : > { %v955_v21 = vpop.xlane.xlu0 %954 }
 0x3c4   : > { %v965_v22 = vsub.f32 %v949_v6, %v955_v21  ;;  %1310 = vrot.lane.b32.xlu0 %v4120_v63, %s5110_s5 }
 0x3c6   : > { %v969_v24 = vmul.f32 1.442695, %v965_v22 }
 0x3c8   : > { %3682 = vpow2.f32 %v969_v24 }
 0x3cb   : > { %v958_v25 = vpop.xlane.xlu2 %957 }
 0x3cc   : > { %v966_v27 = vsub.f32 %v950_v9, %v958_v25 }
 0x3ce   : > { %v3683_v28 = vpop.eup %3682  ;;  %v971_v29 = vmul.f32 1.442695, %v966_v27 }
 0x3cf   : > { %v977_v30 = vmul.f32 %v3683_v28, %v4193_v26 }
 0x3d0   : > { %3684 = vpow2.f32 %v971_v29 }
 0x3d1   : > { %v981_v31 = vsel %vm697_vm1, %v977_v30, 0.0 }
 0x3d2   : > { %982 = vadd.xlane.f32.xlu2 %v981_v31 }
 0x3d3   : > { %v961_v32 = vpop.xlane.xlu1 %960 }
 0x3d4   : > { %v967_v33 = vsub.f32 %v951_v13, %v961_v32 }
 0x3d6   : > { %v3685_v34 = vpop.eup %3684  ;;  %v973_v36 = vmul.f32 1.442695, %v967_v33 }
 0x3d7   : > { %v978_v37 = vmul.f32 %v3685_v34, %v4193_v26 }
 0x3d8   : > { %3686 = vpow2.f32 %v973_v36 }
 0x3d9   : > { %v984_v38 = vsel %vm697_vm1, %v978_v37, 0.0 }
 0x3da   : > { %985 = vadd.xlane.f32.xlu2 %v984_v38 }
 0x3db   : > { %v964_v10 = vpop.xlane.xlu0 %963 }
 0x3dc   : > { %v968_v39 = vsub.f32 %v952_v16, %v964_v10 }
 0x3de   : > { %v3687_v40 = vpop.eup %3686  ;;  %v975_v41 = vmul.f32 1.442695, %v968_v39 }
 0x3df   : > { %v979_v42 = vmul.f32 %v3687_v40, %v4193_v26 }
 0x3e0   : > { %3688 = vpow2.f32 %v975_v41 }
 0x3e1   : > { %v987_v43 = vsel %vm697_vm1, %v979_v42, 0.0 }
 0x3e2   : > { %988 = vadd.xlane.f32.xlu2 %v987_v43 }
 0x3e6   : > { %v3689_v44 = vpop.eup %3688 }
 0x3e7   : > { %v980_v47 = vmul.f32 %v3689_v44, %v4193_v26 }
 0x3e9   : > { %v990_v48 = vsel %vm697_vm1, %v980_v47, 0.0 }
 0x3ea   : > { %991 = vadd.xlane.f32.xlu2 %v990_v48 }
 0x3eb   : > { %v3577_v50 = vpop.permute.xlu1 %3576 }
 0x3ec   : > { %v3578_v51 = vunpack.i.l.bf16 %v3577_v50  ;;  %v3579_v52 = vunpack.i.h.bf16 %v3577_v50 }
 0x3ee   : > { %1037 = vmatpush.msra.mxu3 %v3578_v51  ;;  %v3582_v46 = vpop.permute.xlu0 %3581 }
 0x3ef   : > { %v3583_v54 = vunpack.i.l.bf16 %v3582_v46  ;;  %v3584_v45 = vunpack.i.h.bf16 %v3582_v46 }
 0x3f0   : > { %1038 = vmatpush.msra.mxu3 %v3579_v52 }
 0x3f2   : > { %1039 = vmatpush.msra.mxu3 %v3583_v54 }
 0x3f3   : > { %v1068_v55 = vpop.permute.xlu1 %1067 }
 0x3f4   : > { %1040 = vmatpush.msra.mxu3 %v3584_v45 }
 0x3f6   : > { %v1070_v56 = vpop.permute.xlu0 %1069 }
 0x3f7   : > { %3386 = vmatpush.xpose.msk.msrb.mxu0 %vm903_vm3, %v1070_v56 }
 0x3fb   : > { %v1056_v57 = vpop.permute.xlu1 %1055  ;;  %3387 = vmatpush.xpose.msk.msrb.mxu0 %vm903_vm3, %v1068_v55 }
 0x3fe   : > { %v1064_v53 = vpop.permute.xlu0 %1063 }
 0x402   : > { %1065 = vrot.lane.b32.xlu2 %v4110_v59, %s5118_s27  ;;  %s5138_s27 = smov 88  }
 0x403   : > { %v1060_v58 = vpop.permute.xlu1 %1059 }
 0x406   : > { %v1058_v60 = vpop.permute.xlu0 %1057 }
 0x40a   : > { %1316 = vrot.lane.b32.xlu2 %v4115_v62, %s5114_s0 }
 0x40b   : > { %v1531_v61 = vpop.permute.xlu1 %1530 }
 0x40c   : > { %3422 = vmatpush.xpose.msk.msra.mxu2 %vm903_vm3, %v1531_v61 }
 0x40e   : > { %v1319_v63 = vpop.permute.xlu0 %1318 }
 0x412   : > { %1314 = vrot.lane.b32.xlu2 %v4110_v59, %s5114_s0  ;;  %s5141_s0 = smov 72  }
 0x413   : > { %v1062_v15 = vpop.permute.xlu1 %1061 }
 0x416   : > { %v1529_v1 = vpop.permute.xlu0 %1528 }
 0x417   : > { %3423 = vmatpush.xpose.msk.msra.mxu2 %vm903_vm3, %v1529_v1 }
 0x41a   : > { %1524 = vrot.lane.b32.xlu2 %v4124_v0, %s5112_s29  ;;  %s5140_s29 = smov 80  }
 0x41b   : > { %v1313_v17 = vpop.permute.xlu1 %1312 }
 0x41e   : > { %v1527_v2 = vpop.permute.xlu0 %1526 }
 0x41f   : > { %3424 = vmatpush.xpose.msk.msra.mxu2 %vm903_vm3, %v1527_v2 }
 0x422   : > { %1306 = vrot.lane.b32.xlu2 %v4110_v59, %s5110_s5  ;;  %s5136_s5 = smov 96  }
 0x423   : > { %v1517_v22 = vpop.permute.xlu1 %1516 }
 0x426   : > { %v1305_v21 = vpop.permute.xlu0 %1304 }
 0x42a   : > { %1520 = vrot.lane.b32.xlu2 %v4115_v62, %s5102_s30  ;;  %s5106_s30 = smov 40  }
 0x42b   : > { %v1309_v25 = vpop.permute.xlu1 %1308 }
 0x42e   : > { %v1519_v24 = vpop.permute.xlu0 %1518 }
 0x436   : > { %v1311_v27 = vpop.permute.xlu0 %1310 }
 0x445   : > { %v983_v3 = vpop.xlane.xlu2 %982 }
 0x446   : > { %3690 = vrcp.f32 %v983_v3 }
 0x44c   : > { %v3691_v4 = vpop.eup %3690 }
 0x44d   : > { %v986_v5 = vpop.xlane.xlu2 %985  ;;  %v997_v6 = vmul.f32 %v3691_v4, %v977_v30 }
 0x44e   : > { %3692 = vrcp.f32 %v986_v5 }
 0x44f   : > { %3382 = vmatmul.msk.f32.vlgmr.msra.gmra.mxu3 %vm697_vm1, %v997_v6 }
 0x454   : > { %v3693_v7 = vpop.eup %3692 }
 0x455   : > { %v989_v8 = vpop.xlane.xlu2 %988  ;;  %v998_v0 = vmul.f32 %v3693_v7, %v978_v37 }
 0x456   : > { %3694 = vrcp.f32 %v989_v8 }
 0x457   : > { %3383 = vmatmul.msk.f32.gmra.mxu3 %vm697_vm1, %v998_v0 }
 0x45c   : > { %v3695_v9 = vpop.eup %3694 }
 0x45d   : > { %v992_v11 = vpop.xlane.xlu2 %991  ;;  %v999_v59 = vmul.f32 %v3695_v9, %v979_v42 }
 0x45e   : > { %3696 = vrcp.f32 %v992_v11 }
 0x45f   : > { %3384 = vmatmul.msk.f32.gmra.mxu3 %vm697_vm1, %v999_v59 }
 0x464   : > { %v3697_v62 = vpop.eup %3696 }
 0x465   : > { %v1066_v12 = vpop.permute.xlu2 %1065  ;;  %v1000_v13 = vmul.f32 %v3697_v62, %v980_v47  ;;  %v1523_v47 = vpop.permute.xlu1 %1522 }
 0x466   : > { %3388 = vmatpush.xpose.msk.msrb.mxu0 %vm903_vm3, %v1066_v12 }
 0x467   : > { %3385 = vmatmul.msk.f32.gmra.mxu3 %vm697_vm1, %v1000_v13 }
 0x46a   : > { %3389 = vmatpush.xpose.msk.msrb.mxu0 %vm903_vm3, %v1064_v53 }
 0x46d   : > { %v1317_v14 = vpop.permute.xlu2 %1316  ;;  %3390 = vmatmul.msk.f32.vlgmr.msrb.gmra.mxu0 %vm903_vm3, %v1056_v57 }
 0x46e   : > { %3406 = vmatpush.xpose.msk.msra.mxu0 %vm903_vm3, %v1319_v63 }
 0x472   : > { %3407 = vmatpush.xpose.msk.msra.mxu0 %vm903_vm3, %v1317_v14 }
 0x475   : > { %v1315_v16 = vpop.permute.xlu2 %1314  ;;  %3391 = vmatmul.msk.f32.gmra.mxu0 %vm903_vm3, %v1058_v60 }
 0x476   : > { %3408 = vmatpush.xpose.msk.msra.mxu0 %vm903_vm3, %v1315_v16 }
 0x47a   : > { %3409 = vmatpush.xpose.msk.msra.mxu0 %vm903_vm3, %v1313_v17 }
 0x47d   : > { %v1525_v20 = vpop.permute.xlu2 %1524  ;;  %3392 = vmatmul.msk.f32.gmra.mxu0 %vm903_vm3, %v1060_v58 }
 0x47e   : > { %3425 = vmatpush.xpose.msk.msra.mxu2 %vm903_vm3, %v1525_v20 }
 0x485   : > { %3393 = vmatmul.msk.f32.gmra.mxu0 %vm903_vm3, %v1062_v15  ;;  %v1307_v23 = vpop.permute.xlu2 %1306 }
 0x48d   : > { %3410 = vmatmul.msk.f32.vlgmr.msra.gmra.mxu0 %vm903_vm3, %v1305_v21  ;;  %v1521_v41 = vpop.permute.xlu2 %1520 }
 0x495   : > { %3411 = vmatmul.msk.f32.gmra.mxu0 %vm903_vm3, %v1307_v23 }
 0x49d   : > { %3412 = vmatmul.msk.f32.gmra.mxu0 %vm903_vm3, %v1309_v25 }
 0x4a5   : > { %3413 = vmatmul.msk.f32.gmra.mxu0 %vm903_vm3, %v1311_v27 }
 0x4d2   : > { %v1042_v28 = vpop.f32.mrf.mxu3 }
 0x4d3   : > { %3402 = vmatmul.msk.f32.vlgmr.msrb.gmra.mxu2 %vm903_vm3, %v1042_v28 }
 0x4da   : > { %v1045_v29 = vpop.f32.mrf.mxu3 }
 0x4db   : > { %3403 = vmatmul.msk.f32.gmra.mxu2 %vm903_vm3, %v1045_v29 }
 0x4e2   : > { %v1048_v30 = vpop.f32.mrf.mxu3 }
 0x4e3   : > { %3404 = vmatmul.msk.f32.gmra.mxu2 %vm903_vm3, %v1048_v30 }
 0x4ea   : > { %v1051_v31 = vpop.f32.mrf.mxu3  ;;  %v1104_v32 = vpop.f32.mrf.mxu0 }
 0x4eb   : > { %v1116_v33 = vmul.f32 0.35355338, %v1104_v32  ;;  %3405 = vmatmul.msk.f32.gmra.mxu2 %vm903_vm3, %v1051_v31 }
 0x4ed   : > { %v1120_v34 = vsel %vm697_vm1, %v1116_v33, -inf }
 0x4ee   : > { %1121 = vmax.xlane.f32.xlu2 %v1120_v34 }
 0x4f2   : > { %v1107_v36 = vpop.f32.mrf.mxu0 }
 0x4f3   : > { %v1117_v37 = vmul.f32 0.35355338, %v1107_v36  ;;  %3426 = vmatmul.msk.f32.vlgmr.msra.gmra.mxu2 %vm903_vm3, %v1517_v22 }
 0x4f5   : > { %v1123_v38 = vsel %vm697_vm1, %v1117_v37, -inf }
 0x4f6   : > { %1124 = vmax.xlane.f32.xlu0 %v1123_v38 }
 0x4fa   : > { %v1110_v10 = vpop.f32.mrf.mxu0 }
 0x4fb   : > { %v1118_v39 = vmul.f32 0.35355338, %v1110_v10  ;;  %3427 = vmatmul.msk.f32.gmra.mxu2 %vm903_vm3, %v1519_v24 }
 0x4fd   : > { %v1126_v40 = vsel %vm697_vm1, %v1118_v39, -inf }
 0x4fe   : > { %1127 = vmax.xlane.f32.xlu1 %v1126_v40 }
 0x502   : > { %v1113_v42 = vpop.f32.mrf.mxu0 }
 0x503   : > { %v1119_v43 = vmul.f32 0.35355338, %v1113_v42  ;;  %3428 = vmatmul.msk.f32.gmra.mxu2 %vm903_vm3, %v1521_v41 }
 0x505   : > { %v1129_v44 = vsel %vm697_vm1, %v1119_v43, -inf }
 0x506   : > { %1130 = vmax.xlane.f32.xlu2 %v1129_v44 }
 0x50a   : > { %v1353_v48 = vpop.f32.mrf.mxu0 }
 0x50b   : > { %v1365_v49 = vmul.f32 0.35355338, %v1353_v48  ;;  %3429 = vmatmul.msk.f32.gmra.mxu2 %vm903_vm3, %v1523_v47 }
 0x50d   : > { %v1369_v50 = vsel %vm697_vm1, %v1365_v49, -inf }
 0x50e   : > { %1370 = vmax.xlane.f32.xlu0 %v1369_v50 }
 0x512   : > { %v1356_v51 = vpop.f32.mrf.mxu0 }
 0x513   : > { %v4255_v46 = vmul.f32 0.35355338, %v1356_v51 }
 0x515   : > { %v1372_v52 = vsel %vm697_vm1, %v4255_v46, -inf }
 0x516   : > { %1373 = vmax.xlane.f32.xlu1 %v1372_v52 }
 0x51a   : > { %v1359_v54 = vpop.f32.mrf.mxu0 }
 0x51b   : > { %v4259_v45 = vmul.f32 0.35355338, %v1359_v54 }
 0x51d   : > { %v1375_v55 = vsel %vm697_vm1, %v4259_v45, -inf }
 0x51e   : > { %1376 = vmax.xlane.f32.xlu0 %v1375_v55 }
 0x522   : > { %v1362_v56 = vpop.f32.mrf.mxu0 }
 0x523   : > { %v4263_v57 = vmul.f32 0.35355338, %v1362_v56 }
 0x525   : > { %v1378_v53 = vsel %vm697_vm1, %v4263_v57, -inf }
 0x526   : > { %1379 = vmax.xlane.f32.xlu0 %v1378_v53 }
 0x53a   : > { %3591 = vrot.lane.b32.xlu0 %v4152_v19, %s5108_s23 }
 0x556   : > { %v4284_v17 = vpop.f32.mrf.mxu2 }
 0x55e   : > { %v4293_v22 = vpop.f32.mrf.mxu2 }
 0x561   : > { %v1122_v58 = vpop.xlane.xlu2 %1121 }
 0x562   : > { %v1132_v60 = vsub.f32 %v1116_v33, %v1122_v58 }
 0x564   : > { %v1136_v61 = vmul.f32 1.442695, %v1132_v60 }
 0x566   : > { %3698 = vpow2.f32 %v1136_v61  ;;  %v4295_v24 = vpop.f32.mrf.mxu2 }
 0x569   : > { %v1125_v63 = vpop.xlane.xlu0 %1124 }
 0x56a   : > { %v1133_v1 = vsub.f32 %v1117_v37, %v1125_v63 }
 0x56c   : > { %v3699_v2 = vpop.eup %3698  ;;  %v1138_v3 = vmul.f32 1.442695, %v1133_v1 }
 0x56d   : > { %v4270_v4 = vmul.f32 %v3699_v2, %v4193_v26 }
 0x56e   : > { %3700 = vpow2.f32 %v1138_v3  ;;  %v4301_v28 = vpop.f32.mrf.mxu2 }
 0x56f   : > { %v1148_v5 = vsel %vm697_vm1, %v4270_v4, 0.0 }
 0x570   : > { %1149 = vadd.xlane.f32.xlu2 %v1148_v5 }
 0x571   : > { %v1128_v6 = vpop.xlane.xlu1 %1127 }
 0x572   : > { %v1134_v7 = vsub.f32 %v1118_v39, %v1128_v6 }
 0x574   : > { %v3701_v8 = vpop.eup %3700  ;;  %v1140_v0 = vmul.f32 1.442695, %v1134_v7 }
 0x575   : > { %v4275_v9 = vmul.f32 %v3701_v8, %v4193_v26 }
 0x576   : > { %3702 = vpow2.f32 %v1140_v0  ;;  %v1565_v31 = vpop.f32.mrf.mxu2 }
 0x577   : > { %v1151_v11 = vsel %vm697_vm1, %v4275_v9, 0.0  ;;  %v4308_v33 = vmul.f32 0.35355338, %v1565_v31 }
 0x578   : > { %1152 = vadd.xlane.f32.xlu1 %v1151_v11 }
 0x579   : > { %v1131_v59 = vpop.xlane.xlu2 %1130  ;;  %v1581_v36 = vsel %vm697_vm1, %v4308_v33, -inf }
 0x57a   : > { %v1135_v62 = vsub.f32 %v1119_v43, %v1131_v59 }
 0x57c   : > { %v3703_v12 = vpop.eup %3702  ;;  %v1142_v13 = vmul.f32 1.442695, %v1135_v62 }
 0x57d   : > { %v4280_v14 = vmul.f32 %v3703_v12, %v4193_v26 }
 0x57e   : > { %3704 = vpow2.f32 %v1142_v13  ;;  %v1568_v34 = vpop.f32.mrf.mxu2 }
 0x57f   : > { %v1154_v15 = vsel %vm697_vm1, %v4280_v14, 0.0  ;;  %v4312_v37 = vmul.f32 0.35355338, %v1568_v34 }
 0x580   : > { %1155 = vadd.xlane.f32.xlu1 %v1154_v15 }
 0x581   : > { %v1371_v23 = vpop.xlane.xlu0 %1370  ;;  %v1584_v10 = vsel %vm697_vm1, %v4312_v37, -inf }
 0x582   : > { %v1381_v25 = vsub.f32 %v1365_v49, %v1371_v23 }
 0x584   : > { %v3705_v16 = vpop.eup %3704  ;;  %v1385_v27 = vmul.f32 1.442695, %v1381_v25 }
 0x585   : > { %v4287_v20 = vmul.f32 %v3705_v16, %v4193_v26 }
 0x586   : > { %3706 = vpow2.f32 %v1385_v27  ;;  %v1571_v38 = vpop.f32.mrf.mxu2 }
 0x587   : > { %v1157_v21 = vsel %vm697_vm1, %v4287_v20, 0.0  ;;  %v4316_v39 = vmul.f32 0.35355338, %v1571_v38 }
 0x588   : > { %3586 = vrot.lane.b32.xlu2 %v4146_v18, %s5108_s23  ;;  %1158 = vadd.xlane.f32.xlu0 %v1157_v21  ;;  %s5137_s23 = smov 64  }
 0x589   : > { %v1587_v40 = vsel %vm697_vm1, %v4316_v39, -inf  ;;  %v1374_v49 = vpop.xlane.xlu1 %1373 }
 0x58c   : > { %v3707_v29 = vpop.eup %3706 }
 0x58d   : > { %v4304_v30 = vmul.f32 %v3707_v29, %v4193_v26 }
 0x58e   : > { %v1574_v41 = vpop.f32.mrf.mxu2 }
 0x58f   : > { %v1397_v32 = vsel %vm697_vm1, %v4304_v30, 0.0  ;;  %v4320_v42 = vmul.f32 0.35355338, %v1574_v41 }
 0x591   : > { %v1590_v43 = vsel %vm697_vm1, %v4320_v42, -inf  ;;  %v1377_v44 = vpop.xlane.xlu0 %1376 }
 0x592   : > { %v1383_v48 = vsub.f32 %v4259_v45, %v1377_v44 }
 0x594   : > { %v1389_v51 = vmul.f32 1.442695, %v1383_v48 }
 0x599   : > { %3596 = vrot.lane.b32.xlu1 %v4146_v18, %s5104_s1  ;;  %v1380_v50 = vpop.xlane.xlu0 %1379 }
 0x59a   : > { %v1384_v11 = vsub.f32 %v4263_v57, %v1380_v50 }
 0x59c   : > { %3611 = vrot.lane.b32.xlu0 %v4152_v19, %s5106_s30 }
 0x5ac   : > { %v3592_v55 = vpop.permute.xlu0 %3591 }
 0x5ad   : > { %v3593_v58 = vunpack.i.l.bf16 %v3592_v55  ;;  %v3594_v45 = vunpack.i.h.bf16 %v3592_v55 }
 0x5b1   : > { %1398 = vadd.xlane.f32.xlu2 %v1397_v32 }
 0x5b9   : > { %1582 = vmax.xlane.f32.xlu2 %v1581_v36 }
 0x5c3   : > { %1585 = vmax.xlane.f32.xlu1 %v1584_v10 }
 0x5cb   : > { %1588 = vmax.xlane.f32.xlu1 %v1587_v40 }
 0x5d1   : > { %3606 = vrot.lane.b32.xlu2 %v4146_v18, %s5106_s30 }
 0x5d3   : > { %1591 = vmax.xlane.f32.xlu1 %v1590_v43 }
 0x5e3   : > { %v1150_v47 = vpop.xlane.xlu2 %1149 }
 0x5e4   : > { %3708 = vrcp.f32 %v1150_v47 }
 0x5e5   : > { %3710 = vpow2.f32 %v1389_v51 }
 0x5ea   : > { %v3709_v53 = vpop.eup %3708 }
 0x5eb   : > { %v3587_v52 = vpop.permute.xlu2 %3586  ;;  %v1153_v18 = vpop.xlane.xlu1 %1152  ;;  %v1164_v61 = vmul.f32 %v3709_v53, %v4270_v4  ;;  %v1382_v4 = vsub.f32 %v4255_v46, %v1374_v49 }
 0x5ec   : > { %3601 = vrot.lane.b32.xlu1 %v4152_v19, %s5104_s1  ;;  %v3588_v54 = vunpack.i.l.bf16 %v3587_v52  ;;  %v3589_v56 = vunpack.i.h.bf16 %v3587_v52  ;;  %v3711_v60 = vpop.eup %3710  ;;  %3712 = vrcp.f32 %v1153_v18 }
 0x5ed   : > { %v4332_v63 = vmul.f32 %v3711_v60, %v4193_v26  ;;  %v1387_v8 = vmul.f32 1.442695, %v1382_v4  ;;  %v1221_v60 = vld [vmem:[%s5086_s9 + $0x8] sm:$0xff] }
 0x5ee   : > { %1204 = vmatpush.msrb.mxu1 %v3588_v54  ;;  %1249 = vmatpush.msrb.mxu3 %v1221_v60 }
 0x5ef   : > { %v1403_v2 = vsel %vm697_vm1, %v4332_v63, 0.0 }
 0x5f0   : > { %1205 = vmatpush.msrb.mxu1 %v3589_v56 }
 0x5f2   : > { %1206 = vmatpush.msrb.mxu1 %v3593_v58  ;;  %v3713_v1 = vpop.eup %3712 }
 0x5f3   : > { %v1156_v19 = vpop.xlane.xlu1 %1155  ;;  %v1165_v3 = vmul.f32 %v3713_v1, %v4275_v9  ;;  %v1391_v9 = vmul.f32 1.442695, %v1384_v11 }
 0x5f4   : > { %1207 = vmatpush.msrb.mxu1 %v3594_v45  ;;  %3714 = vrcp.f32 %v1156_v19 }
 0x5f5   : > { %3394 = vmatmul.msk.f32.vlgmr.msrb.gmra.mxu1 %vm697_vm1, %v1164_v61 }
 0x5fa   : > { %1404 = vadd.xlane.f32.xlu2 %v1403_v2  ;;  %v3715_v6 = vpop.eup %3714 }
 0x5fb   : > { %v1159_v5 = vpop.xlane.xlu0 %1158  ;;  %v1166_v7 = vmul.f32 %v3715_v6, %v4280_v14 }
 0x5fc   : > { %3716 = vrcp.f32 %v1159_v5 }
 0x5fd   : > { %3395 = vmatmul.msk.f32.gmra.mxu1 %vm697_vm1, %v1165_v3  ;;  %3718 = vpow2.f32 %v1387_v8 }
 0x5fe   : > { %3720 = vpow2.f32 %v1391_v9 }
 0x602   : > { %v3717_v0 = vpop.eup %3716 }
 0x603   : > { %v1167_v62 = vmul.f32 %v3717_v0, %v4287_v20  ;;  %v3719_v13 = vpop.eup %3718 }
 0x604   : > { %v4345_v46 = vmul.f32 %v3719_v13, %v4193_v26  ;;  %v3721_v16 = vpop.eup %3720 }
 0x605   : > { %3396 = vmatmul.msk.f32.gmra.mxu1 %vm697_vm1, %v1166_v7  ;;  %v4350_v57 = vmul.f32 %v3721_v16, %v4193_v26 }
 0x606   : > { %v1400_v14 = vsel %vm697_vm1, %v4345_v46, 0.0 }
 0x607   : > { %v1406_v20 = vsel %vm697_vm1, %v4350_v57, 0.0 }
 0x60b   : > { %v3597_v59 = vpop.permute.xlu1 %3596 }
 0x60c   : > { %v3598_v12 = vunpack.i.l.bf16 %v3597_v59  ;;  %v3599_v15 = vunpack.i.h.bf16 %v3597_v59 }
 0x60d   : > { %3397 = vmatmul.msk.f32.gmra.mxu1 %vm697_vm1, %v1167_v62 }
 0x60e   : > { %1453 = vmatpush.msra.mxu1 %v3598_v12  ;;  %v3612_v32 = vpop.permute.xlu0 %3611 }
 0x60f   : > { %v3613_v41 = vunpack.i.l.bf16 %v3612_v32  ;;  %v3614_v44 = vunpack.i.h.bf16 %v3612_v32  ;;  %v1682_v32 = vld [vmem:[%s5086_s9 + $0x18] sm:$0xff] }
 0x610   : > { %1454 = vmatpush.msra.mxu1 %v3599_v15 }
 0x616   : > { %1401 = vadd.xlane.f32.xlu1 %v1400_v14 }
 0x61e   : > { %1407 = vadd.xlane.f32.xlu1 %v1406_v20 }
 0x624   : > { %v1399_v21 = vpop.xlane.xlu2 %1398 }
 0x62c   : > { %v1583_v23 = vpop.xlane.xlu2 %1582 }
 0x62d   : > { %v1593_v25 = vsub.f32 %v4308_v33, %v1583_v23 }
 0x62f   : > { %v1597_v27 = vmul.f32 1.442695, %v1593_v25 }
 0x631   : > { %3722 = vpow2.f32 %v1597_v27 }
 0x634   : > { %v3607_v29 = vpop.permute.xlu2 %3606 }
 0x635   : > { %v3608_v31 = vunpack.i.l.bf16 %v3607_v29  ;;  %v3609_v38 = vunpack.i.h.bf16 %v3607_v29 }
 0x636   : > { %v1586_v34 = vpop.xlane.xlu1 %1585 }
 0x637   : > { %v3723_v36 = vpop.eup %3722  ;;  %v1594_v10 = vsub.f32 %v4312_v37, %v1586_v34  ;;  %1665 = vmatpush.msrb.mxu0 %v3608_v31 }
 0x638   : > { %v4357_v40 = vmul.f32 %v3723_v36, %v4193_v26 }
 0x639   : > { %v1599_v43 = vmul.f32 1.442695, %v1594_v10  ;;  %1666 = vmatpush.msrb.mxu0 %v3609_v38 }
 0x63a   : > { %v1609_v33 = vsel %vm697_vm1, %v4357_v40, 0.0 }
 0x63b   : > { %3724 = vpow2.f32 %v1599_v43  ;;  %1610 = vadd.xlane.f32.xlu0 %v1609_v33  ;;  %1667 = vmatpush.msrb.mxu0 %v3613_v41 }
 0x63d   : > { %1668 = vmatpush.msrb.mxu0 %v3614_v44 }
 0x63e   : > { %v1589_v47 = vpop.xlane.xlu1 %1588 }
 0x63f   : > { %v1595_v48 = vsub.f32 %v4316_v39, %v1589_v47 }
 0x641   : > { %v3725_v49 = vpop.eup %3724  ;;  %v1601_v37 = vmul.f32 1.442695, %v1595_v48 }
 0x642   : > { %v1606_v50 = vmul.f32 %v3725_v49, %v4193_v26 }
 0x643   : > { %3726 = vpow2.f32 %v1601_v37 }
 0x644   : > { %v1612_v51 = vsel %vm697_vm1, %v1606_v50, 0.0 }
 0x645   : > { %1613 = vadd.xlane.f32.xlu0 %v1612_v51 }
 0x646   : > { %v1592_v52 = vpop.xlane.xlu1 %1591 }
 0x647   : > { %v1596_v54 = vsub.f32 %v4320_v42, %v1592_v52 }
 0x649   : > { %v3727_v55 = vpop.eup %3726  ;;  %v1603_v18 = vmul.f32 1.442695, %v1596_v54  ;;  %v3659_v54 = vld [vmem:[%s5087_s10] ss:$0 sm:$0xff] }
 0x64a   : > { %v1607_v56 = vmul.f32 %v3727_v55, %v4193_v26 }
 0x64b   : > { %3728 = vpow2.f32 %v1603_v18  ;;  %v3852_v18 = vld [vmem:[#allocation2] sm:$0xff] }
 0x64c   : > { %v1615_v53 = vsel %vm697_vm1, %v1607_v56, 0.0  ;;  %3730 = vrcp.f32 %v1399_v21 }
 0x64d   : > { %1616 = vadd.xlane.f32.xlu1 %v1615_v53 }
 0x651   : > { %v3729_v39 = vpop.eup %3728 }
 0x652   : > { %v1608_v58 = vmul.f32 %v3729_v39, %v4193_v26  ;;  %v3731_v61 = vpop.eup %3730 }
 0x653   : > { %v1413_v2 = vmul.f32 %v3731_v61, %v4304_v30  ;;  %v3853_v61 = vld [vmem:[#allocation2 + $0x8] sm:$0xff] }
 0x654   : > { %v1618_v45 = vsel %vm697_vm1, %v1608_v58, 0.0 }
 0x655   : > { %1619 = vadd.xlane.f32.xlu1 %v1618_v45 }
 0x65e   : > { %v3602_v42 = vpop.permute.xlu1 %3601 }
 0x65f   : > { %v3603_v19 = vunpack.i.l.bf16 %v3602_v42  ;;  %v3604_v1 = vunpack.i.h.bf16 %v3602_v42 }
 0x661   : > { %1455 = vmatpush.msra.mxu1 %v3603_v19 }
 0x663   : > { %1456 = vmatpush.msra.mxu1 %v3604_v1 }
 0x664   : > { %3414 = vmatmul.msk.f32.vlgmr.msra.gmra.mxu1 %vm697_vm1, %v1413_v2 }
 0x665   : > { %1710 = vmatpush.msrb.mxu1 %v1682_v32 }
 0x66d   : > { %v1405_v8 = vpop.xlane.xlu2 %1404 }
 0x672   : > { %v1209_v3 = vpop.f32.mrf.mxu1 }
 0x673   : > { %3398 = vmatmul.msk.f32.vlgmr.msrb.gmra.mxu3 %vm903_vm3, %v1209_v3 }
 0x67a   : > { %v1212_v5 = vpop.f32.mrf.mxu1 }
 0x67b   : > { %3399 = vmatmul.msk.f32.gmra.mxu3 %vm903_vm3, %v1212_v5 }
 0x682   : > { %v1215_v6 = vpop.f32.mrf.mxu1 }
 0x683   : > { %3400 = vmatmul.msk.f32.gmra.mxu3 %vm903_vm3, %v1215_v6 }
 0x689   : > { %v1402_v4 = vpop.xlane.xlu1 %1401 }
 0x68a   : > { %3732 = vrcp.f32 %v1402_v4  ;;  %v1218_v7 = vpop.f32.mrf.mxu1  ;;  %v3854_v4 = vld [vmem:[#allocation2 + $0x10] sm:$0xff] }
 0x68b   : > { %3401 = vmatmul.msk.f32.gmra.mxu3 %vm903_vm3, %v1218_v7  ;;  %3734 = vrcp.f32 %v1405_v8 }
 0x690   : > { %v3733_v0 = vpop.eup %3732 }
 0x691   : > { %v1414_v30 = vmul.f32 %v3733_v0, %v4345_v46  ;;  %v1408_v11 = vpop.xlane.xlu1 %1407  ;;  %v3735_v59 = vpop.eup %3734 }
 0x692   : > { %3736 = vrcp.f32 %v1408_v11  ;;  %v1415_v62 = vmul.f32 %v3735_v59, %v4332_v63  ;;  %v1470_v63 = vld [vmem:[%s5086_s9 + $0x10] sm:$0xff] }
 0x693   : > { %3415 = vmatmul.msk.f32.gmra.mxu1 %vm697_vm1, %v1414_v30  ;;  %1498 = vmatpush.msra.mxu3 %v1470_v63 }
 0x698   : > { %v3737_v9 = vpop.eup %3736 }
 0x699   : > { %v1416_v12 = vmul.f32 %v3737_v9, %v4350_v57  ;;  %v3855_v9 = vld [vmem:[#allocation2 + $0x18] sm:$0xff] }
 0x69b   : > { %3416 = vmatmul.msk.f32.gmra.mxu1 %vm697_vm1, %v1415_v62 }
 0x6a3   : > { %3417 = vmatmul.msk.f32.gmra.mxu1 %vm697_vm1, %v1416_v12 }
 0x6ae   : > { %v1611_v13 = vpop.xlane.xlu0 %1610 }
 0x6af   : > { %3738 = vrcp.f32 %v1611_v13 }
 0x6b5   : > { %v3739_v15 = vpop.eup %3738 }
 0x6b6   : > { %v1625_v14 = vmul.f32 %v3739_v15, %v4357_v40 }
 0x6b8   : > { %3430 = vmatmul.msk.f32.vlgmr.msrb.gmra.mxu0 %vm697_vm1, %v1625_v14  ;;  %v1614_v46 = vpop.xlane.xlu0 %1613 }
 0x6b9   : > { %3740 = vrcp.f32 %v1614_v46 }
 0x6bf   : > { %v3741_v16 = vpop.eup %3740 }
 0x6c0   : > { %v1617_v20 = vpop.xlane.xlu1 %1616  ;;  %v1626_v21 = vmul.f32 %v3741_v16, %v1606_v50 }
 0x6c1   : > { %3742 = vrcp.f32 %v1617_v20 }
 0x6c2   : > { %3431 = vmatmul.msk.f32.gmra.mxu0 %vm697_vm1, %v1626_v21 }
 0x6c7   : > { %v3743_v57 = vpop.eup %3742 }
 0x6c8   : > { %v1620_v23 = vpop.xlane.xlu1 %1619  ;;  %v1627_v25 = vmul.f32 %v3743_v57, %v1607_v56 }
 0x6c9   : > { %3744 = vrcp.f32 %v1620_v23 }
 0x6ca   : > { %3432 = vmatmul.msk.f32.gmra.mxu0 %vm697_vm1, %v1627_v25 }
 0x6cf   : > { %v3745_v27 = vpop.eup %3744 }
 0x6d0   : > { %v1628_v29 = vmul.f32 %v3745_v27, %v1608_v58 }
 0x6d2   : > { %3433 = vmatmul.msk.f32.gmra.mxu0 %vm697_vm1, %v1628_v29 }
 0x6e1   : > { %v1458_v31 = vpop.f32.mrf.mxu1 }
 0x6e2   : > { %3418 = vmatmul.msk.f32.vlgmr.msra.gmra.mxu3 %vm903_vm3, %v1458_v31 }
 0x6f6   : > { %v1251_v33 = vpop.f32.mrf.mxu3 }
 0x6f7   : > { %v1293_v37 = vadd.f32 %v4284_v17, %v1251_v33  ;;  %v1846_v33 = vld [vmem:[%s5090_s13 + $0x10] sm:$0xff] }
 0x6fe   : > { %v1254_v44 = vpop.f32.mrf.mxu3 }
 0x6ff   : > { %v1296_v39 = vadd.f32 %v4293_v22, %v1254_v44  ;;  %v1845_v44 = vld [vmem:[%s5090_s13 + $0x8] sm:$0xff] }
 0x706   : > { %v1257_v47 = vpop.f32.mrf.mxu3 }
 0x707   : > { %v1299_v1 = vadd.f32 %v4295_v24, %v1257_v47  ;;  %v1844_v47 = vld [vmem:[%s5090_s13] sm:$0xff] }
 0x70e   : > { %v1260_v48 = vpop.f32.mrf.mxu3 }
 0x70f   : > { %v1302_v0 = vadd.f32 %v4301_v28, %v1260_v48 }
 0x710   : > { %v1461_v34 = vpop.f32.mrf.mxu1 }
 0x711   : > { %3419 = vmatmul.msk.f32.gmra.mxu3 %vm903_vm3, %v1461_v34 }
 0x718   : > { %v1464_v36 = vpop.f32.mrf.mxu1 }
 0x719   : > { %3420 = vmatmul.msk.f32.gmra.mxu3 %vm903_vm3, %v1464_v36 }
 0x720   : > { %v1467_v38 = vpop.f32.mrf.mxu1 }
 0x721   : > { %3421 = vmatmul.msk.f32.gmra.mxu3 %vm903_vm3, %v1467_v38 }
 0x735   : > { %v1670_v10 = vpop.f32.mrf.mxu0 }
 0x736   : > { %3434 = vmatmul.msk.f32.vlgmr.msrb.gmra.mxu1 %vm903_vm3, %v1670_v10 }
 0x73f   : > { %v1673_v40 = vpop.f32.mrf.mxu0 }
 0x740   : > { %3435 = vmatmul.msk.f32.gmra.mxu1 %vm903_vm3, %v1673_v40 }
 0x747   : > { %v1676_v41 = vpop.f32.mrf.mxu0 }
 0x748   : > { %3436 = vmatmul.msk.f32.gmra.mxu1 %vm903_vm3, %v1676_v41 }
 0x74f   : > { %v1679_v43 = vpop.f32.mrf.mxu0 }
 0x750   : > { %3437 = vmatmul.msk.f32.gmra.mxu1 %vm903_vm3, %v1679_v43  ;;  %v1847_v43 = vld [vmem:[%s5090_s13 + $0x18] sm:$0xff] }
 0x751   : > { %1876 = vmatpush.msrb.mxu3 %v1847_v43 }
 0x753   : > { %1877 = vmatpush.msrb.mxu3 %v1846_v33 }
 0x755   : > { %1878 = vmatpush.msrb.mxu3 %v1845_v44 }
 0x757   : > { %1879 = vmatpush.msrb.mxu3 %v1844_v47 }
 0x765   : > { %v1500_v49 = vpop.f32.mrf.mxu3 }
 0x766   : > { %v1512_v50 = vadd.f32 %v1500_v49, %v1293_v37 }
 0x794   : > { %v1503_v55 = vpop.f32.mrf.mxu3 }
 0x795   : > { %v1513_v60 = vadd.f32 %v1503_v55, %v1296_v39 }
 0x79c   : > { %v1506_v42 = vpop.f32.mrf.mxu3 }
 0x79d   : > { %v1514_v3 = vadd.f32 %v1506_v42, %v1299_v1  ;;  %v3660_v42 = vld [vmem:[%s5088_s11] ss:$0 sm:$0xff] }
 0x7a4   : > { %v1509_v8 = vpop.f32.mrf.mxu3 }
 0x7a5   : > { %v1515_v11 = vadd.f32 %v1509_v8, %v1302_v0  ;;  %v1942_v8 = vld [vmem:[%s5092_s15 + $0x68] sm:$0xff] }
 0x7b3   : > { %v1712_v51 = vpop.f32.mrf.mxu1 }
 0x7b4   : > { %v1724_v52 = vadd.f32 %v1712_v51, %v1512_v50 }
 0x7b6   : > { %v1728_v56 = vadd.f32 %v3852_v18, %v1724_v52 }
 0x7b8   : > { %v4407_v53 = vadd.f32 %v3659_v54, %v1728_v56 }
 0x7ba   : > { %v1742_v58 = vsel %vm697_vm1, %v4407_v53, 0.0 }
 0x7bb   : > { %1743 = vadd.xlane.f32.xlu1 %v1742_v58 }
 0x7bd   : > { %v1715_v17 = vpop.f32.mrf.mxu1 }
 0x7be   : > { %v1725_v45 = vadd.f32 %v1715_v17, %v1513_v60 }
 0x7c0   : > { %v1729_v19 = vadd.f32 %v3853_v61, %v1725_v45 }
 0x7c2   : > { %v4413_v2 = vadd.f32 %v3659_v54, %v1729_v19 }
 0x7c4   : > { %v1745_v5 = vsel %vm697_vm1, %v4413_v2, 0.0 }
 0x7c5   : > { %v1718_v6 = vpop.f32.mrf.mxu1  ;;  %1746 = vadd.xlane.f32.xlu2 %v1745_v5  ;;  %v3661_v5 = vld [vmem:[%s5089_s12] ss:$0 sm:$0xff] }
 0x7c6   : > { %v1726_v22 = vadd.f32 %v1718_v6, %v1514_v3  ;;  %v1944_v6 = vld [vmem:[%s5092_s15 + $0x78] sm:$0xff] }
 0x7c7   : > { %1949 = vmatpush.msrb.mxu2 %v1944_v6 }
 0x7c8   : > { %v1730_v7 = vadd.f32 %v3854_v4, %v1726_v22  ;;  %v1943_v22 = vld [vmem:[%s5092_s15 + $0x70] sm:$0xff] }
 0x7c9   : > { %1950 = vmatpush.msrb.mxu2 %v1943_v22 }
 0x7ca   : > { %v4418_v30 = vadd.f32 %v3659_v54, %v1730_v7 }
 0x7cb   : > { %1951 = vmatpush.msrb.mxu2 %v1942_v8 }
 0x7cc   : > { %v1748_v24 = vsel %vm697_vm1, %v4418_v30, 0.0 }
 0x7cd   : > { %v1721_v59 = vpop.f32.mrf.mxu1  ;;  %1749 = vadd.xlane.f32.xlu0 %v1748_v24 }
 0x7ce   : > { %v1727_v62 = vadd.f32 %v1721_v59, %v1515_v11 }
 0x7d0   : > { %v1731_v12 = vadd.f32 %v3855_v9, %v1727_v62  ;;  %v1941_v62 = vld [vmem:[%s5092_s15 + $0x60] sm:$0xff] }
 0x7d1   : > { %1952 = vmatpush.msrb.mxu2 %v1941_v62 }
 0x7d2   : > { %v4422_v13 = vadd.f32 %v3659_v54, %v1731_v12 }
 0x7d4   : > { %v1751_v15 = vsel %vm697_vm1, %v4422_v13, 0.0 }
 0x7d5   : > { %1752 = vadd.xlane.f32.xlu1 %v1751_v15 }
 0x82e   : > { %v1744_v14 = vpop.xlane.xlu1 %1743 }
 0x82f   : > { %v1754_v28 = vmul.f32 %v1744_v14, %v4049_v35 }
 0x831   : > { %v1758_v46 = vsub.f32 %v4407_v53, %v1754_v28 }
 0x833   : > { %v1762_v16 = vmul.f32 %v1758_v46, %v1758_v46 }
 0x835   : > { %v1766_v20 = vsel %vm697_vm1, %v1762_v16, 0.0 }
 0x836   : > { %1767 = vadd.xlane.f32.xlu2 %v1766_v20 }
 0x838   : > { %v1747_v21 = vpop.xlane.xlu2 %1746 }
 0x839   : > { %v1755_v63 = vmul.f32 %v1747_v21, %v4049_v35 }
 0x83b   : > { %v4431_v57 = vsub.f32 %v4413_v2, %v1755_v63 }
 0x83d   : > { %v1763_v23 = vmul.f32 %v4431_v57, %v4431_v57 }
 0x83f   : > { %v1769_v25 = vsel %vm697_vm1, %v1763_v23, 0.0 }
 0x840   : > { %1770 = vadd.xlane.f32.xlu0 %v1769_v25  ;;  %v1750_v27 = vpop.xlane.xlu0 %1749 }
 0x841   : > { %v1756_v29 = vmul.f32 %v1750_v27, %v4049_v35 }
 0x843   : > { %v4438_v31 = vsub.f32 %v4418_v30, %v1756_v29 }
 0x845   : > { %v1764_v32 = vmul.f32 %v4438_v31, %v4438_v31 }
 0x847   : > { %v1772_v34 = vsel %vm697_vm1, %v1764_v32, 0.0 }
 0x848   : > { %1773 = vadd.xlane.f32.xlu1 %v1772_v34  ;;  %v1753_v36 = vpop.xlane.xlu1 %1752 }
 0x849   : > { %v1757_v38 = vmul.f32 %v1753_v36, %v4049_v35 }
 0x84b   : > { %v4445_v10 = vsub.f32 %v4422_v13, %v1757_v38 }
 0x84d   : > { %v1765_v40 = vmul.f32 %v4445_v10, %v4445_v10 }
 0x84f   : > { %v1775_v41 = vsel %vm697_vm1, %v1765_v40, 0.0 }
 0x850   : > { %1776 = vadd.xlane.f32.xlu2 %v1775_v41 }
 0x8a9   : > { %v1768_v48 = vpop.xlane.xlu2 %1767 }
 0x8aa   : > { %v1778_v49 = vmul.f32 %v1768_v48, %v4049_v35 }
 0x8ac   : > { %v1782_v37 = vadd.f32 1e-06, %v1778_v49 }
 0x8ae   : > { %3746 = vrsqrt.f32 %v1782_v37  ;;  %vm1792_vm6 = vweird.f32 %v1782_v37 }
 0x8b3   : > { %v1771_v50 = vpop.xlane.xlu0 %1770 }
 0x8b4   : > { %v3747_v51 = vpop.eup %3746  ;;  %v1779_v52 = vmul.f32 %v1771_v50, %v4049_v35  ;;  %v1938_v50 = vld [vmem:[%s5092_s15 + $0x48] sm:$0xff] }
 0x8b5   : > { %v1787_v54 = vmul.f32 %v3747_v51, %v1782_v37  ;;  %vm1793_vm5 = vweird.f32 %v3747_v51  ;;  %v1939_v37 = vld [vmem:[%s5092_s15 + $0x50] sm:$0xff] }
 0x8b6   : > { %v1783_v55 = vadd.f32 1e-06, %v1779_v52  ;;  %vm1794_vm7 = vmor %vm1792_vm6, %vm1793_vm5  ;;  %v1935_v52 = vld [vmem:[%s5092_s15 + $0x30] sm:$0xff] }
 0x8b7   : > { %v1788_v18 = vmul.f32 %v3747_v51, %v1787_v54  ;;  %v1934_v54 = vld [vmem:[%s5092_s15 + $0x28] sm:$0xff] }
 0x8b8   : > { %3748 = vrsqrt.f32 %v1783_v55  ;;  %vm1802_vm9 = vweird.f32 %v1783_v55 }
 0x8b9   : > { %v1789_v56 = vmul.f32 0.5, %v1788_v18  ;;  %v1932_v18 = vld [vmem:[%s5092_s15 + $0x18] sm:$0xff] }
 0x8bb   : > { %v1790_v39 = vsub.f32 1.5, %v1789_v56  ;;  %v1774_v58 = vpop.xlane.xlu1 %1773  ;;  %v1931_v56 = vld [vmem:[%s5092_s15 + $0x10] sm:$0xff] }
 0x8bc   : > { %v1780_v60 = vmul.f32 %v1774_v58, %v4049_v35  ;;  %v1929_v58 = vld [vmem:[%s5092_s15] sm:$0xff] }
 0x8bd   : > { %v1791_v17 = vmul.f32 %v3747_v51, %v1790_v39  ;;  %v1930_v39 = vld [vmem:[%s5092_s15 + $0x8] sm:$0xff] }
 0x8be   : > { %v3749_v45 = vpop.eup %3748  ;;  %v1784_v61 = vadd.f32 1e-06, %v1780_v60  ;;  %v3662_v60 = vld [vmem:[%s5091_s14] ss:$0 sm:$0xff] }
 0x8bf   : > { %v1795_v19 = vsel %vm1794_vm7, %v3747_v51, %v1791_v17  ;;  %v1797_v1 = vmul.f32 %v3749_v45, %v1783_v55  ;;  %vm1803_vm8 = vweird.f32 %v3749_v45  ;;  %v1936_v51 = vld [vmem:[%s5092_s15 + $0x38] sm:$0xff]  ;;  %v1933_v55 = vld [vmem:[%s5092_s15 + $0x20] sm:$0xff] }
 0x8c0   : > { %v1826_v3 = vmul.f32 %v1795_v19, %v1758_v46  ;;  %3750 = vrsqrt.f32 %v1784_v61  ;;  %vm1804_vm10 = vmor %vm1802_vm9, %vm1803_vm8  ;;  %vm1812_vm12 = vweird.f32 %v1784_v61 }
 0x8c1   : > { %v1798_v4 = vmul.f32 %v3749_v45, %v1797_v1 }
 0x8c2   : > { %v1833_v7 = vmul.f32 %v3660_v42, %v1826_v3 }
 0x8c3   : > { %v1799_v0 = vmul.f32 0.5, %v1798_v4  ;;  %v1777_v11 = vpop.xlane.xlu2 %1776 }
 0x8c4   : > { %v1781_v24 = vmul.f32 %v1777_v11, %v4049_v35  ;;  %v1840_v59 = vadd.f32 %v3661_v5, %v1833_v7 }
 0x8c5   : > { %v1800_v9 = vsub.f32 1.5, %v1799_v0 }
 0x8c6   : > { %v3751_v12 = vpop.eup %3750  ;;  %v1785_v15 = vadd.f32 1e-06, %v1781_v24  ;;  %3438 = vmatmul.msk.f32.vlgmr.msrb.gmra.mxu3 %vm697_vm1, %v1840_v59 }
 0x8c7   : > { %v1801_v14 = vmul.f32 %v3749_v45, %v1800_v9  ;;  %v1807_v28 = vmul.f32 %v3751_v12, %v1784_v61  ;;  %vm1813_vm11 = vweird.f32 %v3751_v12 }
 0x8c8   : > { %3752 = vrsqrt.f32 %v1785_v15  ;;  %vm1814_vm13 = vmor %vm1812_vm12, %vm1813_vm11  ;;  %vm1822_vm15 = vweird.f32 %v1785_v15 }
 0x8c9   : > { %v1805_v46 = vsel %vm1804_vm10, %v3749_v45, %v1801_v14  ;;  %v1808_v16 = vmul.f32 %v3751_v12, %v1807_v28 }
 0x8ca   : > { %v1827_v20 = vmul.f32 %v1805_v46, %v4431_v57 }
 0x8cb   : > { %v1809_v21 = vmul.f32 0.5, %v1808_v16 }
 0x8cc   : > { %v1834_v63 = vmul.f32 %v3660_v42, %v1827_v20 }
 0x8cd   : > { %v1810_v23 = vsub.f32 1.5, %v1809_v21 }
 0x8ce   : > { %v3753_v25 = vpop.eup %3752  ;;  %v1841_v27 = vadd.f32 %v3661_v5, %v1834_v63 }
 0x8cf   : > { %v1811_v29 = vmul.f32 %v3751_v12, %v1810_v23  ;;  %v1817_v32 = vmul.f32 %v3753_v25, %v1785_v15  ;;  %vm1823_vm14 = vweird.f32 %v3753_v25 }
 0x8d0   : > { %3439 = vmatmul.msk.f32.gmra.mxu3 %vm697_vm1, %v1841_v27  ;;  %vm1824_vm4 = vmor %vm1822_vm15, %vm1823_vm14 }
 0x8d1   : > { %v1815_v34 = vsel %vm1814_vm13, %v3751_v12, %v1811_v29  ;;  %v1818_v36 = vmul.f32 %v3753_v25, %v1817_v32 }
 0x8d2   : > { %v1828_v38 = vmul.f32 %v1815_v34, %v4438_v31  ;;  %v1940_v31 = vld [vmem:[%s5092_s15 + $0x58] sm:$0xff] }
 0x8d3   : > { %v1819_v40 = vmul.f32 0.5, %v1818_v36  ;;  %1953 = vmatpush.msrb.mxu2 %v1940_v31 }
 0x8d4   : > { %v1835_v41 = vmul.f32 %v3660_v42, %v1828_v38 }
 0x8d5   : > { %v1820_v43 = vsub.f32 1.5, %v1819_v40  ;;  %1954 = vmatpush.msrb.mxu2 %v1939_v37 }
 0x8d6   : > { %v1842_v57 = vadd.f32 %v3661_v5, %v1835_v41 }
 0x8d7   : > { %v1821_v33 = vmul.f32 %v3753_v25, %v1820_v43  ;;  %1955 = vmatpush.msrb.mxu2 %v1938_v50 }
 0x8d8   : > { %3440 = vmatmul.msk.f32.gmra.mxu3 %vm697_vm1, %v1842_v57 }
 0x8d9   : > { %v1825_v44 = vsel %vm1824_vm4, %v3753_v25, %v1821_v33 }
 0x8da   : > { %v1829_v47 = vmul.f32 %v1825_v44, %v4445_v10  ;;  %v1937_v10 = vld [vmem:[%s5092_s15 + $0x40] sm:$0xff] }
 0x8db   : > { %1956 = vmatpush.msrb.mxu2 %v1937_v10 }
 0x8dc   : > { %v1836_v48 = vmul.f32 %v3660_v42, %v1829_v47 }
 0x8dd   : > { %1957 = vmatpush.msrb.mxu2 %v1936_v51 }
 0x8de   : > { %v1843_v49 = vadd.f32 %v3661_v5, %v1836_v48 }
 0x8df   : > { %1958 = vmatpush.msrb.mxu2 %v1935_v52 }
 0x8e0   : > { %3441 = vmatmul.msk.f32.gmra.mxu3 %vm697_vm1, %v1843_v49  ;;  %v3663_v49 = vld [vmem:[%s5093_s16] ss:$0 sm:$0xff] }
 0x8e1   : > { %1959 = vmatpush.msrb.mxu2 %v1934_v54 }
 0x8e3   : > { %1960 = vmatpush.msrb.mxu2 %v1933_v55 }
 0x8e5   : > { %1961 = vmatpush.msrb.mxu2 %v1932_v18 }
 0x8e7   : > { %1962 = vmatpush.msrb.mxu2 %v1931_v56 }
 0x8e9   : > { %1963 = vmatpush.msrb.mxu2 %v1930_v39 }
 0x8eb   : > { %1964 = vmatpush.msrb.mxu2 %v1929_v58 }
 0x949   : > { %v1881_v17 = vpop.f32.mrf.mxu3 }
 0x94a   : > { %v1882_v45 = vadd.f32 %v3662_v60, %v1881_v17 }
 0x94c   : > { %v1897_v42 = vmul.f32 0.044715, %v1882_v45  ;;  %v1893_v59 = vmul.f32 0.5, %v1882_v45 }
 0x94e   : > { %v1901_v61 = vmul.f32 %v1897_v42, %v1882_v45 }
 0x950   : > { %v1905_v19 = vmul.f32 %v1901_v61, %v1882_v45 }
 0x952   : > { %v1909_v1 = vadd.f32 %v1905_v19, %v1882_v45 }
 0x953   : > { %v1884_v3 = vpop.f32.mrf.mxu3 }
 0x954   : > { %v1885_v5 = vadd.f32 %v3662_v60, %v1884_v3  ;;  %v1913_v6 = vmul.f32 0.7978846, %v1909_v1 }
 0x956   : > { %3754 = vtanh.f32 %v1913_v6  ;;  %v1898_v22 = vmul.f32 0.044715, %v1885_v5  ;;  %v1894_v25 = vmul.f32 0.5, %v1885_v5 }
 0x958   : > { %v1902_v4 = vmul.f32 %v1898_v22, %v1885_v5 }
 0x95a   : > { %v1906_v7 = vmul.f32 %v1902_v4, %v1885_v5 }
 0x95b   : > { %v1887_v8 = vpop.f32.mrf.mxu3 }
 0x95c   : > { %v3755_v0 = vpop.eup %3754  ;;  %v1888_v11 = vadd.f32 %v3662_v60, %v1887_v8  ;;  %v1910_v24 = vadd.f32 %v1906_v7, %v1885_v5 }
 0x95d   : > { %v1921_v62 = vadd.f32 1.0, %v3755_v0 }
 0x95e   : > { %v1914_v9 = vmul.f32 0.7978846, %v1910_v24  ;;  %v1899_v12 = vmul.f32 0.044715, %v1888_v11  ;;  %v1895_v41 = vmul.f32 0.5, %v1888_v11 }
 0x95f   : > { %v1925_v15 = vmul.f32 %v1921_v62, %v1893_v59 }
 0x960   : > { %3756 = vtanh.f32 %v1914_v9  ;;  %v1903_v14 = vmul.f32 %v1899_v12, %v1888_v11  ;;  %v3447_v12 = vld [vmem:[%s5084_s7 + $0x38] sm:$0xff] }
 0x961   : > { %1965 = vmatmul.f32.vlgmr.msrb.gmra.mxu2 %v1925_v15  ;;  %2122 = vmatpush.msra.mxu0 %v3447_v12  ;;  %v3446_v15 = vld [vmem:[%s5084_s7 + $0x30] sm:$0xff] }
 0x962   : > { %v1907_v28 = vmul.f32 %v1903_v14, %v1888_v11  ;;  %v3445_v14 = vld [vmem:[%s5084_s7 + $0x28] sm:$0xff] }
 0x963   : > { %v1890_v46 = vpop.f32.mrf.mxu3  ;;  %2123 = vmatpush.msra.mxu0 %v3446_v15 }
 0x964   : > { %v1891_v16 = vadd.f32 %v3662_v60, %v1890_v46  ;;  %v1911_v20 = vadd.f32 %v1907_v28, %v1888_v11  ;;  %v3444_v28 = vld [vmem:[%s5084_s7 + $0x20] sm:$0xff] }
 0x965   : > { %2124 = vmatpush.msra.mxu0 %v3445_v14 }
 0x966   : > { %v3757_v21 = vpop.eup %3756  ;;  %v1915_v63 = vmul.f32 0.7978846, %v1911_v20  ;;  %v1900_v23 = vmul.f32 0.044715, %v1891_v16  ;;  %v1896_v44 = vmul.f32 0.5, %v1891_v16 }
 0x967   : > { %v1922_v27 = vadd.f32 1.0, %v3757_v21  ;;  %2125 = vmatpush.msra.mxu0 %v3444_v28 }
 0x968   : > { %3758 = vtanh.f32 %v1915_v63  ;;  %v1904_v29 = vmul.f32 %v1900_v23, %v1891_v16 }
 0x969   : > { %v1926_v32 = vmul.f32 %v1922_v27, %v1894_v25 }
 0x96a   : > { %v1908_v34 = vmul.f32 %v1904_v29, %v1891_v16 }
 0x96b   : > { %1968 = vmatmul.f32.gmra.mxu2 %v1926_v32 }
 0x96c   : > { %v1912_v36 = vadd.f32 %v1908_v34, %v1891_v16 }
 0x96e   : > { %v3759_v38 = vpop.eup %3758  ;;  %v1916_v40 = vmul.f32 0.7978846, %v1912_v36 }
 0x96f   : > { %v1923_v43 = vadd.f32 1.0, %v3759_v38 }
 0x970   : > { %3760 = vtanh.f32 %v1916_v40 }
 0x971   : > { %v1927_v57 = vmul.f32 %v1923_v43, %v1895_v41  ;;  %v3664_v43 = vld [vmem:[%s5135_s4 + $0x1] ss:$0 sm:$0xff] }
 0x973   : > { %1971 = vmatmul.f32.gmra.mxu2 %v1927_v57 }
 0x976   : > { %v3761_v33 = vpop.eup %3760 }
 0x977   : > { %v1924_v47 = vadd.f32 1.0, %v3761_v33 }
 0x979   : > { %v1928_v48 = vmul.f32 %v1924_v47, %v1896_v44 }
 0x97b   : > { %1974 = vmatmul.f32.gmra.mxu2 %v1928_v48  ;;  %v3665_v48 = vld [vmem:[%s5083_s6 + $0x1] ss:$0 sm:$0xff] }
 0x9e4   : > { %v1966_v31 = vpop.f32.mrf.mxu2 }
 0x9e5   : > { %v1967_v37 = vadd.f32 %v3663_v49, %v1966_v31 }
 0x9e7   : > { %v4534_v50 = vadd.f32 %v1967_v37, %v4407_v53 }
 0x9e9   : > { %v1986_v10 = vsel %vm697_vm1, %v4534_v50, 0.0 }
 0x9ea   : > { %1987 = vadd.xlane.f32.xlu0 %v1986_v10 }
 0x9ee   : > { %v1969_v51 = vpop.f32.mrf.mxu2 }
 0x9ef   : > { %v1970_v52 = vadd.f32 %v3663_v49, %v1969_v51 }
 0x9f1   : > { %v4539_v54 = vadd.f32 %v1970_v52, %v4413_v2 }
 0x9f3   : > { %v1989_v55 = vsel %vm697_vm1, %v4539_v54, 0.0 }
 0x9f4   : > { %1990 = vadd.xlane.f32.xlu1 %v1989_v55 }
 0x9f6   : > { %v1972_v18 = vpop.f32.mrf.mxu2 }
 0x9f7   : > { %v1973_v56 = vadd.f32 %v3663_v49, %v1972_v18 }
 0x9f9   : > { %v4544_v39 = vadd.f32 %v1973_v56, %v4418_v30 }
 0x9fb   : > { %v1992_v53 = vsel %vm697_vm1, %v4544_v39, 0.0 }
 0x9fc   : > { %1993 = vadd.xlane.f32.xlu2 %v1992_v53 }
 0x9fe   : > { %v1975_v58 = vpop.f32.mrf.mxu2 }
 0x9ff   : > { %v1976_v60 = vadd.f32 %v3663_v49, %v1975_v58 }
 0xa01   : > { %v4549_v17 = vadd.f32 %v1976_v60, %v4422_v13 }
 0xa03   : > { %v1995_v2 = vsel %vm697_vm1, %v4549_v17, 0.0 }
 0xa04   : > { %1996 = vadd.xlane.f32.xlu0 %v1995_v2 }
 0xa5d   : > { %v1988_v45 = vpop.xlane.xlu0 %1987 }
 0xa5e   : > { %v1998_v42 = vmul.f32 %v1988_v45, %v4049_v35 }
 0xa60   : > { %v2002_v61 = vsub.f32 %v4534_v50, %v1998_v42 }
 0xa62   : > { %v2006_v30 = vmul.f32 %v2002_v61, %v2002_v61 }
 0xa64   : > { %v2010_v19 = vsel %vm697_vm1, %v2006_v30, 0.0 }
 0xa65   : > { %2011 = vadd.xlane.f32.xlu1 %v2010_v19 }
 0xa67   : > { %v1991_v1 = vpop.xlane.xlu1 %1990 }
 0xa68   : > { %v1999_v3 = vmul.f32 %v1991_v1, %v4049_v35 }
 0xa6a   : > { %v4558_v5 = vsub.f32 %v4539_v54, %v1999_v3 }
 0xa6c   : > { %v2007_v13 = vmul.f32 %v4558_v5, %v4558_v5 }
 0xa6e   : > { %v2013_v6 = vsel %vm697_vm1, %v2007_v13, 0.0 }
 0xa6f   : > { %v1994_v22 = vpop.xlane.xlu2 %1993  ;;  %2014 = vadd.xlane.f32.xlu2 %v2013_v6 }
 0xa70   : > { %v2000_v4 = vmul.f32 %v1994_v22, %v4049_v35 }
 0xa72   : > { %v4565_v7 = vsub.f32 %v4544_v39, %v2000_v4 }
 0xa74   : > { %v2008_v8 = vmul.f32 %v4565_v7, %v4565_v7 }
 0xa76   : > { %v2016_v0 = vsel %vm697_vm1, %v2008_v8, 0.0 }
 0xa77   : > { %v1997_v11 = vpop.xlane.xlu0 %1996  ;;  %2017 = vadd.xlane.f32.xlu0 %v2016_v0 }
 0xa78   : > { %v2001_v24 = vmul.f32 %v1997_v11, %v4049_v35 }
 0xa7a   : > { %v4572_v59 = vsub.f32 %v4549_v17, %v2001_v24 }
 0xa7c   : > { %v2009_v62 = vmul.f32 %v4572_v59, %v4572_v59 }
 0xa7e   : > { %v2019_v9 = vsel %vm697_vm1, %v2009_v62, 0.0 }
 0xa7f   : > { %2020 = vadd.xlane.f32.xlu1 %v2019_v9 }
 0xad8   : > { %v2012_v46 = vpop.xlane.xlu1 %2011 }
 0xad9   : > { %v2022_v16 = vmul.f32 %v2012_v46, %v4049_v35 }
 0xadb   : > { %v2026_v20 = vadd.f32 1e-06, %v2022_v16 }
 0xadd   : > { %3762 = vrsqrt.f32 %v2026_v20  ;;  %vm2036_vm6 = vweird.f32 %v2026_v20 }
 0xae2   : > { %v2015_v21 = vpop.xlane.xlu2 %2014 }
 0xae3   : > { %v3763_v63 = vpop.eup %3762  ;;  %v2023_v23 = vmul.f32 %v2015_v21, %v4049_v35 }
 0xae4   : > { %v2031_v25 = vmul.f32 %v3763_v63, %v2026_v20  ;;  %vm2037_vm5 = vweird.f32 %v3763_v63 }
 0xae5   : > { %v2027_v27 = vadd.f32 1e-06, %v2023_v23  ;;  %vm2038_vm7 = vmor %vm2036_vm6, %vm2037_vm5 }
 0xae6   : > { %v2032_v29 = vmul.f32 %v3763_v63, %v2031_v25 }
 0xae7   : > { %3764 = vrsqrt.f32 %v2027_v27  ;;  %vm2046_vm9 = vweird.f32 %v2027_v27 }
 0xae8   : > { %v2033_v32 = vmul.f32 0.5, %v2032_v29 }
 0xaea   : > { %v2034_v34 = vsub.f32 1.5, %v2033_v32  ;;  %v2018_v36 = vpop.xlane.xlu0 %2017 }
 0xaeb   : > { %v2024_v38 = vmul.f32 %v2018_v36, %v4049_v35 }
 0xaec   : > { %v2035_v40 = vmul.f32 %v3763_v63, %v2034_v34 }
 0xaed   : > { %v3765_v41 = vpop.eup %3764  ;;  %v2028_v57 = vadd.f32 1e-06, %v2024_v38 }
 0xaee   : > { %v2039_v33 = vsel %vm2038_vm7, %v3763_v63, %v2035_v40  ;;  %v2041_v44 = vmul.f32 %v3765_v41, %v2027_v27  ;;  %vm2047_vm8 = vweird.f32 %v3765_v41 }
 0xaef   : > { %v2070_v47 = vmul.f32 %v2039_v33, %v2002_v61  ;;  %3766 = vrsqrt.f32 %v2028_v57  ;;  %vm2048_vm10 = vmor %vm2046_vm9, %vm2047_vm8  ;;  %vm2056_vm12 = vweird.f32 %v2028_v57 }
 0xaf0   : > { %v2042_v49 = vmul.f32 %v3765_v41, %v2041_v44 }
 0xaf1   : > { %v2077_v31 = vmul.f32 %v3664_v43, %v2070_v47 }
 0xaf2   : > { %v2043_v37 = vmul.f32 0.5, %v2042_v49  ;;  %v2021_v10 = vpop.xlane.xlu1 %2020 }
 0xaf3   : > { %v2025_v51 = vmul.f32 %v2021_v10, %v4049_v35  ;;  %v2084_v52 = vadd.f32 %v3665_v48, %v2077_v31 }
 0xaf4   : > { %v2044_v55 = vsub.f32 1.5, %v2043_v37 }
 0xaf5   : > { %v3767_v18 = vpop.eup %3766  ;;  %v2029_v56 = vadd.f32 1e-06, %v2025_v51  ;;  %3449 = vmatmul.msk.f32.vlgmr.msra.gmra.mxu0 %vm697_vm1, %v2084_v52 }
 0xaf6   : > { %v2045_v53 = vmul.f32 %v3765_v41, %v2044_v55  ;;  %v2051_v58 = vmul.f32 %v3767_v18, %v2028_v57  ;;  %vm2057_vm11 = vweird.f32 %v3767_v18 }
 0xaf7   : > { %3768 = vrsqrt.f32 %v2029_v56  ;;  %vm2058_vm13 = vmor %vm2056_vm12, %vm2057_vm11  ;;  %vm2066_vm15 = vweird.f32 %v2029_v56 }
 0xaf8   : > { %v2049_v60 = vsel %vm2048_vm10, %v3765_v41, %v2045_v53  ;;  %v2052_v2 = vmul.f32 %v3767_v18, %v2051_v58 }
 0xaf9   : > { %v2071_v45 = vmul.f32 %v2049_v60, %v4558_v5 }
 0xafa   : > { %v2053_v42 = vmul.f32 0.5, %v2052_v2 }
 0xafb   : > { %v2078_v61 = vmul.f32 %v3664_v43, %v2071_v45 }
 0xafc   : > { %v2054_v30 = vsub.f32 1.5, %v2053_v42 }
 0xafd   : > { %v3769_v19 = vpop.eup %3768  ;;  %v2085_v1 = vadd.f32 %v3665_v48, %v2078_v61 }
 0xafe   : > { %v2055_v3 = vmul.f32 %v3767_v18, %v2054_v30  ;;  %v2061_v13 = vmul.f32 %v3769_v19, %v2029_v56  ;;  %vm2067_vm14 = vweird.f32 %v3769_v19 }
 0xaff   : > { %3450 = vmatmul.msk.f32.gmra.mxu0 %vm697_vm1, %v2085_v1  ;;  %vm2068_vm4 = vmor %vm2066_vm15, %vm2067_vm14 }
 0xb00   : > { %v2059_v6 = vsel %vm2058_vm13, %v3767_v18, %v2055_v3  ;;  %v2062_v22 = vmul.f32 %v3769_v19, %v2061_v13 }
 0xb01   : > { %v2072_v4 = vmul.f32 %v2059_v6, %v4565_v7  ;;  %v3666_v7 = vld [vmem:[%s5085_s8 + $0x1] ss:$0 sm:$0xff] }
 0xb02   : > { %v2063_v8 = vmul.f32 0.5, %v2062_v22 }
 0xb03   : > { %v2079_v0 = vmul.f32 %v3664_v43, %v2072_v4 }
 0xb04   : > { %v2064_v11 = vsub.f32 1.5, %v2063_v8 }
 0xb05   : > { %v2086_v5 = vadd.f32 %v3665_v48, %v2079_v0 }
 0xb06   : > { %v2065_v24 = vmul.f32 %v3769_v19, %v2064_v11 }
 0xb07   : > { %3451 = vmatmul.msk.f32.gmra.mxu0 %vm697_vm1, %v2086_v5 }
 0xb08   : > { %v2069_v62 = vsel %vm2068_vm4, %v3769_v19, %v2065_v24 }
 0xb09   : > { %v2073_v9 = vmul.f32 %v2069_v62, %v4572_v59 }
 0xb0b   : > { %v2080_v12 = vmul.f32 %v3664_v43, %v2073_v9 }
 0xb0d   : > { %v2087_v15 = vadd.f32 %v3665_v48, %v2080_v12 }
 0xb0f   : > { %3452 = vmatmul.msk.f32.gmra.mxu0 %vm697_vm1, %v2087_v15 }
 0xb72   : > { %v2127_v14 = vpop.f32.mrf.mxu0 }
 0xb73   : > { %v2128_v28 = vadd.f32 %v3666_v7, %v2127_v14 }
 0xb75   : > { %2139 = vst.msk [vmem:[#allocation3] sm:$0xff] %vm882_vm0, %v2128_v28 }
 0xb7c   : > { %v2130_v46 = vpop.f32.mrf.mxu0  ;;  %v4621_v27 = vld [vmem:[#allocation3] sm:$0xff] }
 0xb7d   : > { %v2131_v16 = vadd.f32 %v3666_v7, %v2130_v46 }
 0xb7f   : > { %2140 = vst.msk [vmem:[#allocation3 + $0x8] sm:$0xff] %vm882_vm0, %v2131_v16 }
 0xb84   : > { %v2133_v20 = vpop.f32.mrf.mxu0 }
 0xb85   : > { %v2134_v21 = vadd.f32 %v3666_v7, %v2133_v20 }
 0xb86   : > { %v4611_v63 = vld [vmem:[#allocation3 + $0x8] sm:$0xff] }
 0xb87   : > { %2141 = vst.msk [vmem:[#allocation3 + $0x10] sm:$0xff] %vm882_vm0, %v2134_v21  ;;  %2153 = vrot.lane.b32.xlu1 %v4611_v63, %s5136_s5  ;;  %v4647_v51 = vpack.i.bf16 %v4621_v27, %v4611_v63 }
 0xb8c   : > { %v2136_v59 = vpop.f32.mrf.mxu0 }
 0xb8d   : > { %v2137_v23 = vadd.f32 %v3666_v7, %v2136_v59 }
 0xb8e   : > { %v4616_v25 = vld [vmem:[#allocation3 + $0x10] sm:$0xff] }
 0xb8f   : > { %2142 = vst.msk [vmem:[#allocation3 + $0x18] sm:$0xff] %vm882_vm0, %v2137_v23  ;;  %2155 = vrot.lane.b32.xlu0 %v4616_v25, %s5136_s5 }
 0xb96   : > { %v4623_v29 = vld [vmem:[#allocation3 + $0x18] sm:$0xff] }
 0xb97   : > { %2151 = vrot.lane.b32.xlu0 %v4621_v27, %s5136_s5  ;;  %2157 = vrot.lane.b32.xlu2 %v4623_v29, %s5136_s5  ;;  %v4653_v52 = vpack.i.bf16 %v4616_v25, %v4623_v29  ;;  %s5144_s5 = smov 56  }
 0xbf1   : > { %v2158_v32 = vpop.permute.xlu2 %2157 }
 0xbf2   : > { %3453 = vmatpush.xpose.msk.msra.mxu1 %vm903_vm3, %v2158_v32 }
 0xbf9   : > { %v2154_v36 = vpop.permute.xlu1 %2153 }
 0xc01   : > { %v2156_v34 = vpop.permute.xlu0 %2155 }
 0xc02   : > { %3454 = vmatpush.xpose.msk.msra.mxu1 %vm903_vm3, %v2156_v34 }
 0xc06   : > { %3455 = vmatpush.xpose.msk.msra.mxu1 %vm903_vm3, %v2154_v36 }
 0xc09   : > { %v2152_v38 = vpop.permute.xlu0 %2151 }
 0xc0a   : > { %3456 = vmatpush.xpose.msk.msra.mxu1 %vm903_vm3, %v2152_v38 }
 0xc0d   : > { %3457 = vmatmul.msk.f32.vlgmr.msra.gmra.mxu1 %vm903_vm3, %v4621_v27 }
 0xc15   : > { %3458 = vmatmul.msk.f32.gmra.mxu1 %vm903_vm3, %v4611_v63 }
 0xc1d   : > { %3459 = vmatmul.msk.f32.gmra.mxu1 %vm903_vm3, %v4616_v25 }
 0xc25   : > { %3460 = vmatmul.msk.f32.gmra.mxu1 %vm903_vm3, %v4623_v29 }
 0xc8a   : > { %v2192_v40 = vpop.f32.mrf.mxu1 }
 0xc8b   : > { %v2204_v41 = vmul.f32 0.35355338, %v2192_v40 }
 0xc8d   : > { %v2208_v43 = vsel %vm697_vm1, %v2204_v41, -inf }
 0xc8e   : > { %2209 = vmax.xlane.f32.xlu2 %v2208_v43 }
 0xc92   : > { %v2195_v57 = vpop.f32.mrf.mxu1 }
 0xc93   : > { %v2205_v33 = vmul.f32 0.35355338, %v2195_v57 }
 0xc95   : > { %v2211_v44 = vsel %vm697_vm1, %v2205_v33, -inf }
 0xc96   : > { %2212 = vmax.xlane.f32.xlu1 %v2211_v44 }
 0xc9a   : > { %v2198_v47 = vpop.f32.mrf.mxu1 }
 0xc9b   : > { %v2206_v48 = vmul.f32 0.35355338, %v2198_v47 }
 0xc9d   : > { %v2214_v49 = vsel %vm697_vm1, %v2206_v48, -inf }
 0xc9e   : > { %2215 = vmax.xlane.f32.xlu0 %v2214_v49 }
 0xca2   : > { %v2201_v31 = vpop.f32.mrf.mxu1 }
 0xca3   : > { %v2207_v37 = vmul.f32 0.35355338, %v2201_v31 }
 0xca5   : > { %v2217_v10 = vsel %vm697_vm1, %v2207_v37, -inf }
 0xca6   : > { %2218 = vmax.xlane.f32.xlu2 %v2217_v10 }
 0xcb2   : > { %3621 = vrot.lane.b32.xlu0 %v4647_v51, %s5137_s23 }
 0xcbe   : > { %3616 = vrot.lane.b32.xlu2 %v4653_v52, %s5137_s23  ;;  %s5145_s23 = smov 40  }
 0xcc6   : > { %2323 = vrot.lane.b32.xlu2 %v4616_v25, %s5138_s27 }
 0xcce   : > { %2321 = vrot.lane.b32.xlu2 %v4611_v63, %s5138_s27 }
 0xcd6   : > { %2319 = vrot.lane.b32.xlu2 %v4621_v27, %s5138_s27 }
 0xcde   : > { %2313 = vrot.lane.b32.xlu2 %v4611_v63, %s5139_s28 }
 0xce6   : > { %2315 = vrot.lane.b32.xlu2 %v4616_v25, %s5139_s28 }
 0xcee   : > { %2572 = vrot.lane.b32.xlu2 %v4616_v25, %s5140_s29 }
 0xcf6   : > { %2317 = vrot.lane.b32.xlu2 %v4623_v29, %s5139_s28 }
 0xcfe   : > { %2780 = vrot.lane.b32.xlu2 %v4621_v27, %s5141_s0 }
 0xd01   : > { %v2210_v55 = vpop.xlane.xlu2 %2209 }
 0xd02   : > { %v2220_v18 = vsub.f32 %v2204_v41, %v2210_v55  ;;  %v3465_v41 = vld [vmem:[%s5086_s9 + $0x20] sm:$0xff] }
 0xd04   : > { %v2224_v56 = vmul.f32 1.442695, %v2220_v18 }
 0xd06   : > { %3770 = vpow2.f32 %v2224_v56  ;;  %2560 = vrot.lane.b32.xlu2 %v4621_v27, %s5142_s22 }
 0xd09   : > { %v2213_v53 = vpop.xlane.xlu1 %2212 }
 0xd0a   : > { %v2221_v58 = vsub.f32 %v2205_v33, %v2213_v53 }
 0xd0c   : > { %v3771_v60 = vpop.eup %3770  ;;  %v2226_v2 = vmul.f32 1.442695, %v2221_v58 }
 0xd0d   : > { %v2232_v45 = vmul.f32 %v3771_v60, %v4193_v26 }
 0xd0e   : > { %3772 = vpow2.f32 %v2226_v2  ;;  %2566 = vrot.lane.b32.xlu2 %v4623_v29, %s5142_s22 }
 0xd0f   : > { %v2236_v42 = vsel %vm697_vm1, %v2232_v45, 0.0 }
 0xd10   : > { %2237 = vadd.xlane.f32.xlu1 %v2236_v42 }
 0xd11   : > { %v2216_v61 = vpop.xlane.xlu0 %2215 }
 0xd12   : > { %v2222_v30 = vsub.f32 %v2206_v48, %v2216_v61 }
 0xd14   : > { %v3773_v19 = vpop.eup %3772  ;;  %v2228_v1 = vmul.f32 1.442695, %v2222_v30 }
 0xd15   : > { %v2233_v3 = vmul.f32 %v3773_v19, %v4193_v26 }
 0xd16   : > { %3774 = vpow2.f32 %v2228_v1 }
 0xd17   : > { %v2239_v13 = vsel %vm697_vm1, %v2233_v3, 0.0 }
 0xd18   : > { %2240 = vadd.xlane.f32.xlu1 %v2239_v13 }
 0xd19   : > { %v2219_v6 = vpop.xlane.xlu2 %2218 }
 0xd1a   : > { %v2223_v22 = vsub.f32 %v2207_v37, %v2219_v6 }
 0xd1c   : > { %v3775_v4 = vpop.eup %3774  ;;  %v2230_v8 = vmul.f32 1.442695, %v2223_v22 }
 0xd1d   : > { %v2234_v0 = vmul.f32 %v3775_v4, %v4193_v26 }
 0xd1e   : > { %3776 = vpow2.f32 %v2230_v8 }
 0xd1f   : > { %v2242_v11 = vsel %vm697_vm1, %v2234_v0, 0.0 }
 0xd20   : > { %2243 = vadd.xlane.f32.xlu1 %v2242_v11 }
 0xd21   : > { %v3617_v5 = vpop.permute.xlu2 %3616 }
 0xd22   : > { %v3618_v24 = vunpack.i.l.bf16 %v3617_v5  ;;  %v3619_v9 = vunpack.i.h.bf16 %v3617_v5 }
 0xd24   : > { %v3777_v62 = vpop.eup %3776  ;;  %v3622_v12 = vpop.permute.xlu0 %3621  ;;  %2292 = vmatpush.msra.mxu3 %v3618_v24 }
 0xd25   : > { %v3623_v15 = vunpack.i.l.bf16 %v3622_v12  ;;  %v2235_v7 = vmul.f32 %v3777_v62, %v4193_v26  ;;  %v3624_v28 = vunpack.i.h.bf16 %v3622_v12 }
 0xd26   : > { %2293 = vmatpush.msra.mxu3 %v3619_v9 }
 0xd27   : > { %v2245_v14 = vsel %vm697_vm1, %v2235_v7, 0.0 }
 0xd28   : > { %2246 = vadd.xlane.f32.xlu0 %v2245_v14  ;;  %2294 = vmatpush.msra.mxu3 %v3623_v15 }
 0xd29   : > { %v2324_v16 = vpop.permute.xlu2 %2323 }
 0xd2a   : > { %2295 = vmatpush.msra.mxu3 %v3624_v28 }
 0xd2c   : > { %2546 = vmatpush.msrb.mxu3 %v3465_v41 }
 0xd31   : > { %v2322_v32 = vpop.permute.xlu2 %2321 }
 0xd39   : > { %2325 = vrot.lane.b32.xlu1 %v4623_v29, %s5138_s27  ;;  %v2320_v43 = vpop.permute.xlu2 %2319  ;;  %s5146_s27 = smov 48  }
 0xd3c   : > { %2574 = vrot.lane.b32.xlu0 %v4623_v29, %s5140_s29 }
 0xd41   : > { %2311 = vrot.lane.b32.xlu1 %v4621_v27, %s5139_s28  ;;  %v2314_v44 = vpop.permute.xlu2 %2313  ;;  %s3366_s28 = sshll.u32 %s5148_s25, 3 }
 0xd44   : > { %2772 = vrot.lane.b32.xlu0 %v4621_v27, %s5143_s26 }
 0xd49   : > { %2786 = vrot.lane.b32.xlu1 %v4623_v29, %s5141_s0  ;;  %v2316_v48 = vpop.permute.xlu2 %2315 }
 0xd4c   : > { %2562 = vrot.lane.b32.xlu0 %v4611_v63, %s5142_s22 }
 0xd51   : > { %2784 = vrot.lane.b32.xlu1 %v4616_v25, %s5141_s0  ;;  %v2573_v37 = vpop.permute.xlu2 %2572 }
 0xd59   : > { %2782 = vrot.lane.b32.xlu1 %v4611_v63, %s5141_s0  ;;  %v2318_v18 = vpop.permute.xlu2 %2317 }
 0xd61   : > { %2570 = vrot.lane.b32.xlu1 %v4611_v63, %s5140_s29  ;;  %v2781_v53 = vpop.permute.xlu2 %2780 }
 0xd69   : > { %2568 = vrot.lane.b32.xlu1 %v4621_v27, %s5140_s29 }
 0xd71   : > { %2564 = vrot.lane.b32.xlu1 %v4616_v25, %s5142_s22  ;;  %s654_s22 = scalar_lea.vmem %s5098_s21, %s3366_s28 }
 0xd83   : > { %v2238_v46 = vpop.xlane.xlu1 %2237 }
 0xd84   : > { %3778 = vrcp.f32 %v2238_v46 }
 0xd8a   : > { %v3779_v20 = vpop.eup %3778 }
 0xd8b   : > { %v2252_v21 = vmul.f32 %v3779_v20, %v2232_v45  ;;  %v2241_v59 = vpop.xlane.xlu1 %2240  ;;  %v2561_v45 = vpop.permute.xlu2 %2560 }
 0xd8c   : > { %3780 = vrcp.f32 %v2241_v59 }
 0xd8d   : > { %3461 = vmatmul.msk.f32.vlgmr.msra.gmra.mxu3 %vm697_vm1, %v2252_v21 }
 0xd92   : > { %v3781_v23 = vpop.eup %3780 }
 0xd93   : > { %v2244_v34 = vpop.xlane.xlu1 %2243  ;;  %v2253_v36 = vmul.f32 %v3781_v23, %v2233_v3  ;;  %v2567_v30 = vpop.permute.xlu2 %2566 }
 0xd94   : > { %3782 = vrcp.f32 %v2244_v34 }
 0xd95   : > { %3462 = vmatmul.msk.f32.gmra.mxu3 %vm697_vm1, %v2253_v36 }
 0xd9a   : > { %v3783_v27 = vpop.eup %3782 }
 0xd9b   : > { %v2247_v38 = vpop.xlane.xlu0 %2246  ;;  %v2254_v40 = vmul.f32 %v3783_v27, %v2234_v0 }
 0xd9c   : > { %3784 = vrcp.f32 %v2247_v38 }
 0xd9d   : > { %3463 = vmatmul.msk.f32.gmra.mxu3 %vm697_vm1, %v2254_v40 }
 0xda2   : > { %v3785_v57 = vpop.eup %3784 }
 0xda3   : > { %v2255_v33 = vmul.f32 %v3785_v57, %v2235_v7 }
 0xda5   : > { %3464 = vmatmul.msk.f32.gmra.mxu3 %vm697_vm1, %v2255_v33 }
 0xdab   : > { %v2326_v47 = vpop.permute.xlu1 %2325 }
 0xdac   : > { %3466 = vmatpush.xpose.msk.msra.mxu2 %vm903_vm3, %v2326_v47 }
 0xdae   : > { %v2575_v31 = vpop.permute.xlu0 %2574 }
 0xdb0   : > { %3467 = vmatpush.xpose.msk.msra.mxu2 %vm903_vm3, %v2324_v16 }
 0xdb3   : > { %v2312_v49 = vpop.permute.xlu1 %2311 }
 0xdb4   : > { %3468 = vmatpush.xpose.msk.msra.mxu2 %vm903_vm3, %v2322_v32 }
 0xdb6   : > { %v2773_v2 = vpop.permute.xlu0 %2772 }
 0xdb8   : > { %3469 = vmatpush.xpose.msk.msra.mxu2 %vm903_vm3, %v2320_v43 }
 0xdbb   : > { %v2787_v10 = vpop.permute.xlu1 %2786  ;;  %3470 = vmatmul.msk.f32.vlgmr.msra.gmra.mxu2 %vm903_vm3, %v2312_v49 }
 0xdbc   : > { %3487 = vmatpush.xpose.msk.msrb.mxu2 %vm903_vm3, %v2575_v31  ;;  %3504 = vmatpush.xpose.msk.msra.mxu3 %vm903_vm3, %v2787_v10 }
 0xdbe   : > { %v2563_v42 = vpop.permute.xlu0 %2562 }
 0xdc0   : > { %3488 = vmatpush.xpose.msk.msrb.mxu2 %vm903_vm3, %v2573_v37 }
 0xdc3   : > { %v2785_v55 = vpop.permute.xlu1 %2784  ;;  %3471 = vmatmul.msk.f32.gmra.mxu2 %vm903_vm3, %v2314_v44 }
 0xdc4   : > { %3505 = vmatpush.xpose.msk.msra.mxu3 %vm903_vm3, %v2785_v55 }
 0xdcb   : > { %v2783_v56 = vpop.permute.xlu1 %2782  ;;  %3472 = vmatmul.msk.f32.gmra.mxu2 %vm903_vm3, %v2316_v48 }
 0xdcc   : > { %3506 = vmatpush.xpose.msk.msra.mxu3 %vm903_vm3, %v2783_v56 }
 0xdd0   : > { %3507 = vmatpush.xpose.msk.msra.mxu3 %vm903_vm3, %v2781_v53 }
 0xdd3   : > { %v2571_v58 = vpop.permute.xlu1 %2570  ;;  %3473 = vmatmul.msk.f32.gmra.mxu2 %vm903_vm3, %v2318_v18 }
 0xdd4   : > { %3489 = vmatpush.xpose.msk.msrb.mxu2 %vm903_vm3, %v2571_v58 }
 0xddb   : > { %v2569_v60 = vpop.permute.xlu1 %2568 }
 0xddc   : > { %3490 = vmatpush.xpose.msk.msrb.mxu2 %vm903_vm3, %v2569_v60 }
 0xddf   : > { %3491 = vmatmul.msk.f32.vlgmr.msrb.gmra.mxu2 %vm903_vm3, %v2561_v45 }
 0xde3   : > { %v2565_v61 = vpop.permute.xlu1 %2564 }
 0xde7   : > { %3492 = vmatmul.msk.f32.gmra.mxu2 %vm903_vm3, %v2563_v42 }
 0xdef   : > { %3493 = vmatmul.msk.f32.gmra.mxu2 %vm903_vm3, %v2565_v61 }
 0xdf7   : > { %3494 = vmatmul.msk.f32.gmra.mxu2 %vm903_vm3, %v2567_v30 }
 0xe10   : > { %v2297_v19 = vpop.f32.mrf.mxu3 }
 0xe11   : > { %3483 = vmatmul.msk.f32.vlgmr.msrb.gmra.mxu3 %vm903_vm3, %v2297_v19 }
 0xe18   : > { %v2300_v1 = vpop.f32.mrf.mxu3 }
 0xe19   : > { %3484 = vmatmul.msk.f32.gmra.mxu3 %vm903_vm3, %v2300_v1 }
 0xe20   : > { %v2303_v3 = vpop.f32.mrf.mxu3 }
 0xe21   : > { %3485 = vmatmul.msk.f32.gmra.mxu3 %vm903_vm3, %v2303_v3 }
 0xe28   : > { %v2306_v13 = vpop.f32.mrf.mxu3 }
 0xe29   : > { %3486 = vmatmul.msk.f32.gmra.mxu3 %vm903_vm3, %v2306_v13 }
 0xe31   : > { %3508 = vmatmul.msk.f32.vlgmr.msra.gmra.mxu3 %vm903_vm3, %v2773_v2 }
 0xe3e   : > { %v2360_v6 = vpop.f32.mrf.mxu2 }
 0xe3f   : > { %v2372_v22 = vmul.f32 0.35355338, %v2360_v6 }
 0xe41   : > { %v2376_v4 = vsel %vm697_vm1, %v2372_v22, -inf }
 0xe42   : > { %2377 = vmax.xlane.f32.xlu0 %v2376_v4 }
 0xe46   : > { %v2363_v8 = vpop.f32.mrf.mxu2 }
 0xe47   : > { %v2373_v0 = vmul.f32 0.35355338, %v2363_v8 }
 0xe49   : > { %v2379_v11 = vsel %vm697_vm1, %v2373_v0, -inf }
 0xe4a   : > { %2380 = vmax.xlane.f32.xlu1 %v2379_v11 }
 0xe4e   : > { %v2366_v5 = vpop.f32.mrf.mxu2 }
 0xe4f   : > { %v2374_v24 = vmul.f32 0.35355338, %v2366_v5 }
 0xe51   : > { %v2382_v62 = vsel %vm697_vm1, %v2374_v24, -inf }
 0xe52   : > { %2383 = vmax.xlane.f32.xlu2 %v2382_v62 }
 0xe56   : > { %v2369_v9 = vpop.f32.mrf.mxu2 }
 0xe57   : > { %v2375_v12 = vmul.f32 0.35355338, %v2369_v9 }
 0xe59   : > { %v2385_v15 = vsel %vm697_vm1, %v2375_v12, -inf }
 0xe5a   : > { %2386 = vmax.xlane.f32.xlu0 %v2385_v15 }
 0xe62   : > { %v2609_v7 = vpop.f32.mrf.mxu2 }
 0xe63   : > { %v2621_v14 = vmul.f32 0.35355338, %v2609_v7 }
 0xe65   : > { %v2625_v28 = vsel %vm697_vm1, %v2621_v14, -inf }
 0xe66   : > { %2626 = vmax.xlane.f32.xlu1 %v2625_v28 }
 0xe6a   : > { %v2612_v23 = vpop.f32.mrf.mxu2 }
 0xe6b   : > { %v4806_v62 = vmul.f32 0.35355338, %v2612_v23 }
 0xe6d   : > { %v2628_v15 = vsel %vm697_vm1, %v4806_v62, -inf }
 0xe72   : > { %v4768_v41 = vpop.f32.mrf.mxu2 }
 0xe7a   : > { %v2618_v31 = vpop.f32.mrf.mxu2 }
 0xe7b   : > { %v4780_v55 = vmul.f32 0.35355338, %v2618_v31 }
 0xe7d   : > { %v2634_v60 = vsel %vm697_vm1, %v4780_v55, -inf }
 0xe7f   : > { %3631 = vrot.lane.b32.xlu1 %v4647_v51, %s5144_s5 }
 0xe87   : > { %3636 = vrot.lane.b32.xlu1 %v4653_v52, %s5145_s23 }
 0xe8f   : > { %3641 = vrot.lane.b32.xlu1 %v4653_v52, %s5146_s27 }
 0xe94   : > { %v4750_v46 = vpop.f32.mrf.mxu3 }
 0xe97   : > { %3651 = vrot.lane.b32.xlu1 %v4647_v51, %s5146_s27 }
 0xe9c   : > { %v4754_v16 = vpop.f32.mrf.mxu3 }
 0xe9f   : > { %2774 = vrot.lane.b32.xlu1 %v4611_v63, %s5143_s26 }
 0xea4   : > { %v4758_v20 = vpop.f32.mrf.mxu3 }
 0xea7   : > { %2778 = vrot.lane.b32.xlu1 %v4623_v29, %s5143_s26 }
 0xeac   : > { %v4762_v21 = vpop.f32.mrf.mxu3 }
 0xeb4   : > { %v2821_v59 = vpop.f32.mrf.mxu3 }
 0xeb5   : > { %v4764_v32 = vmul.f32 0.35355338, %v2821_v59  ;;  %v2378_v34 = vpop.xlane.xlu0 %2377 }
 0xeb6   : > { %v2388_v36 = vsub.f32 %v2372_v22, %v2378_v34 }
 0xeb7   : > { %v2837_v27 = vsel %vm697_vm1, %v4764_v32, -inf }
 0xeb8   : > { %v2392_v38 = vmul.f32 1.442695, %v2388_v36  ;;  %2838 = vmax.xlane.f32.xlu2 %v2837_v27 }
 0xeba   : > { %3786 = vpow2.f32 %v2392_v38  ;;  %v2623_v38 = vmul.f32 0.35355338, %v4768_v41 }
 0xebd   : > { %v2381_v63 = vpop.xlane.xlu1 %2380 }
 0xebe   : > { %v2389_v40 = vsub.f32 %v2373_v0, %v2381_v63 }
 0xec0   : > { %v3787_v43 = vpop.eup %3786  ;;  %v2394_v29 = vmul.f32 1.442695, %v2389_v40 }
 0xec1   : > { %v4771_v57 = vmul.f32 %v3787_v43, %v4193_v26 }
 0xec2   : > { %3788 = vpow2.f32 %v2394_v29 }
 0xec3   : > { %v2404_v33 = vsel %vm697_vm1, %v4771_v57, 0.0 }
 0xec4   : > { %2405 = vadd.xlane.f32.xlu0 %v2404_v33 }
 0xec5   : > { %v2384_v44 = vpop.xlane.xlu2 %2383 }
 0xec6   : > { %v2390_v47 = vsub.f32 %v2374_v24, %v2384_v44  ;;  %v2631_v44 = vsel %vm697_vm1, %v2623_v38, -inf }
 0xec8   : > { %v3789_v48 = vpop.eup %3788  ;;  %v2396_v49 = vmul.f32 1.442695, %v2390_v47 }
 0xec9   : > { %v4776_v37 = vmul.f32 %v3789_v48, %v4193_v26 }
 0xeca   : > { %3790 = vpow2.f32 %v2396_v49 }
 0xecb   : > { %v2407_v10 = vsel %vm697_vm1, %v4776_v37, 0.0 }
 0xecc   : > { %2408 = vadd.xlane.f32.xlu0 %v2407_v10 }
 0xecd   : > { %v2387_v18 = vpop.xlane.xlu0 %2386 }
 0xece   : > { %v2391_v56 = vsub.f32 %v2375_v12, %v2387_v18 }
 0xed0   : > { %v3791_v53 = vpop.eup %3790  ;;  %v2398_v58 = vmul.f32 1.442695, %v2391_v56  ;;  %3626 = vrot.lane.b32.xlu2 %v4653_v52, %s5144_s5 }
 0xed1   : > { %2635 = vmax.xlane.f32.xlu1 %v2634_v60  ;;  %v4787_v2 = vmul.f32 %v3791_v53, %v4193_v26 }
 0xed2   : > { %3792 = vpow2.f32 %v2398_v58 }
 0xed3   : > { %v2410_v45 = vsel %vm697_vm1, %v4787_v2, 0.0 }
 0xed4   : > { %2411 = vadd.xlane.f32.xlu0 %v2410_v45 }
 0xed8   : > { %v3793_v42 = vpop.eup %3792 }
 0xed9   : > { %v2627_v61 = vpop.xlane.xlu1 %2626  ;;  %v4792_v30 = vmul.f32 %v3793_v42, %v4193_v26 }
 0xeda   : > { %v2637_v19 = vsub.f32 %v2621_v14, %v2627_v61 }
 0xedb   : > { %v2413_v52 = vsel %vm697_vm1, %v4792_v30, 0.0 }
 0xedc   : > { %v2641_v1 = vmul.f32 1.442695, %v2637_v19  ;;  %2414 = vadd.xlane.f32.xlu0 %v2413_v52 }
 0xede   : > { %3794 = vpow2.f32 %v2641_v1 }
 0xee4   : > { %v3795_v3 = vpop.eup %3794 }
 0xee5   : > { %v4797_v13 = vmul.f32 %v3795_v3, %v4193_v26 }
 0xee7   : > { %v2653_v6 = vsel %vm697_vm1, %v4797_v13, 0.0 }
 0xee8   : > { %2654 = vadd.xlane.f32.xlu0 %v2653_v6 }
 0xef1   : > { %v3632_v22 = vpop.permute.xlu1 %3631 }
 0xef2   : > { %v3633_v23 = vunpack.i.l.bf16 %v3632_v22  ;;  %v3634_v36 = vunpack.i.h.bf16 %v3632_v22 }
 0xef9   : > { %v3637_v4 = vpop.permute.xlu1 %3636 }
 0xefa   : > { %v3638_v8 = vunpack.i.l.bf16 %v3637_v4  ;;  %v3639_v0 = vunpack.i.h.bf16 %v3637_v4 }
 0xefc   : > { %2921 = vmatpush.msra.mxu2 %v3638_v8  ;;  %3646 = vrot.lane.b32.xlu0 %v4647_v51, %s5145_s23 }
 0xefe   : > { %2922 = vmatpush.msra.mxu2 %v3639_v0 }
 0xf01   : > { %v3642_v11 = vpop.permute.xlu1 %3641 }
 0xf02   : > { %v3643_v27 = vunpack.i.l.bf16 %v3642_v11  ;;  %v3644_v63 = vunpack.i.h.bf16 %v3642_v11 }
 0xf04   : > { %2776 = vrot.lane.b32.xlu0 %v4616_v25, %s5143_s26 }
 0xf09   : > { %v3652_v5 = vpop.permute.xlu1 %3651 }
 0xf0a   : > { %v3653_v33 = vunpack.i.l.bf16 %v3652_v5  ;;  %v3654_v47 = vunpack.i.h.bf16 %v3652_v5 }
 0xf11   : > { %v2775_v24 = vpop.permute.xlu1 %2774 }
 0xf12   : > { %3509 = vmatmul.msk.f32.gmra.mxu3 %vm903_vm3, %v2775_v24 }
 0xf19   : > { %v2779_v61 = vpop.permute.xlu1 %2778 }
 0xf2b   : > { %v2839_v9 = vpop.xlane.xlu2 %2838 }
 0xf2c   : > { %v2849_v12 = vsub.f32 %v4764_v32, %v2839_v9 }
 0xf2e   : > { %v2853_v7 = vmul.f32 1.442695, %v2849_v12  ;;  %2629 = vmax.xlane.f32.xlu0 %v2628_v15 }
 0xf30   : > { %3796 = vpow2.f32 %v2853_v7 }
 0xf33   : > { %v3627_v51 = vpop.permute.xlu2 %3626 }
 0xf34   : > { %v3628_v14 = vunpack.i.l.bf16 %v3627_v51  ;;  %v3629_v59 = vunpack.i.h.bf16 %v3627_v51  ;;  %v3499_v51 = vld [vmem:[%s5086_s9 + $0x30] sm:$0xff] }
 0xf36   : > { %v3797_v28 = vpop.eup %3796  ;;  %2460 = vmatpush.msrb.mxu0 %v3628_v14 }
 0xf37   : > { %v2406_v25 = vpop.xlane.xlu0 %2405  ;;  %v4812_v34 = vmul.f32 %v3797_v28, %v4193_v26 }
 0xf38   : > { %3798 = vrcp.f32 %v2406_v25  ;;  %2461 = vmatpush.msrb.mxu0 %v3629_v59 }
 0xf39   : > { %v2865_v32 = vsel %vm697_vm1, %v4812_v34, 0.0 }
 0xf3a   : > { %2866 = vadd.xlane.f32.xlu2 %v2865_v32  ;;  %2462 = vmatpush.msrb.mxu0 %v3633_v23 }
 0xf3c   : > { %2463 = vmatpush.msrb.mxu0 %v3634_v36 }
 0xf3e   : > { %2709 = vmatpush.msra.mxu0 %v3643_v27  ;;  %v3799_v40 = vpop.eup %3798 }
 0xf3f   : > { %v2420_v43 = vmul.f32 %v3799_v40, %v4771_v57  ;;  %v2409_v29 = vpop.xlane.xlu0 %2408 }
 0xf40   : > { %2710 = vmatpush.msra.mxu0 %v3644_v63  ;;  %3800 = vrcp.f32 %v2409_v29 }
 0xf41   : > { %3474 = vmatmul.msk.f32.vlgmr.msrb.gmra.mxu0 %vm697_vm1, %v2420_v43 }
 0xf42   : > { %2711 = vmatpush.msra.mxu0 %v3653_v33  ;;  %2632 = vmax.xlane.f32.xlu2 %v2631_v44 }
 0xf44   : > { %2712 = vmatpush.msra.mxu0 %v3654_v47  ;;  %v2636_v4 = vpop.xlane.xlu1 %2635  ;;  %v3516_v47 = vld [vmem:[%s5086_s9 + $0x38] sm:$0xff] }
 0xf45   : > { %v2640_v5 = vsub.f32 %v4780_v55, %v2636_v4 }
 0xf46   : > { %v3801_v48 = vpop.eup %3800  ;;  %2966 = vmatpush.msrb.mxu0 %v3516_v47 }
 0xf47   : > { %v2412_v49 = vpop.xlane.xlu0 %2411  ;;  %v2421_v41 = vmul.f32 %v3801_v48, %v4776_v37  ;;  %v2647_v9 = vmul.f32 1.442695, %v2640_v5 }
 0xf48   : > { %3802 = vrcp.f32 %v2412_v49 }
 0xf49   : > { %3475 = vmatmul.msk.f32.gmra.mxu0 %vm697_vm1, %v2421_v41 }
 0xf4e   : > { %v3803_v57 = vpop.eup %3802 }
 0xf4f   : > { %v2415_v31 = vpop.xlane.xlu0 %2414  ;;  %v2422_v10 = vmul.f32 %v3803_v57, %v4787_v2 }
 0xf50   : > { %3804 = vrcp.f32 %v2415_v31 }
 0xf51   : > { %3476 = vmatmul.msk.f32.gmra.mxu0 %vm697_vm1, %v2422_v10 }
 0xf56   : > { %v3805_v18 = vpop.eup %3804 }
 0xf57   : > { %v2423_v56 = vmul.f32 %v3805_v18, %v4792_v30  ;;  %v3478_v30 = vld [vmem:[%s5086_s9 + $0x28] sm:$0xff] }
 0xf58   : > { %2505 = vmatpush.msrb.mxu1 %v3478_v30 }
 0xf59   : > { %3477 = vmatmul.msk.f32.gmra.mxu0 %vm697_vm1, %v2423_v56 }
 0xf5a   : > { %2754 = vmatpush.msra.mxu1 %v3499_v51 }
 0xf5b   : > { %v2655_v53 = vpop.xlane.xlu0 %2654 }
 0xf5c   : > { %3806 = vrcp.f32 %v2655_v53 }
 0xf62   : > { %v3807_v58 = vpop.eup %3806 }
 0xf63   : > { %v2669_v37 = vmul.f32 %v3807_v58, %v4797_v13 }
 0xf65   : > { %3495 = vmatmul.msk.f32.vlgmr.msra.gmra.mxu0 %vm697_vm1, %v2669_v37 }
 0xf6e   : > { %v3647_v60 = vpop.permute.xlu0 %3646 }
 0xf6f   : > { %v3648_v45 = vunpack.i.l.bf16 %v3647_v60  ;;  %v3649_v42 = vunpack.i.h.bf16 %v3647_v60 }
 0xf71   : > { %2923 = vmatpush.msra.mxu2 %v3648_v45 }
 0xf73   : > { %2924 = vmatpush.msra.mxu2 %v3649_v42 }
 0xf76   : > { %v2777_v2 = vpop.permute.xlu0 %2776 }
 0xf77   : > { %3510 = vmatmul.msk.f32.gmra.mxu3 %vm903_vm3, %v2777_v2 }
 0xf7f   : > { %3511 = vmatmul.msk.f32.gmra.mxu3 %vm903_vm3, %v2779_v61 }
 0xfa1   : > { %v2630_v19 = vpop.xlane.xlu0 %2629 }
 0xfa2   : > { %v2638_v52 = vsub.f32 %v4806_v62, %v2630_v19 }
 0xfa4   : > { %v2643_v1 = vmul.f32 1.442695, %v2638_v52 }
 0xfa6   : > { %3808 = vpow2.f32 %v2643_v1 }
 0xfac   : > { %v3809_v3 = vpop.eup %3808 }
 0xfad   : > { %v2867_v13 = vpop.xlane.xlu2 %2866  ;;  %v2650_v6 = vmul.f32 %v3809_v3, %v4193_v26 }
 0xfae   : > { %3810 = vrcp.f32 %v2867_v13 }
 0xfaf   : > { %v2656_v22 = vsel %vm697_vm1, %v2650_v6, 0.0 }
 0xfb0   : > { %2657 = vadd.xlane.f32.xlu2 %v2656_v22 }
 0xfb4   : > { %v3811_v8 = vpop.eup %3810 }
 0xfb5   : > { %v2881_v0 = vmul.f32 %v3811_v8, %v4812_v34  ;;  %v2633_v11 = vpop.xlane.xlu2 %2632  ;;  %v2824_v34 = vpop.f32.mrf.mxu3 }
 0xfb6   : > { %v2639_v24 = vsub.f32 %v2623_v38, %v2633_v11  ;;  %v2834_v32 = vmul.f32 0.35355338, %v2824_v34 }
 0xfb7   : > { %3512 = vmatmul.msk.f32.vlgmr.msra.gmra.mxu2 %vm697_vm1, %v2881_v0 }
 0xfb8   : > { %v2645_v62 = vmul.f32 1.442695, %v2639_v24  ;;  %v2840_v36 = vsel %vm697_vm1, %v2834_v32, -inf }
 0xfba   : > { %3812 = vpow2.f32 %v2645_v62 }
 0xfbb   : > { %3814 = vpow2.f32 %v2647_v9 }
 0xfbe   : > { %v2465_v12 = vpop.f32.mrf.mxu0 }
 0xfbf   : > { %3479 = vmatmul.msk.f32.vlgmr.msrb.gmra.mxu1 %vm903_vm3, %v2465_v12 }
 0xfc0   : > { %v3813_v15 = vpop.eup %3812 }
 0xfc1   : > { %v2651_v7 = vmul.f32 %v3813_v15, %v4193_v26  ;;  %v3815_v55 = vpop.eup %3814 }
 0xfc2   : > { %v2652_v59 = vmul.f32 %v3815_v55, %v4193_v26 }
 0xfc3   : > { %v2659_v14 = vsel %vm697_vm1, %v2651_v7, 0.0 }
 0xfc4   : > { %2660 = vadd.xlane.f32.xlu2 %v2659_v14  ;;  %v2662_v25 = vsel %vm697_vm1, %v2652_v59, 0.0 }
 0xfc6   : > { %v2468_v28 = vpop.f32.mrf.mxu0 }
 0xfc7   : > { %3480 = vmatmul.msk.f32.gmra.mxu1 %vm903_vm3, %v2468_v28 }
 0xfcc   : > { %2663 = vadd.xlane.f32.xlu2 %v2662_v25  ;;  %v4878_v25 = vld [vmem:[%s5087_s10 + $0x1] ss:$0 sm:$0xff] }
 0xfce   : > { %v2471_v23 = vpop.f32.mrf.mxu0 }
 0xfcf   : > { %3481 = vmatmul.msk.f32.gmra.mxu1 %vm903_vm3, %v2471_v23 }
 0xfd4   : > { %2841 = vmax.xlane.f32.xlu2 %v2840_v36 }
 0xfd6   : > { %v2474_v27 = vpop.f32.mrf.mxu0 }
 0xfd7   : > { %3482 = vmatmul.msk.f32.gmra.mxu1 %vm903_vm3, %v2474_v27 }
 0xfe2   : > { %v2714_v38 = vpop.f32.mrf.mxu0 }
 0xfe3   : > { %3500 = vmatmul.msk.f32.vlgmr.msra.gmra.mxu1 %vm903_vm3, %v2714_v38 }
 0xffa   : > { %v2827_v63 = vpop.f32.mrf.mxu3 }
 0xffb   : > { %v2835_v40 = vmul.f32 0.35355338, %v2827_v63 }
 0xffd   : > { %v2843_v43 = vsel %vm697_vm1, %v2835_v40, -inf }
 0xffe   : > { %2844 = vmax.xlane.f32.xlu2 %v2843_v43 }
0x1002   : > { %v2830_v29 = vpop.f32.mrf.mxu3 }
0x1003   : > { %v2836_v33 = vmul.f32 0.35355338, %v2830_v29 }
0x1005   : > { %v2846_v44 = vsel %vm697_vm1, %v2836_v33, -inf }
0x1006   : > { %2847 = vmax.xlane.f32.xlu0 %v2846_v44 }
0x1023   : > { %v2658_v48 = vpop.xlane.xlu2 %2657 }
0x1024   : > { %3816 = vrcp.f32 %v2658_v48 }
0x102a   : > { %v3817_v49 = vpop.eup %3816 }
0x102b   : > { %v2670_v41 = vmul.f32 %v3817_v49, %v2650_v6 }
0x102d   : > { %3496 = vmatmul.msk.f32.gmra.mxu0 %vm697_vm1, %v2670_v41 }
0x1037   : > { %v2661_v57 = vpop.xlane.xlu2 %2660 }
0x1038   : > { %3818 = vrcp.f32 %v2661_v57 }
0x103a   : > { %v2926_v45 = vpop.f32.mrf.mxu2 }
0x103c   : > { %v2507_v5 = vpop.f32.mrf.mxu1 }
0x103d   : > { %v2549_v14 = vadd.f32 %v4750_v46, %v2507_v5 }
0x103e   : > { %v3819_v31 = vpop.eup %3818 }
0x103f   : > { %v2664_v10 = vpop.xlane.xlu2 %2663  ;;  %v2671_v18 = vmul.f32 %v3819_v31, %v2651_v7  ;;  %v3527_v31 = vld [vmem:[%s5090_s13 + $0x38] sm:$0xff] }
0x1040   : > { %3820 = vrcp.f32 %v2664_v10  ;;  %3137 = vmatpush.msrb.mxu1 %v3527_v31  ;;  %v3526_v10 = vld [vmem:[%s5090_s13 + $0x30] sm:$0xff] }
0x1041   : > { %3497 = vmatmul.msk.f32.gmra.mxu0 %vm697_vm1, %v2671_v18  ;;  %v3525_v18 = vld [vmem:[%s5090_s13 + $0x28] sm:$0xff] }
0x1042   : > { %3138 = vmatpush.msrb.mxu1 %v3526_v10 }
0x1044   : > { %v2510_v62 = vpop.f32.mrf.mxu1  ;;  %3139 = vmatpush.msrb.mxu1 %v3525_v18  ;;  %v4998_v18 = vld [vmem:[%s5091_s14 + $0x1] ss:$0 sm:$0xff] }
0x1046   : > { %v3821_v56 = vpop.eup %3820 }
0x1047   : > { %v2842_v53 = vpop.xlane.xlu2 %2841  ;;  %v2672_v58 = vmul.f32 %v3821_v56, %v2652_v59  ;;  %v3524_v56 = vld [vmem:[%s5090_s13 + $0x20] sm:$0xff] }
0x1048   : > { %v2850_v37 = vsub.f32 %v2834_v32, %v2842_v53  ;;  %3140 = vmatpush.msrb.mxu1 %v3524_v56 }
0x1049   : > { %3498 = vmatmul.msk.f32.gmra.mxu0 %vm697_vm1, %v2672_v58 }
0x104a   : > { %v2855_v60 = vmul.f32 1.442695, %v2850_v37 }
0x104c   : > { %3822 = vpow2.f32 %v2855_v60  ;;  %v4868_v9 = vpop.f32.mrf.mxu1 }
0x1051   : > { %3517 = vmatmul.msk.f32.vlgmr.msrb.gmra.mxu0 %vm903_vm3, %v2926_v45 }
0x1052   : > { %v3823_v42 = vpop.eup %3822 }
0x1053   : > { %v2862_v2 = vmul.f32 %v3823_v42, %v4193_v26 }
0x1054   : > { %v4871_v15 = vpop.f32.mrf.mxu1 }
0x1055   : > { %v2868_v61 = vsel %vm697_vm1, %v2862_v2, 0.0 }
0x1056   : > { %2869 = vadd.xlane.f32.xlu1 %v2868_v61 }
0x1071   : > { %v2845_v30 = vpop.xlane.xlu2 %2844 }
0x1072   : > { %v2851_v19 = vsub.f32 %v2835_v40, %v2845_v30 }
0x1074   : > { %v2857_v52 = vmul.f32 1.442695, %v2851_v19 }
0x1076   : > { %3824 = vpow2.f32 %v2857_v52 }
0x1079   : > { %v2848_v1 = vpop.xlane.xlu0 %2847 }
0x107a   : > { %v2852_v3 = vsub.f32 %v2836_v33, %v2848_v1 }
0x107c   : > { %v3825_v13 = vpop.eup %3824  ;;  %v2859_v6 = vmul.f32 1.442695, %v2852_v3 }
0x107d   : > { %v2863_v22 = vmul.f32 %v3825_v13, %v4193_v26 }
0x107e   : > { %3826 = vpow2.f32 %v2859_v6 }
0x107f   : > { %v2871_v4 = vsel %vm697_vm1, %v2863_v22, 0.0 }
0x1080   : > { %2872 = vadd.xlane.f32.xlu2 %v2871_v4 }
0x1084   : > { %v3827_v8 = vpop.eup %3826 }
0x1085   : > { %v2864_v0 = vmul.f32 %v3827_v8, %v4193_v26  ;;  %v2756_v26 = vpop.f32.mrf.mxu1  ;;  %v4921_v8 = vld [vmem:[%s5089_s12 + $0x1] ss:$0 sm:$0xff] }
0x1086   : > { %v2768_v55 = vadd.f32 %v2756_v26, %v2549_v14 }
0x1087   : > { %v2874_v11 = vsel %vm697_vm1, %v2864_v0, 0.0 }
0x1088   : > { %2875 = vadd.xlane.f32.xlu0 %v2874_v11 }
0x10aa   : > { %v2717_v24 = vpop.f32.mrf.mxu0 }
0x10ab   : > { %3501 = vmatmul.msk.f32.gmra.mxu1 %vm903_vm3, %v2717_v24 }
0x10be   : > { %v2720_v12 = vpop.f32.mrf.mxu0 }
0x10bf   : > { %3502 = vmatmul.msk.f32.gmra.mxu1 %vm903_vm3, %v2720_v12 }
0x10c6   : > { %v2723_v7 = vpop.f32.mrf.mxu0 }
0x10c7   : > { %3503 = vmatmul.msk.f32.gmra.mxu1 %vm903_vm3, %v2723_v7 }
0x10c9   : > { %v2870_v51 = vpop.xlane.xlu1 %2869 }
0x10ca   : > { %3828 = vrcp.f32 %v2870_v51 }
0x10ce   : > { %v2968_v28 = vpop.f32.mrf.mxu0 }
0x10cf   : > { %v2980_v59 = vadd.f32 %v2968_v28, %v2768_v55  ;;  %v2558_v55 = vadd.f32 %v4762_v21, %v4871_v15  ;;  %v3548_v21 = vld [vmem:[%s5092_s15 + $0xf8] sm:$0xff]  ;;  %v3547_v15 = vld [vmem:[%s5092_s15 + $0xf0] sm:$0xff] }
0x10d0   : > { %v3829_v34 = vpop.eup %3828  ;;  %3212 = vmatpush.msrb.mxu3 %v3548_v21 }
0x10d1   : > { %v2984_v23 = vadd.f32 %v2980_v59, %v4534_v50  ;;  %v2882_v32 = vmul.f32 %v3829_v34, %v2862_v2  ;;  %v2552_v2 = vadd.f32 %v4754_v16, %v2510_v62  ;;  %v2555_v62 = vadd.f32 %v4758_v20, %v4868_v9 }
0x10d2   : > { %3213 = vmatpush.msrb.mxu3 %v3547_v15  ;;  %v5019_v15 = vld [vmem:[%s5093_s16 + $0x1] ss:$0 sm:$0xff] }
0x10d3   : > { %v4882_v36 = vadd.f32 %v4878_v25, %v2984_v23  ;;  %3513 = vmatmul.msk.f32.gmra.mxu2 %vm697_vm1, %v2882_v32 }
0x10d5   : > { %v3001_v46 = vsel %vm697_vm1, %v4882_v36, 0.0 }
0x10d6   : > { %3002 = vadd.xlane.f32.xlu1 %v3001_v46  ;;  %v3544_v46 = vld [vmem:[%s5092_s15 + $0xd8] sm:$0xff] }
0x10f3   : > { %v2873_v27 = vpop.xlane.xlu2 %2872 }
0x10f4   : > { %3830 = vrcp.f32 %v2873_v27  ;;  %v3543_v27 = vld [vmem:[%s5092_s15 + $0xd0] sm:$0xff] }
0x10fa   : > { %v3831_v38 = vpop.eup %3830 }
0x10fb   : > { %v2876_v63 = vpop.xlane.xlu0 %2875  ;;  %v2883_v40 = vmul.f32 %v3831_v38, %v2863_v22  ;;  %v4913_v22 = vld [vmem:[%s5088_s11 + $0x1] ss:$0 sm:$0xff]  ;;  %v3542_v38 = vld [vmem:[%s5092_s15 + $0xc8] sm:$0xff] }
0x10fc   : > { %3832 = vrcp.f32 %v2876_v63  ;;  %v3541_v63 = vld [vmem:[%s5092_s15 + $0xc0] sm:$0xff] }
0x10fd   : > { %3514 = vmatmul.msk.f32.gmra.mxu2 %vm697_vm1, %v2883_v40  ;;  %v3540_v40 = vld [vmem:[%s5092_s15 + $0xb8] sm:$0xff] }
0x1102   : > { %v3833_v43 = vpop.eup %3832 }
0x1103   : > { %v2884_v50 = vmul.f32 %v3833_v43, %v2864_v0  ;;  %v3539_v43 = vld [vmem:[%s5092_s15 + $0xb0] sm:$0xff] }
0x1105   : > { %3515 = vmatmul.msk.f32.gmra.mxu2 %vm697_vm1, %v2884_v50  ;;  %v3538_v50 = vld [vmem:[%s5092_s15 + $0xa8] sm:$0xff] }
0x1128   : > { %v2759_v45 = vpop.f32.mrf.mxu1 }
0x1129   : > { %v2769_v30 = vadd.f32 %v2759_v45, %v2552_v2 }
0x113c   : > { %v2762_v24 = vpop.f32.mrf.mxu1 }
0x113d   : > { %v2770_v12 = vadd.f32 %v2762_v24, %v2555_v62 }
0x1144   : > { %v2765_v14 = vpop.f32.mrf.mxu1 }
0x1145   : > { %v2771_v59 = vadd.f32 %v2765_v14, %v2558_v55 }
0x1149   : > { %v3003_v29 = vpop.xlane.xlu1 %3002 }
0x114a   : > { %v3013_v33 = vmul.f32 %v3003_v29, %v4049_v35  ;;  %v3537_v29 = vld [vmem:[%s5092_s15 + $0xa0] sm:$0xff] }
0x114c   : > { %v3017_v44 = vsub.f32 %v4882_v36, %v3013_v33  ;;  %v3536_v33 = vld [vmem:[%s5092_s15 + $0x98] sm:$0xff] }
0x114e   : > { %v3021_v47 = vmul.f32 %v3017_v44, %v3017_v44 }
0x1150   : > { %v3025_v48 = vsel %vm697_vm1, %v3021_v47, 0.0  ;;  %v3535_v47 = vld [vmem:[%s5092_s15 + $0x90] sm:$0xff] }
0x1151   : > { %3026 = vadd.xlane.f32.xlu2 %v3025_v48 }
0x1156   : > { %v2929_v49 = vpop.f32.mrf.mxu2 }
0x1157   : > { %3518 = vmatmul.msk.f32.gmra.mxu0 %vm903_vm3, %v2929_v49  ;;  %v3534_v49 = vld [vmem:[%s5092_s15 + $0x88] sm:$0xff] }
0x1180   : > { %v2932_v41 = vpop.f32.mrf.mxu2 }
0x1181   : > { %3519 = vmatmul.msk.f32.gmra.mxu0 %vm903_vm3, %v2932_v41 }
0x1188   : > { %v2935_v57 = vpop.f32.mrf.mxu2 }
0x1189   : > { %3520 = vmatmul.msk.f32.gmra.mxu0 %vm903_vm3, %v2935_v57  ;;  %v3533_v57 = vld [vmem:[%s5092_s15 + $0x80] sm:$0xff] }
0x11c4   : > { %v3027_v53 = vpop.xlane.xlu2 %3026 }
0x11c5   : > { %v3037_v58 = vmul.f32 %v3027_v53, %v4049_v35 }
0x11c7   : > { %v3041_v37 = vadd.f32 1e-06, %v3037_v58 }
0x11c9   : > { %3834 = vrsqrt.f32 %v3041_v37  ;;  %vm3051_vm3 = vweird.f32 %v3041_v37 }
0x11cf   : > { %v3835_v60 = vpop.eup %3834 }
0x11d0   : > { %v3046_v42 = vmul.f32 %v3835_v60, %v3041_v37  ;;  %vm3052_vm0 = vweird.f32 %v3835_v60 }
0x11d1   : > { %vm3053_vm5 = vmor %vm3051_vm3, %vm3052_vm0 }
0x11d2   : > { %v3047_v61 = vmul.f32 %v3835_v60, %v3046_v42 }
0x11d4   : > { %v3048_v19 = vmul.f32 0.5, %v3047_v61  ;;  %v2971_v52 = vpop.f32.mrf.mxu0 }
0x11d5   : > { %v2981_v1 = vadd.f32 %v2971_v52, %v2769_v30 }
0x11d6   : > { %v3049_v3 = vsub.f32 1.5, %v3048_v19 }
0x11d7   : > { %v2985_v13 = vadd.f32 %v2981_v1, %v4539_v54 }
0x11d8   : > { %v3050_v6 = vmul.f32 %v3835_v60, %v3049_v3 }
0x11d9   : > { %v4916_v4 = vadd.f32 %v4878_v25, %v2985_v13 }
0x11da   : > { %v3054_v16 = vsel %vm3053_vm5, %v3835_v60, %v3050_v6 }
0x11db   : > { %v3085_v0 = vmul.f32 %v3054_v16, %v3017_v44  ;;  %v3004_v54 = vsel %vm697_vm1, %v4916_v4, 0.0 }
0x11dc   : > { %3005 = vadd.xlane.f32.xlu0 %v3004_v54 }
0x11dd   : > { %v3092_v11 = vmul.f32 %v4913_v22, %v3085_v0 }
0x11df   : > { %v3099_v5 = vadd.f32 %v4921_v8, %v3092_v11 }
0x11e1   : > { %3529 = vmatmul.msk.f32.vlgmr.msrb.gmra.mxu1 %vm697_vm1, %v3099_v5 }
0x11fe   : > { %v2974_v7 = vpop.f32.mrf.mxu0 }
0x11ff   : > { %v2982_v51 = vadd.f32 %v2974_v7, %v2770_v12 }
0x1201   : > { %v2986_v26 = vadd.f32 %v2982_v51, %v4544_v39 }
0x1203   : > { %v4934_v28 = vadd.f32 %v4878_v25, %v2986_v26 }
0x1205   : > { %v3007_v34 = vsel %vm697_vm1, %v4934_v28, 0.0 }
0x1206   : > { %3008 = vadd.xlane.f32.xlu1 %v3007_v34  ;;  %v2977_v23 = vpop.f32.mrf.mxu0 }
0x1207   : > { %v2983_v32 = vadd.f32 %v2977_v23, %v2771_v59 }
0x1209   : > { %v2987_v20 = vadd.f32 %v2983_v32, %v4549_v17  ;;  %v3546_v17 = vld [vmem:[%s5092_s15 + $0xe8] sm:$0xff] }
0x120a   : > { %3214 = vmatpush.msrb.mxu3 %v3546_v17 }
0x120b   : > { %v4940_v9 = vadd.f32 %v4878_v25, %v2987_v20  ;;  %v3545_v25 = vld [vmem:[%s5092_s15 + $0xe0] sm:$0xff] }
0x120c   : > { %3215 = vmatpush.msrb.mxu3 %v3545_v25 }
0x120d   : > { %v3010_v39 = vsel %vm697_vm1, %v4940_v9, 0.0 }
0x120e   : > { %3011 = vadd.xlane.f32.xlu2 %v3010_v39  ;;  %3216 = vmatpush.msrb.mxu3 %v3544_v46 }
0x1210   : > { %3217 = vmatpush.msrb.mxu3 %v3543_v27 }
0x1212   : > { %3218 = vmatpush.msrb.mxu3 %v3542_v38 }
0x1214   : > { %3219 = vmatpush.msrb.mxu3 %v3541_v63 }
0x1216   : > { %3220 = vmatpush.msrb.mxu3 %v3540_v40 }
0x1218   : > { %3221 = vmatpush.msrb.mxu3 %v3539_v43 }
0x121a   : > { %3222 = vmatpush.msrb.mxu3 %v3538_v50 }
0x121c   : > { %3223 = vmatpush.msrb.mxu3 %v3537_v29 }
0x121e   : > { %3224 = vmatpush.msrb.mxu3 %v3536_v33 }
0x1220   : > { %3225 = vmatpush.msrb.mxu3 %v3535_v47 }
0x1222   : > { %3226 = vmatpush.msrb.mxu3 %v3534_v49 }
0x1224   : > { %3227 = vmatpush.msrb.mxu3 %v3533_v57 }
0x124f   : > { %v3006_v44 = vpop.xlane.xlu0 %3005 }
0x1250   : > { %v3014_v48 = vmul.f32 %v3006_v44, %v4049_v35 }
0x1252   : > { %v3018_v41 = vsub.f32 %v4916_v4, %v3014_v48 }
0x1254   : > { %v3022_v31 = vmul.f32 %v3018_v41, %v3018_v41 }
0x1256   : > { %v3028_v10 = vsel %vm697_vm1, %v3022_v31, 0.0 }
0x1257   : > { %3029 = vadd.xlane.f32.xlu0 %v3028_v10 }
0x125e   : > { %v3142_v56 = vpop.f32.mrf.mxu1 }
0x125f   : > { %v3143_v53 = vadd.f32 %v4998_v18, %v3142_v56 }
0x1261   : > { %v3158_v58 = vmul.f32 0.044715, %v3143_v53  ;;  %v3154_v61 = vmul.f32 0.5, %v3143_v53 }
0x1263   : > { %v3162_v37 = vmul.f32 %v3158_v58, %v3143_v53 }
0x1265   : > { %v3166_v60 = vmul.f32 %v3162_v37, %v3143_v53 }
0x1267   : > { %v3170_v45 = vadd.f32 %v3166_v60, %v3143_v53 }
0x1269   : > { %v3174_v42 = vmul.f32 0.7978846, %v3170_v45 }
0x126b   : > { %3836 = vtanh.f32 %v3174_v42 }
0x1271   : > { %v3837_v2 = vpop.eup %3836 }
0x1272   : > { %v3182_v30 = vadd.f32 1.0, %v3837_v2 }
0x1274   : > { %v3186_v19 = vmul.f32 %v3182_v30, %v3154_v61 }
0x1276   : > { %3228 = vmatmul.f32.vlgmr.msrb.gmra.mxu3 %v3186_v19 }
0x1279   : > { %v3009_v52 = vpop.xlane.xlu1 %3008 }
0x127a   : > { %v3015_v1 = vmul.f32 %v3009_v52, %v4049_v35 }
0x127c   : > { %v3019_v3 = vsub.f32 %v4934_v28, %v3015_v1 }
0x127e   : > { %v3023_v13 = vmul.f32 %v3019_v3, %v3019_v3 }
0x1280   : > { %v3031_v6 = vsel %vm697_vm1, %v3023_v13, 0.0 }
0x1281   : > { %3032 = vadd.xlane.f32.xlu1 %v3031_v6  ;;  %v3012_v16 = vpop.xlane.xlu2 %3011 }
0x1282   : > { %v3016_v0 = vmul.f32 %v3012_v16, %v4049_v35 }
0x1284   : > { %v5006_v54 = vsub.f32 %v4940_v9, %v3016_v0 }
0x1286   : > { %v3024_v11 = vmul.f32 %v5006_v54, %v5006_v54 }
0x1288   : > { %v3034_v5 = vsel %vm697_vm1, %v3024_v11, 0.0 }
0x1289   : > { %3035 = vadd.xlane.f32.xlu2 %v3034_v5 }
0x12ca   : > { %v3030_v24 = vpop.xlane.xlu0 %3029 }
0x12cb   : > { %v3038_v62 = vmul.f32 %v3030_v24, %v4049_v35 }
0x12cd   : > { %v3042_v12 = vadd.f32 1e-06, %v3038_v62 }
0x12cf   : > { %3838 = vrsqrt.f32 %v3042_v12  ;;  %vm3061_vm7 = vweird.f32 %v3042_v12 }
0x12d5   : > { %v3839_v7 = vpop.eup %3838 }
0x12d6   : > { %v3056_v51 = vmul.f32 %v3839_v7, %v3042_v12  ;;  %vm3062_vm6 = vweird.f32 %v3839_v7 }
0x12d7   : > { %vm3063_vm8 = vmor %vm3061_vm7, %vm3062_vm6 }
0x12d8   : > { %v3057_v26 = vmul.f32 %v3839_v7, %v3056_v51 }
0x12da   : > { %v3058_v14 = vmul.f32 0.5, %v3057_v26 }
0x12dc   : > { %v3059_v55 = vsub.f32 1.5, %v3058_v14 }
0x12de   : > { %v3060_v59 = vmul.f32 %v3839_v7, %v3059_v55 }
0x12e0   : > { %v3064_v34 = vsel %vm3063_vm8, %v3839_v7, %v3060_v59 }
0x12e1   : > { %v3086_v23 = vmul.f32 %v3064_v34, %v3018_v41 }
0x12e3   : > { %v3093_v32 = vmul.f32 %v4913_v22, %v3086_v23 }
0x12e5   : > { %v3100_v20 = vadd.f32 %v4921_v8, %v3093_v32 }
0x12e7   : > { %3530 = vmatmul.msk.f32.gmra.mxu1 %vm697_vm1, %v3100_v20 }
0x12f4   : > { %v3033_v39 = vpop.xlane.xlu1 %3032 }
0x12f5   : > { %v3039_v21 = vmul.f32 %v3033_v39, %v4049_v35 }
0x12f7   : > { %v3043_v17 = vadd.f32 1e-06, %v3039_v21 }
0x12f9   : > { %3840 = vrsqrt.f32 %v3043_v17  ;;  %v3229_v25 = vpop.f32.mrf.mxu3  ;;  %vm3071_vm10 = vweird.f32 %v3043_v17 }
0x12fa   : > { %v3230_v46 = vadd.f32 %v5019_v15, %v3229_v25 }
0x12fc   : > { %v3241_v27 = vadd.f32 %v3230_v46, %v4882_v36  ;;  %v3036_v38 = vpop.xlane.xlu2 %3035 }
0x12fd   : > { %v3040_v63 = vmul.f32 %v3036_v38, %v4049_v35 }
0x12fe   : > { %3245 = vst.msk [vmem:[#allocation2] sm:$0xff] %vm697_vm1, %v3241_v27 }
0x12ff   : > { %v3841_v40 = vpop.eup %3840  ;;  %v3044_v43 = vadd.f32 1e-06, %v3040_v63 }
0x1300   : > { %v3066_v50 = vmul.f32 %v3841_v40, %v3043_v17  ;;  %vm3072_vm9 = vweird.f32 %v3841_v40 }
0x1301   : > { %3842 = vrsqrt.f32 %v3044_v43  ;;  %vm3073_vm11 = vmor %vm3071_vm10, %vm3072_vm9  ;;  %vm3081_vm13 = vweird.f32 %v3044_v43 }
0x1302   : > { %v3067_v29 = vmul.f32 %v3841_v40, %v3066_v50 }
0x1304   : > { %v3068_v33 = vmul.f32 0.5, %v3067_v29  ;;  %v3278_v29 = vld [vmem:[%s5096_s19 + $0x10] sm:$0xff] }
0x1305   : > { %v3249_v44 = vld [vmem:[#allocation2] sm:$0x1] }
0x1306   : > { %v3069_v47 = vsub.f32 1.5, %v3068_v33  ;;  %v3252_v48 = vsel %vm705_vm2, %v3249_v44, 0.0  ;;  %v3277_v33 = vld [vmem:[%s5096_s19 + $0x8] sm:$0xff] }
0x1307   : > { %v3843_v49 = vpop.eup %3842  ;;  %3253 = vadd.xlane.f32.xlu0 %v3252_v48 }
0x1308   : > { %v3070_v41 = vmul.f32 %v3841_v40, %v3069_v47  ;;  %v3076_v36 = vmul.f32 %v3843_v49, %v3044_v43  ;;  %vm3082_vm12 = vweird.f32 %v3843_v49 }
0x1309   : > { %vm3083_vm14 = vmor %vm3081_vm13, %vm3082_vm12 }
0x130a   : > { %v3074_v57 = vsel %vm3073_vm11, %v3841_v40, %v3070_v41  ;;  %v3077_v31 = vmul.f32 %v3843_v49, %v3076_v36 }
0x130b   : > { %v3087_v10 = vmul.f32 %v3074_v57, %v3019_v3 }
0x130c   : > { %v3078_v56 = vmul.f32 0.5, %v3077_v31 }
0x130d   : > { %v3094_v53 = vmul.f32 %v4913_v22, %v3087_v10 }
0x130e   : > { %v3079_v58 = vsub.f32 1.5, %v3078_v56 }
0x130f   : > { %v3101_v37 = vadd.f32 %v4921_v8, %v3094_v53 }
0x1310   : > { %v3080_v60 = vmul.f32 %v3843_v49, %v3079_v58 }
0x1311   : > { %3531 = vmatmul.msk.f32.gmra.mxu1 %vm697_vm1, %v3101_v37 }
0x1312   : > { %v3084_v45 = vsel %vm3083_vm14, %v3843_v49, %v3080_v60 }
0x1313   : > { %v3088_v42 = vmul.f32 %v3084_v45, %v5006_v54 }
0x1315   : > { %v3095_v2 = vmul.f32 %v4913_v22, %v3088_v42 }
0x1317   : > { %v3102_v61 = vadd.f32 %v4921_v8, %v3095_v2 }
0x1319   : > { %3532 = vmatmul.msk.f32.gmra.mxu1 %vm697_vm1, %v3102_v61 }
0x1364   : > { %v3145_v30 = vpop.f32.mrf.mxu1 }
0x1365   : > { %v3146_v19 = vadd.f32 %v4998_v18, %v3145_v30 }
0x1367   : > { %v3159_v52 = vmul.f32 0.044715, %v3146_v19  ;;  %v3155_v0 = vmul.f32 0.5, %v3146_v19 }
0x1369   : > { %v3163_v1 = vmul.f32 %v3159_v52, %v3146_v19 }
0x136b   : > { %v3167_v3 = vmul.f32 %v3163_v1, %v3146_v19 }
0x136d   : > { %v3171_v13 = vadd.f32 %v3167_v3, %v3146_v19 }
0x136f   : > { %v3175_v6 = vmul.f32 0.7978846, %v3171_v13  ;;  %v3280_v13 = vld [vmem:[%s5097_s20] sm:$0x1] }
0x1371   : > { %3844 = vtanh.f32 %v3175_v6 }
0x1377   : > { %v3845_v16 = vpop.eup %3844 }
0x1378   : > { %v3183_v11 = vadd.f32 1.0, %v3845_v16 }
0x137a   : > { %v3254_v5 = vpop.xlane.xlu0 %3253  ;;  %v3187_v54 = vmul.f32 %v3183_v11, %v3155_v0 }
0x137b   : > { %v3255_v22 = vmul.f32 %v3254_v5, %v4049_v35 }
0x137c   : > { %3231 = vmatmul.f32.gmra.mxu3 %v3187_v54 }
0x137d   : > { %v3256_v8 = vsub.f32 %v3249_v44, %v3255_v22  ;;  %v3276_v44 = vld [vmem:[%s5096_s19] sm:$0xff] }
0x137f   : > { %v3257_v24 = vmul.f32 %v3256_v8, %v3256_v8 }
0x1381   : > { %v3258_v62 = vsel %vm705_vm2, %v3257_v24, 0.0 }
0x1382   : > { %3259 = vadd.xlane.f32.xlu1 %v3258_v62 }
0x138e   : > { %v3148_v12 = vpop.f32.mrf.mxu1 }
0x138f   : > { %v3149_v7 = vadd.f32 %v4998_v18, %v3148_v12 }
0x1391   : > { %v3160_v51 = vmul.f32 0.044715, %v3149_v7  ;;  %v3156_v46 = vmul.f32 0.5, %v3149_v7 }
0x1393   : > { %v3164_v26 = vmul.f32 %v3160_v51, %v3149_v7 }
0x1395   : > { %v3168_v14 = vmul.f32 %v3164_v26, %v3149_v7 }
0x1396   : > { %v3151_v55 = vpop.f32.mrf.mxu1 }
0x1397   : > { %v3152_v59 = vadd.f32 %v4998_v18, %v3151_v55  ;;  %v3172_v34 = vadd.f32 %v3168_v14, %v3149_v7  ;;  %v3279_v18 = vld [vmem:[%s5096_s19 + $0x18] sm:$0xff] }
0x1398   : > { %3296 = vmatpush.msrb.mxu2 %v3279_v18 }
0x1399   : > { %v3161_v23 = vmul.f32 0.044715, %v3152_v59  ;;  %v3176_v32 = vmul.f32 0.7978846, %v3172_v34  ;;  %v3157_v40 = vmul.f32 0.5, %v3152_v59 }
0x139a   : > { %3297 = vmatpush.msrb.mxu2 %v3278_v29 }
0x139b   : > { %3846 = vtanh.f32 %v3176_v32  ;;  %v3165_v20 = vmul.f32 %v3161_v23, %v3152_v59 }
0x139c   : > { %3298 = vmatpush.msrb.mxu2 %v3277_v33 }
0x139d   : > { %v3169_v39 = vmul.f32 %v3165_v20, %v3152_v59 }
0x139e   : > { %3299 = vmatpush.msrb.mxu2 %v3276_v44 }
0x139f   : > { %v3173_v21 = vadd.f32 %v3169_v39, %v3152_v59 }
0x13a1   : > { %v3847_v17 = vpop.eup %3846  ;;  %v3177_v25 = vmul.f32 0.7978846, %v3173_v21 }
0x13a2   : > { %v3184_v27 = vadd.f32 1.0, %v3847_v17 }
0x13a3   : > { %3848 = vtanh.f32 %v3177_v25 }
0x13a4   : > { %v3188_v38 = vmul.f32 %v3184_v27, %v3156_v46 }
0x13a6   : > { %3234 = vmatmul.f32.gmra.mxu3 %v3188_v38 }
0x13a9   : > { %v3849_v63 = vpop.eup %3848 }
0x13aa   : > { %v3185_v43 = vadd.f32 1.0, %v3849_v63 }
0x13ac   : > { %v3189_v50 = vmul.f32 %v3185_v43, %v3157_v40 }
0x13ae   : > { %3237 = vmatmul.f32.gmra.mxu3 %v3189_v50 }
0x13f5   : > { %v3260_v47 = vpop.xlane.xlu1 %3259 }
0x13f6   : > { %v3261_v48 = vmul.f32 %v3260_v47, %v4049_v35  ;;  %v3250_v35 = vld [vmem:[%s5094_s17] sm:$0x1] }
0x13f8   : > { %v3262_v49 = vadd.f32 1e-06, %v3261_v48 }
0x13fa   : > { %3850 = vrsqrt.f32 %v3262_v49  ;;  %vm3269_vm15 = vweird.f32 %v3262_v49 }
0x13ff   : > { %v3232_v41 = vpop.f32.mrf.mxu3 }
0x1400   : > { %v3851_v36 = vpop.eup %3850  ;;  %v3233_v57 = vadd.f32 %v5019_v15, %v3232_v41 }
0x1401   : > { %v3264_v31 = vmul.f32 %v3851_v36, %v3262_v49  ;;  %vm3270_vm2 = vweird.f32 %v3851_v36 }
0x1402   : > { %v3242_v10 = vadd.f32 %v3233_v57, %v4916_v4  ;;  %vm3271_vm4 = vmor %vm3269_vm15, %vm3270_vm2  ;;  %v3251_v4 = vld [vmem:[%s5095_s18] sm:$0x1] }
0x1403   : > { %v3265_v56 = vmul.f32 %v3851_v36, %v3264_v31 }
0x1404   : > { %3246 = vst.msk [vmem:[#allocation2 + $0x8] sm:$0xff] %vm697_vm1, %v3242_v10 }
0x1405   : > { %v3266_v53 = vmul.f32 0.5, %v3265_v56 }
0x1407   : > { %v3267_v58 = vsub.f32 1.5, %v3266_v53 }
0x1409   : > { %v3268_v37 = vmul.f32 %v3851_v36, %v3267_v58 }
0x140b   : > { %v3272_v60 = vsel %vm3271_vm4, %v3851_v36, %v3268_v37 }
0x140c   : > { %v3273_v45 = vmul.f32 %v3272_v60, %v3256_v8 }
0x140e   : > { %v3274_v42 = vmul.f32 %v3273_v45, %v3250_v35 }
0x1410   : > { %v3275_v2 = vadd.f32 %v3274_v42, %v3251_v4 }
0x1412   : > { %3550 = vmatmul.msk.f32.vlgmr.msrb.gmra.mxu2 %vm697_vm1, %v3275_v2 }
0x1429   : > { %v3235_v61 = vpop.f32.mrf.mxu3 }
0x142a   : > { %v3236_v30 = vadd.f32 %v5019_v15, %v3235_v61 }
0x142c   : > { %v3243_v19 = vadd.f32 %v3236_v30, %v4934_v28 }
0x142e   : > { %3247 = vst.msk [vmem:[#allocation2 + $0x10] sm:$0xff] %vm697_vm1, %v3243_v19 }
0x1431   : > { %v3238_v52 = vpop.f32.mrf.mxu3 }
0x1432   : > { %v3239_v1 = vadd.f32 %v5019_v15, %v3238_v52 }
0x1434   : > { %v3244_v3 = vadd.f32 %v3239_v1, %v4940_v9 }
0x1436   : > { %3248 = vst.msk [vmem:[#allocation2 + $0x18] sm:$0xff] %vm697_vm1, %v3244_v3 }
0x1495   : > { %v3301_v6 = vpop.f32.mrf.mxu2 }
0x1496   : > { %v3302_v16 = vadd.f32 %v3301_v6, %v3280_v13 }
0x1498   : > { %v3304_v28 = vperm.slane %v3302_v16, 0 }
0x149a   : > { %3305 = vst [vmem:[%s654_s22] sm:$0xff] %v3304_v28 }
0x149b PF: > { %s31_s2 = sadd.s32 1, %s3862_s2  }
0x149c   : > { %p28_p4 = scmp.ge.s32.totalorder %s31_s2, 4  }
0x149e   :  { %30 = sbr.rel (!%p28_p4) target bundleno = 7 (0x7), region = 146 }

</bundles_post_ra>
